<compile_context>
chip_gen: v7x
topology: tpu7x:2x2x1
jax: 0.10.0
libtpu: 0.0.40
codegen_flags: <defaults>
</compile_context>

<pallas_src>
import functools
import math

import jax
import jax.numpy as jnp
from jax.experimental import pallas as pl
from jax.experimental.pallas import tpu as pltpu

MATMUL_DTYPE = jnp.bfloat16            # MXU inputs; accumulation stays f32
VMEM_LIMIT_BYTES = 48 * 1024 * 1024    # > 16/32 MiB defaults, < v7x 64 MiB physical


# ------------------------------ small helpers --------------------------------

def _cost(flops, bytes_accessed, transcendentals=0):
    return pl.CostEstimate(flops=int(flops), transcendentals=int(transcendentals),
                           bytes_accessed=int(bytes_accessed))


def _nbytes(*arrays):
    return sum(int(a.size) * a.dtype.itemsize for a in arrays)


# ------------------------- in-kernel helper functions ------------------------

def _mm(a, w):
    """a: (R, K) activation (f32/bf16), w: (K, N) weight already stored in bf16."""
    return jnp.dot(a.astype(MATMUL_DTYPE), w, preferred_element_type=jnp.float32)


def _ln(x, g, b, eps=1e-5):
    mu = jnp.mean(x, axis=-1, keepdims=True)
    var = jnp.mean(jnp.square(x - mu), axis=-1, keepdims=True)
    return (x - mu) * jax.lax.rsqrt(var + eps) * g + b


def _gelu(x):
    # TODO(synk): GPT-2 uses the tanh approximation (gelu_new); if the reference
    # ViT blocks use exact erf-GELU the image-encoder activations drift slightly.
    c = math.sqrt(2.0 / math.pi)
    return 0.5 * x * (1.0 + jnp.tanh(c * (x + 0.044715 * x * x * x)))


def _mha_into(out_ref, q, k, v, *, B, Sq, Sk, H, causal):
    """q: (B*Sq, D) f32, k/v: (B*Sk, D) f32.  Writes the (B*Sq, D) multi-head
    attention output into the VMEM scratch `out_ref` (no concatenate copies)."""
    D = q.shape[-1]
    Dh = D // H
    scale = 1.0 / math.sqrt(Dh)
    if causal:
        row = jax.lax.broadcasted_iota(jnp.int32, (Sq, Sk), 0)
        col = jax.lax.broadcasted_iota(jnp.int32, (Sq, Sk), 1)
        keep = col <= row
    # TODO(synk): at production sizes (H=12, B>=8) replace this static unroll
    # with a fori_loop / paired-head (128-wide) batched contraction.
    for h in range(H):
        lo = h * Dh
        for b in range(B):
            qb = q[b * Sq:(b + 1) * Sq, lo:lo + Dh].astype(MATMUL_DTYPE)
            kb = k[b * Sk:(b + 1) * Sk, lo:lo + Dh].astype(MATMUL_DTYPE)
            vb = v[b * Sk:(b + 1) * Sk, lo:lo + Dh].astype(MATMUL_DTYPE)
            s = jax.lax.dot_general(
                qb, kb, (((1,), (1,)), ((), ())),
                preferred_element_type=jnp.float32) * scale
            if causal:
                s = jnp.where(keep, s, jnp.float32(-1e30))
            s = s - jnp.max(s, axis=-1, keepdims=True)
            p = jnp.exp(s)
            p = p * pl.reciprocal(jnp.sum(p, axis=-1, keepdims=True), approx=True)
            out_ref[b * Sq:(b + 1) * Sq, lo:lo + Dh] = jnp.dot(
                p.astype(MATMUL_DTYPE), vb, preferred_element_type=jnp.float32)
    return out_ref[...]


# ------------------------------ fused kernels --------------------------------

def _patch_embed_kernel(p_ref, w_ref, b_ref, cls_ref, pos_ref, o_ref, *, B, N):
    # Conv2d(kernel=stride=P) as a matmul, prepend cls token, add pos embedding.
    x = _mm(p_ref[...], w_ref[...]) + b_ref[...]            # (B*N, Dv)
    cls_row = cls_ref[...] + pos_ref[0:1, :]                # (1, Dv)
    pos_rest = pos_ref[1:, :]                               # (N, Dv)
    for b in range(B):
        o_ref[b * (N + 1):b * (N + 1) + 1, :] = cls_row
        o_ref[b * (N + 1) + 1:(b + 1) * (N + 1), :] = x[b * N:(b + 1) * N] + pos_rest


def _vit_stack_kernel(x_ref,
                      ln1_g, ln1_b, qkv_w, qkv_b, proj_w, proj_b,
                      ln2_g, ln2_b, fc_w, fc_b, fc2_w, fc2_b,
                      o_ref, state, attn, *, B, S, H):
    l = pl.program_id(0)
    D = x_ref.shape[-1]

    @pl.when(l == 0)
    def _():
        state[...] = x_ref[...]

    x = state[...]                                          # (B*S, Dv) f32
    # self-attention (non-causal)
    h = _ln(x, ln1_g[0], ln1_b[0])
    qkv = _mm(h, qkv_w[0]) + qkv_b[0]
    q, k, v = qkv[:, :D], qkv[:, D:2 * D], qkv[:, 2 * D:]
    a = _mha_into(attn, q, k, v, B=B, Sq=S, Sk=S, H=H, causal=False)
    x = x + _mm(a, proj_w[0]) + proj_b[0]
    # MLP
    h = _ln(x, ln2_g[0], ln2_b[0])
    h = _gelu(_mm(h, fc_w[0]) + fc_b[0])
    x = x + _mm(h, fc2_w[0]) + fc2_b[0]

    state[...] = x

    @pl.when(l == pl.num_programs(0) - 1)
    def _():
        o_ref[...] = x


def _gpt_stack_kernel(x_ref, vit_ref,
                      ln1_g, ln1_b, attn_w, attn_b, attnp_w, attnp_b,
                      ln3_g, ln3_b, cq_w, cq_b, ck_w, ck_b, cv_w, cv_b,
                      cp_w, cp_b, ln2_g, ln2_b, fc_w, fc_b, mp_w, mp_b,
                      o_ref, state, attn_sc, *, B, S, Nv, H):
    l = pl.program_id(0)
    D = x_ref.shape[-1]

    @pl.when(l == 0)
    def _():
        state[...] = x_ref[...]

    x = state[...]                                          # (B*S, D) f32
    vit = vit_ref[...]                                      # (B*Nv, Dv) bf16
    # causal self-attention
    h = _ln(x, ln1_g[0], ln1_b[0])
    qkv = _mm(h, attn_w[0]) + attn_b[0]
    q, k, v = qkv[:, :D], qkv[:, D:2 * D], qkv[:, 2 * D:]
    a = _mha_into(attn_sc, q, k, v, B=B, Sq=S, Sk=S, H=H, causal=True)
    x = x + _mm(a, attnp_w[0]) + attnp_b[0]
    # cross-attention: text queries, image keys/values
    h = _ln(x, ln3_g[0], ln3_b[0])
    q = _mm(h, cq_w[0]) + cq_b[0]
    k = _mm(vit, ck_w[0]) + ck_b[0]
    v = _mm(vit, cv_w[0]) + cv_b[0]
    a = _mha_into(attn_sc, q, k, v, B=B, Sq=S, Sk=Nv, H=H, causal=False)
    x = x + _mm(a, cp_w[0]) + cp_b[0]
    # MLP
    h = _ln(x, ln2_g[0], ln2_b[0])
    h = _gelu(_mm(h, fc_w[0]) + fc_b[0])
    x = x + _mm(h, mp_w[0]) + mp_b[0]

    state[...] = x

    @pl.when(l == pl.num_programs(0) - 1)
    def _():
        o_ref[...] = x


def _head_kernel(h_ref, g_ref, b_ref, wte_ref, o_ref):
    # ln_f on the (B, D) last-token rows, tied lm_head against a (TN, D) block
    # of wte streamed over the vocab grid (wte never fully resident in VMEM).
    hn = _ln(h_ref[...], g_ref[...], b_ref[...])
    o_ref[...] = jax.lax.dot_general(
        hn.astype(MATMUL_DTYPE), wte_ref[...],
        (((1,), (1,)), ((), ())), preferred_element_type=jnp.float32)


# ------------------------------ forward wrappers ------------------------------

VIT_STACK_ORDER = ('ln1_g', 'ln1_b', 'qkv_w', 'qkv_b', 'proj_w', 'proj_b',
                   'ln2_g', 'ln2_b', 'fc_w', 'fc_b', 'fc2_w', 'fc2_b')

GPT_STACK_ORDER = ('ln1_g', 'ln1_b', 'attn_w', 'attn_b', 'attnp_w', 'attnp_b',
                   'ln3_g', 'ln3_b', 'cq_w', 'cq_b', 'ck_w', 'ck_b',
                   'cv_w', 'cv_b', 'cp_w', 'cp_b', 'ln2_g', 'ln2_b',
                   'fc_w', 'fc_b', 'mp_w', 'mp_b')


def vit_stack_forward(stack, x, *, B, S, H, L):
    D = x.shape[-1]
    args = [x]
    in_specs = [pl.BlockSpec((B * S, D), lambda l: (0, 0))]          # resident
    for name in VIT_STACK_ORDER:
        w = stack[name]
        args.append(w)
        in_specs.append(pl.BlockSpec((1,) + w.shape[1:], lambda l: (l, 0, 0)))
    fl = L * (2 * B * S * 3 * D * D + 4 * B * S * S * D + 2 * B * S * D * D
              + 16 * B * S * D * D)
    tr = L * (B * H * S * S + 4 * B * S * D)
    return pl.pallas_call(
        functools.partial(_vit_stack_kernel, B=B, S=S, H=H),
        grid=(L,),
        out_shape=jax.ShapeDtypeStruct((B * S, D), jnp.float32),
        in_specs=in_specs,
        out_specs=pl.BlockSpec((B * S, D), lambda l: (0, 0)),
        scratch_shapes=[pltpu.VMEM((B * S, D), jnp.float32),   # running hidden state
                        pltpu.VMEM((B * S, D), jnp.float32)],  # attention output
        compiler_params=pltpu.CompilerParams(
            dimension_semantics=("arbitrary",),                # layer axis carries state
            vmem_limit_bytes=VMEM_LIMIT_BYTES),
        cost_estimate=_cost(fl, _nbytes(*args) + B * S * D * 4, tr),
    )(*args)


def gpt_stack_forward(stack, x, vit_hidden, *, B, S, Nv, H, L):
    D = x.shape[-1]
    Dv = vit_hidden.shape[-1]
    args = [x, vit_hidden]
    in_specs = [pl.BlockSpec((B * S, D), lambda l: (0, 0)),          # resident
                pl.BlockSpec((B * Nv, Dv), lambda l: (0, 0))]        # resident (bf16)
    for name in GPT_STACK_ORDER:
        w = stack[name]
        args.append(w)
        in_specs.append(pl.BlockSpec((1,) + w.shape[1:], lambda l: (l, 0, 0)))
    fl = L * (2 * B * S * 3 * D * D + 4 * B * S * S * D + 2 * B * S * D * D
              + 2 * B * S * D * D + 4 * B * Nv * Dv * D + 4 * B * S * Nv * D
              + 2 * B * S * D * D + 16 * B * S * D * D)
    tr = L * (B * H * S * S + B * H * S * Nv + 4 * B * S * D)
    return pl.pallas_call(
        functools.partial(_gpt_stack_kernel, B=B, S=S, Nv=Nv, H=H),
        grid=(L,),
        out_shape=jax.ShapeDtypeStruct((B * S, D), jnp.float32),
        in_specs=in_specs,
        out_specs=pl.BlockSpec((B * S, D), lambda l: (0, 0)),
        scratch_shapes=[pltpu.VMEM((B * S, D), jnp.float32),   # running hidden state
                        pltpu.VMEM((B * S, D), jnp.float32)],  # attention output
        compiler_params=pltpu.CompilerParams(
            dimension_semantics=("arbitrary",),
            vmem_limit_bytes=VMEM_LIMIT_BYTES),
        cost_estimate=_cost(fl, _nbytes(*args) + B * S * D * 4, tr),
    )(*args)


def lm_head_forward(h_last, ln_g, ln_b, wte_bf16):
    B, D = h_last.shape
    V = wte_bf16.shape[0]
    TN = V if V <= 1024 else 1024                      # vocab tile (multiple of 128)
    return pl.pallas_call(
        _head_kernel,
        grid=(pl.cdiv(V, TN),),
        out_shape=jax.ShapeDtypeStruct((B, V), jnp.float32),
        in_specs=[pl.BlockSpec((B, D), lambda j: (0, 0)),
                  pl.BlockSpec((1, D), lambda j: (0, 0)),
                  pl.BlockSpec((1, D), lambda j: (0, 0)),
                  pl.BlockSpec((TN, D), lambda j: (j, 0))],   # stream wte blocks
        out_specs=pl.BlockSpec((B, TN), lambda j: (0, j)),
        compiler_params=pltpu.CompilerParams(
            dimension_semantics=("parallel",),                # shards across TCs (v7x)
            vmem_limit_bytes=VMEM_LIMIT_BYTES),
        cost_estimate=_cost(2 * B * D * V, V * D * 2 + B * D * 4 + B * V * 4),
    )(h_last, ln_g, ln_b, wte_bf16)


def image_encoder_forward(pp, image, cfg):
    B, C, Himg, Wimg = image.shape
    P = cfg['patch']
    ph, pw = Himg // P, Wimg // P
    N = ph * pw
    Dv = cfg['vit_embed']
    # Patch extraction (wrapper glue, PyTorch (C, P, P) flatten order).
    patches = (image.reshape(B, C, ph, P, pw, P)
                    .transpose(0, 2, 4, 1, 3, 5)
                    .reshape(B * N, C * P * P).astype(jnp.float32))
    x = pl.pallas_call(
        functools.partial(_patch_embed_kernel, B=B, N=N),
        out_shape=jax.ShapeDtypeStruct((B * (N + 1), Dv), jnp.float32),
        compiler_params=pltpu.CompilerParams(vmem_limit_bytes=VMEM_LIMIT_BYTES),
        cost_estimate=_cost(2 * B * N * C * P * P * Dv,
                            B * N * C * P * P * 4 + C * P * P * Dv * 2
                            + B * (N + 1) * Dv * 4),
    )(patches, pp['patch_w'], pp['patch_b'], pp['cls_token'], pp['pos_embed'])
    return vit_stack_forward(pp['stack'], x, B=B, S=N + 1,
                             H=cfg['vit_heads'], L=cfg['vit_depth'])


def cross_attention_model_forward(params, image, token_ids, cfg):
    B, S = token_ids.shape
    D = cfg['embed']
    Nv = (cfg['img'] // cfg['patch']) ** 2 + 1

    enriched = image_encoder_forward(params['vit'], image, cfg)     # (B*Nv, Dv) f32
    # TODO(synk): exact ImageEncoder.add_pos_embed source unavailable; modeled
    # as re-adding the learned positional embedding (pos_drop is identity).
    pos = params['vit']['pos_embed']                                # (Nv, Dv)
    vit_hidden = (enriched + jnp.tile(pos, (B, 1))).astype(MATMUL_DTYPE)  # bf16 once

    tok_emb = params['wte'][token_ids].astype(jnp.float32)          # gather (glue)
    pos_emb = params['wpe'][:S].astype(jnp.float32)
    x = (tok_emb + pos_emb[None]).reshape(B * S, D)

    x = gpt_stack_forward(params['gpt_stack'], x, vit_hidden,
                          B=B, S=S, Nv=Nv, H=cfg['heads'], L=cfg['depth'])

    h_last = x.reshape(B, S, D)[:, -1, :]                           # (B, D) only
    logits = lm_head_forward(h_last, params['ln_f_g'], params['ln_f_b'],
                             params['wte'])
    return logits[:, None, :]                                       # (B, 1, vocab)


# ------------------------------- parameter init -------------------------------

class KeyGen:
    def __init__(self, seed):
        self._key = jax.random.PRNGKey(seed)

    def __call__(self):
        self._key, sub = jax.random.split(self._key)
        return sub


def init_params(seed, cfg):
    """Parameters pre-packed for the kernels: per-layer weights stacked into
    (L, ...) arrays; matmul weights cast to bf16 once; LN / bias params f32."""
    kg = KeyGen(seed)
    bf = MATMUL_DTYPE
    D, V, S = cfg['embed'], cfg['vocab'], cfg['seq_len']
    Dv, L, Lv = cfg['vit_embed'], cfg['depth'], cfg['vit_depth']
    C, P = cfg['channels'], cfg['patch']
    Nv = (cfg['img'] // P) ** 2 + 1

    def nrm(shape, dtype=jnp.float32, std=0.02):
        return (std * jax.random.normal(kg(), shape, jnp.float32)).astype(dtype)

    def ones(shape):
        return jnp.ones(shape, jnp.float32)

    def zeros(shape):
        return jnp.zeros(shape, jnp.float32)

    params = {
        'wte': nrm((V, D), bf),                 # tied embedding / lm_head (streamed)
        'wpe': nrm((S, D)),
        'ln_f_g': ones((1, D)), 'ln_f_b': zeros((1, D)),
        'gpt_stack': {
            'ln1_g': ones((L, 1, D)), 'ln1_b': zeros((L, 1, D)),
            'attn_w': nrm((L, D, 3 * D), bf), 'attn_b': zeros((L, 1, 3 * D)),
            'attnp_w': nrm((L, D, D), bf), 'attnp_b': zeros((L, 1, D)),
            'ln3_g': ones((L, 1, D)), 'ln3_b': zeros((L, 1, D)),
            'cq_w': nrm((L, D, D), bf), 'cq_b': zeros((L, 1, D)),
            'ck_w': nrm((L, Dv, D), bf), 'ck_b': zeros((L, 1, D)),
            'cv_w': nrm((L, Dv, D), bf), 'cv_b': zeros((L, 1, D)),
            'cp_w': nrm((L, D, D), bf), 'cp_b': zeros((L, 1, D)),
            'ln2_g': ones((L, 1, D)), 'ln2_b': zeros((L, 1, D)),
            'fc_w': nrm((L, D, 4 * D), bf), 'fc_b': zeros((L, 1, 4 * D)),
            'mp_w': nrm((L, 4 * D, D), bf), 'mp_b': zeros((L, 1, D)),
        },
        'vit': {
            'patch_w': nrm((C * P * P, Dv), bf),   # Conv2d weight as (C*P*P, Dv)
            'patch_b': zeros((1, Dv)),
            'cls_token': nrm((1, Dv)),
            'pos_embed': nrm((Nv, Dv)),
            'stack': {
                'ln1_g': ones((Lv, 1, Dv)), 'ln1_b': zeros((Lv, 1, Dv)),
                'qkv_w': nrm((Lv, Dv, 3 * Dv), bf), 'qkv_b': zeros((Lv, 1, 3 * Dv)),
                'proj_w': nrm((Lv, Dv, Dv), bf), 'proj_b': zeros((Lv, 1, Dv)),
                'ln2_g': ones((Lv, 1, Dv)), 'ln2_b': zeros((Lv, 1, Dv)),
                'fc_w': nrm((Lv, Dv, 4 * Dv), bf), 'fc_b': zeros((Lv, 1, 4 * Dv)),
                'fc2_w': nrm((Lv, 4 * Dv, Dv), bf), 'fc2_b': zeros((Lv, 1, Dv)),
            },
        },
    }
    return params


# ------------------------------------ main ------------------------------------

if __name__ == "__main__":
    cfg = dict(vocab=64, embed=32, seq_len=8, depth=2, heads=4,
               img=16, channels=3, patch=8, vit_embed=32, vit_depth=2, vit_heads=4)

    params = init_params(0, cfg)

    key = jax.random.PRNGKey(0)
    k_img, k_tok = jax.random.split(key)
    image = jax.random.normal(
        k_img, (2, cfg['channels'], cfg['img'], cfg['img']), jnp.float32)  # NCHW
    token_ids = jax.random.randint(k_tok, (2, cfg['seq_len']), 0, cfg['vocab'])

    fwd = jax.jit(lambda p, im, tok: cross_attention_model_forward(p, im, tok, cfg))
    logits = jax.block_until_ready(fwd(params, image, token_ids))

    assert logits.shape == (2, 1, cfg['vocab'])
    assert bool(jnp.all(jnp.isfinite(logits)))
    print("KERNEL_OK")
</pallas_src>

<mosaic_0001>
module attributes {stable_mosaic.version = 11 : i64} {
  func.func @_patch_embed_kernel(%arg0: memref<8x192xf32, #tpu.memory_space<vmem>>, %arg1: memref<192x32xbf16, #tpu.memory_space<vmem>>, %arg2: memref<1x32xf32, #tpu.memory_space<vmem>>, %arg3: memref<1x32xf32, #tpu.memory_space<vmem>>, %arg4: memref<5x32xf32, #tpu.memory_space<vmem>>, %arg5: memref<10x32xf32, #tpu.memory_space<vmem>>) attributes {dimension_semantics = [], scalar_prefetch = 0 : i64, scratch_operands = 0 : i64, tpu.core_type = #tpu.core_type<tc>} {
    %c0 = arith.constant 0 : index
    %c0_0 = arith.constant 0 : index
    %0 = vector.load %arg0[%c0, %c0_0] : memref<8x192xf32, #tpu.memory_space<vmem>>, vector<8x192xf32>
    %c0_1 = arith.constant 0 : index
    %c0_2 = arith.constant 0 : index
    %1 = vector.load %arg1[%c0_1, %c0_2] : memref<192x32xbf16, #tpu.memory_space<vmem>>, vector<192x32xbf16>
    %2 = arith.truncf %0 : vector<8x192xf32> to vector<8x192xbf16>
    %cst = arith.constant dense<0.000000e+00> : vector<8x32xf32>
    %3 = tpu.matmul %2, %1, %cst {dimension_numbers = #tpu.dot_dimension_numbers<[1], [0], [0], [1], [0, 0, 1, 1], [], []>} : vector<8x192xbf16>, vector<192x32xbf16>, vector<8x32xf32> -> vector<8x32xf32>
    %c0_3 = arith.constant 0 : index
    %c0_4 = arith.constant 0 : index
    %4 = vector.load %arg2[%c0_3, %c0_4] : memref<1x32xf32, #tpu.memory_space<vmem>>, vector<1x32xf32>
    %5 = vector.broadcast %4 : vector<1x32xf32> to vector<8x32xf32>
    %6 = arith.addf %3, %5 : vector<8x32xf32>
    %c0_5 = arith.constant 0 : index
    %c0_6 = arith.constant 0 : index
    %7 = vector.load %arg3[%c0_5, %c0_6] : memref<1x32xf32, #tpu.memory_space<vmem>>, vector<1x32xf32>
    %c0_7 = arith.constant 0 : index
    %c0_8 = arith.constant 0 : index
    %8 = vector.load %arg4[%c0_7, %c0_8] : memref<5x32xf32, #tpu.memory_space<vmem>>, vector<1x32xf32>
    %9 = arith.addf %7, %8 : vector<1x32xf32>
    %c1 = arith.constant 1 : index
    %c0_9 = arith.constant 0 : index
    %10 = vector.load %arg4[%c1, %c0_9] : memref<5x32xf32, #tpu.memory_space<vmem>>, vector<4x32xf32>
    %c0_10 = arith.constant 0 : index
    %c0_11 = arith.constant 0 : index
    %11 = vector.load %arg5[%c0_10, %c0_11] : memref<10x32xf32, #tpu.memory_space<vmem>>, vector<1x32xf32>
    tpu.vector_store %arg5[%c0_10, %c0_11], %9 {strides = array<i32>} : memref<10x32xf32, #tpu.memory_space<vmem>>, vector<1x32xf32>,
    %12 = vector.extract_strided_slice %6 {offsets = [0, 0], sizes = [4, 32], strides = [1, 1]} : vector<8x32xf32> to vector<4x32xf32>
    %13 = arith.addf %12, %10 : vector<4x32xf32>
    %c1_12 = arith.constant 1 : index
    %c0_13 = arith.constant 0 : index
    %14 = vector.load %arg5[%c1_12, %c0_13] : memref<10x32xf32, #tpu.memory_space<vmem>>, vector<4x32xf32>
    tpu.vector_store %arg5[%c1_12, %c0_13], %13 {strides = array<i32>} : memref<10x32xf32, #tpu.memory_space<vmem>>, vector<4x32xf32>,
    %c5 = arith.constant 5 : index
    %c0_14 = arith.constant 0 : index
    %15 = vector.load %arg5[%c5, %c0_14] : memref<10x32xf32, #tpu.memory_space<vmem>>, vector<1x32xf32>
    tpu.vector_store %arg5[%c5, %c0_14], %9 {strides = array<i32>} : memref<10x32xf32, #tpu.memory_space<vmem>>, vector<1x32xf32>,
    %16 = vector.extract_strided_slice %6 {offsets = [4, 0], sizes = [4, 32], strides = [1, 1]} : vector<8x32xf32> to vector<4x32xf32>
    %17 = arith.addf %16, %10 : vector<4x32xf32>
    %c6 = arith.constant 6 : index
    %c0_15 = arith.constant 0 : index
    %18 = vector.load %arg5[%c6, %c0_15] : memref<10x32xf32, #tpu.memory_space<vmem>>, vector<4x32xf32>
    tpu.vector_store %arg5[%c6, %c0_15], %17 {strides = array<i32>} : memref<10x32xf32, #tpu.memory_space<vmem>>, vector<4x32xf32>,
    return
  }
}

module attributes {stable_mosaic.version = 11 : i64} {
  func.func @_vit_stack_kernel(%arg0: i32, %arg1: memref<10x32xf32, #tpu.memory_space<vmem>>, %arg2: memref<1x1x32xf32, #tpu.memory_space<vmem>>, %arg3: memref<1x1x32xf32, #tpu.memory_space<vmem>>, %arg4: memref<1x32x96xbf16, #tpu.memory_space<vmem>>, %arg5: memref<1x1x96xf32, #tpu.memory_space<vmem>>, %arg6: memref<1x32x32xbf16, #tpu.memory_space<vmem>>, %arg7: memref<1x1x32xf32, #tpu.memory_space<vmem>>, %arg8: memref<1x1x32xf32, #tpu.memory_space<vmem>>, %arg9: memref<1x1x32xf32, #tpu.memory_space<vmem>>, %arg10: memref<1x32x128xbf16, #tpu.memory_space<vmem>>, %arg11: memref<1x1x128xf32, #tpu.memory_space<vmem>>, %arg12: memref<1x128x32xbf16, #tpu.memory_space<vmem>>, %arg13: memref<1x1x32xf32, #tpu.memory_space<vmem>>, %arg14: memref<10x32xf32, #tpu.memory_space<vmem>>, %arg15: memref<10x32xf32, #tpu.memory_space<vmem>>, %arg16: memref<10x32xf32, #tpu.memory_space<vmem>>) attributes {dimension_semantics = [#tpu.dimension_semantics<arbitrary>], iteration_bounds = array<i64: 2>, scalar_prefetch = 0 : i64, scratch_operands = 2 : i64, tpu.core_type = #tpu.core_type<tc>, window_params = [{pipeline_mode = #tpu.pipeline_mode<synchronous>, transform_indices = @transform_0, window_bounds = array<i64: 10, 32>}, {transform_indices = @transform_1, window_bounds = array<i64: 1, 1, 32>}, {transform_indices = @transform_2, window_bounds = array<i64: 1, 1, 32>}, {transform_indices = @transform_3, window_bounds = array<i64: 1, 32, 96>}, {transform_indices = @transform_4, window_bounds = array<i64: 1, 1, 96>}, {transform_indices = @transform_5, window_bounds = array<i64: 1, 32, 32>}, {transform_indices = @transform_6, window_bounds = array<i64: 1, 1, 32>}, {transform_indices = @transform_7, window_bounds = array<i64: 1, 1, 32>}, {transform_indices = @transform_8, window_bounds = array<i64: 1, 1, 32>}, {transform_indices = @transform_9, window_bounds = array<i64: 1, 32, 128>}, {transform_indices = @transform_10, window_bounds = array<i64: 1, 1, 128>}, {transform_indices = @transform_11, window_bounds = array<i64: 1, 128, 32>}, {transform_indices = @transform_12, window_bounds = array<i64: 1, 1, 32>}, {pipeline_mode = #tpu.pipeline_mode<synchronous>, transform_indices = @transform_13, window_bounds = array<i64: 10, 32>}]} {
    %c0_i32 = arith.constant 0 : i32
    %0 = arith.cmpi eq, %arg0, %c0_i32 : i32
    %1 = arith.extui %0 : i1 to i32
    %c0_i32_0 = arith.constant 0 : i32
    %2 = arith.cmpi ne, %1, %c0_i32_0 : i32
    scf.if %2 {
      %c0_112 = arith.constant 0 : index
      %c0_113 = arith.constant 0 : index
      %287 = vector.load %arg1[%c0_112, %c0_113] : memref<10x32xf32, #tpu.memory_space<vmem>>, vector<10x32xf32>
      %c0_114 = arith.constant 0 : index
      %c0_115 = arith.constant 0 : index
      %288 = vector.load %arg15[%c0_114, %c0_115] : memref<10x32xf32, #tpu.memory_space<vmem>>, vector<10x32xf32>
      tpu.vector_store %arg15[%c0_114, %c0_115], %287 {strides = array<i32>} : memref<10x32xf32, #tpu.memory_space<vmem>>, vector<10x32xf32>,
    } else {
    }
    %c0 = arith.constant 0 : index
    %c0_1 = arith.constant 0 : index
    %3 = vector.load %arg15[%c0, %c0_1] : memref<10x32xf32, #tpu.memory_space<vmem>>, vector<10x32xf32>
    %c0_2 = arith.constant 0 : index
    %c0_3 = arith.constant 0 : index
    %c0_4 = arith.constant 0 : index
    %4 = vector.load %arg2[%c0_2, %c0_3, %c0_4] : memref<1x1x32xf32, #tpu.memory_space<vmem>>, vector<1x1x32xf32>
    %5 = vector.shape_cast %4 : vector<1x1x32xf32> to vector<1x32xf32>
    %c0_5 = arith.constant 0 : index
    %c0_6 = arith.constant 0 : index
    %c0_7 = arith.constant 0 : index
    %6 = vector.load %arg3[%c0_5, %c0_6, %c0_7] : memref<1x1x32xf32, #tpu.memory_space<vmem>>, vector<1x1x32xf32>
    %7 = vector.shape_cast %6 : vector<1x1x32xf32> to vector<1x32xf32>
    %cst = arith.constant dense<0.000000e+00> : vector<10xf32>
    %8 = vector.multi_reduction <add>, %3, %cst [1] : vector<10x32xf32> to vector<10xf32>
    %9 = vector.shape_cast %8 : vector<10xf32> to vector<10x1xf32>
    %cst_8 = arith.constant 3.200000e+01 : f32
    %10 = vector.broadcast %cst_8 : f32 to vector<10x1xf32>
    %11 = arith.divf %9, %10 : vector<10x1xf32>
    %12 = vector.broadcast %11 : vector<10x1xf32> to vector<10x32xf32>
    %13 = arith.subf %3, %12 : vector<10x32xf32>
    %14 = arith.mulf %13, %13 : vector<10x32xf32>
    %cst_9 = arith.constant dense<0.000000e+00> : vector<10xf32>
    %15 = vector.multi_reduction <add>, %14, %cst_9 [1] : vector<10x32xf32> to vector<10xf32>
    %16 = vector.shape_cast %15 : vector<10xf32> to vector<10x1xf32>
    %cst_10 = arith.constant 3.200000e+01 : f32
    %17 = vector.broadcast %cst_10 : f32 to vector<10x1xf32>
    %18 = arith.divf %16, %17 : vector<10x1xf32>
    %19 = vector.broadcast %11 : vector<10x1xf32> to vector<10x32xf32>
    %20 = arith.subf %3, %19 : vector<10x32xf32>
    %cst_11 = arith.constant 9.99999974E-6 : f32
    %21 = vector.broadcast %cst_11 : f32 to vector<10x1xf32>
    %22 = arith.addf %18, %21 : vector<10x1xf32>
    %23 = math.rsqrt %22 : vector<10x1xf32>
    %24 = vector.broadcast %23 : vector<10x1xf32> to vector<10x32xf32>
    %25 = arith.mulf %20, %24 : vector<10x32xf32>
    %26 = vector.broadcast %5 : vector<1x32xf32> to vector<10x32xf32>
    %27 = arith.mulf %25, %26 : vector<10x32xf32>
    %28 = vector.broadcast %7 : vector<1x32xf32> to vector<10x32xf32>
    %29 = arith.addf %27, %28 : vector<10x32xf32>
    %c0_12 = arith.constant 0 : index
    %c0_13 = arith.constant 0 : index
    %c0_14 = arith.constant 0 : index
    %30 = vector.load %arg4[%c0_12, %c0_13, %c0_14] : memref<1x32x96xbf16, #tpu.memory_space<vmem>>, vector<1x32x96xbf16>
    %31 = vector.shape_cast %30 : vector<1x32x96xbf16> to vector<32x96xbf16>
    %32 = arith.truncf %29 : vector<10x32xf32> to vector<10x32xbf16>
    %cst_15 = arith.constant dense<0.000000e+00> : vector<10x96xf32>
    %33 = tpu.matmul %32, %31, %cst_15 {dimension_numbers = #tpu.dot_dimension_numbers<[1], [0], [0], [1], [0, 0, 1, 1], [], []>} : vector<10x32xbf16>, vector<32x96xbf16>, vector<10x96xf32> -> vector<10x96xf32>
    %c0_16 = arith.constant 0 : index
    %c0_17 = arith.constant 0 : index
    %c0_18 = arith.constant 0 : index
    %34 = vector.load %arg5[%c0_16, %c0_17, %c0_18] : memref<1x1x96xf32, #tpu.memory_space<vmem>>, vector<1x1x96xf32>
    %35 = vector.shape_cast %34 : vector<1x1x96xf32> to vector<1x96xf32>
    %36 = vector.broadcast %35 : vector<1x96xf32> to vector<10x96xf32>
    %37 = arith.addf %33, %36 : vector<10x96xf32>
    %38 = vector.extract_strided_slice %37 {offsets = [0, 0], sizes = [10, 32], strides = [1, 1]} : vector<10x96xf32> to vector<10x32xf32>
    %39 = vector.extract_strided_slice %37 {offsets = [0, 32], sizes = [10, 32], strides = [1, 1]} : vector<10x96xf32> to vector<10x32xf32>
    %40 = vector.extract_strided_slice %37 {offsets = [0, 64], sizes = [10, 32], strides = [1, 1]} : vector<10x96xf32> to vector<10x32xf32>
    %41 = vector.extract_strided_slice %38 {offsets = [0, 0], sizes = [5, 8], strides = [1, 1]} : vector<10x32xf32> to vector<5x8xf32>
    %42 = arith.truncf %41 : vector<5x8xf32> to vector<5x8xbf16>
    %43 = vector.extract_strided_slice %39 {offsets = [0, 0], sizes = [5, 8], strides = [1, 1]} : vector<10x32xf32> to vector<5x8xf32>
    %44 = arith.truncf %43 : vector<5x8xf32> to vector<5x8xbf16>
    %45 = vector.extract_strided_slice %40 {offsets = [0, 0], sizes = [5, 8], strides = [1, 1]} : vector<10x32xf32> to vector<5x8xf32>
    %46 = arith.truncf %45 : vector<5x8xf32> to vector<5x8xbf16>
    %cst_19 = arith.constant dense<0.000000e+00> : vector<5x5xf32>
    %47 = tpu.matmul %42, %44, %cst_19 {dimension_numbers = #tpu.dot_dimension_numbers<[1], [1], [0], [0], [0, 0, 1, 0], [], []>} : vector<5x8xbf16>, vector<5x8xbf16>, vector<5x5xf32> -> vector<5x5xf32>
    %cst_20 = arith.constant 0.353553385 : f32
    %48 = vector.broadcast %cst_20 : f32 to vector<5x5xf32>
    %49 = arith.mulf %47, %48 : vector<5x5xf32>
    %cst_21 = arith.constant dense<0xFF800000> : vector<5xf32>
    %50 = vector.multi_reduction <maximumf>, %49, %cst_21 [1] : vector<5x5xf32> to vector<5xf32>
    %51 = vector.shape_cast %50 : vector<5xf32> to vector<5x1xf32>
    %52 = vector.broadcast %51 : vector<5x1xf32> to vector<5x5xf32>
    %53 = arith.subf %49, %52 : vector<5x5xf32>
    %54 = math.exp %53 : vector<5x5xf32>
    %cst_22 = arith.constant dense<0.000000e+00> : vector<5xf32>
    %55 = vector.multi_reduction <add>, %54, %cst_22 [1] : vector<5x5xf32> to vector<5xf32>
    %56 = vector.shape_cast %55 : vector<5xf32> to vector<5x1xf32>
    %57 = tpu.reciprocal %56 {approx = true} : vector<5x1xf32> -> vector<5x1xf32>
    %58 = vector.broadcast %57 : vector<5x1xf32> to vector<5x5xf32>
    %59 = arith.mulf %54, %58 : vector<5x5xf32>
    %60 = arith.truncf %59 : vector<5x5xf32> to vector<5x5xbf16>
    %cst_23 = arith.constant dense<0.000000e+00> : vector<5x8xf32>
    %61 = tpu.matmul %60, %46, %cst_23 {dimension_numbers = #tpu.dot_dimension_numbers<[1], [0], [0], [1], [0, 0, 1, 1], [], []>} : vector<5x5xbf16>, vector<5x8xbf16>, vector<5x8xf32> -> vector<5x8xf32>
    %c0_24 = arith.constant 0 : index
    %c0_25 = arith.constant 0 : index
    %62 = vector.load %arg16[%c0_24, %c0_25] : memref<10x32xf32, #tpu.memory_space<vmem>>, vector<5x8xf32>
    tpu.vector_store %arg16[%c0_24, %c0_25], %61 {strides = array<i32>} : memref<10x32xf32, #tpu.memory_space<vmem>>, vector<5x8xf32>,
    %63 = vector.extract_strided_slice %38 {offsets = [5, 0], sizes = [5, 8], strides = [1, 1]} : vector<10x32xf32> to vector<5x8xf32>
    %64 = arith.truncf %63 : vector<5x8xf32> to vector<5x8xbf16>
    %65 = vector.extract_strided_slice %39 {offsets = [5, 0], sizes = [5, 8], strides = [1, 1]} : vector<10x32xf32> to vector<5x8xf32>
    %66 = arith.truncf %65 : vector<5x8xf32> to vector<5x8xbf16>
    %67 = vector.extract_strided_slice %40 {offsets = [5, 0], sizes = [5, 8], strides = [1, 1]} : vector<10x32xf32> to vector<5x8xf32>
    %68 = arith.truncf %67 : vector<5x8xf32> to vector<5x8xbf16>
    %cst_26 = arith.constant dense<0.000000e+00> : vector<5x5xf32>
    %69 = tpu.matmul %64, %66, %cst_26 {dimension_numbers = #tpu.dot_dimension_numbers<[1], [1], [0], [0], [0, 0, 1, 0], [], []>} : vector<5x8xbf16>, vector<5x8xbf16>, vector<5x5xf32> -> vector<5x5xf32>
    %cst_27 = arith.constant 0.353553385 : f32
    %70 = vector.broadcast %cst_27 : f32 to vector<5x5xf32>
    %71 = arith.mulf %69, %70 : vector<5x5xf32>
    %cst_28 = arith.constant dense<0xFF800000> : vector<5xf32>
    %72 = vector.multi_reduction <maximumf>, %71, %cst_28 [1] : vector<5x5xf32> to vector<5xf32>
    %73 = vector.shape_cast %72 : vector<5xf32> to vector<5x1xf32>
    %74 = vector.broadcast %73 : vector<5x1xf32> to vector<5x5xf32>
    %75 = arith.subf %71, %74 : vector<5x5xf32>
    %76 = math.exp %75 : vector<5x5xf32>
    %cst_29 = arith.constant dense<0.000000e+00> : vector<5xf32>
    %77 = vector.multi_reduction <add>, %76, %cst_29 [1] : vector<5x5xf32> to vector<5xf32>
    %78 = vector.shape_cast %77 : vector<5xf32> to vector<5x1xf32>
    %79 = tpu.reciprocal %78 {approx = true} : vector<5x1xf32> -> vector<5x1xf32>
    %80 = vector.broadcast %79 : vector<5x1xf32> to vector<5x5xf32>
    %81 = arith.mulf %76, %80 : vector<5x5xf32>
    %82 = arith.truncf %81 : vector<5x5xf32> to vector<5x5xbf16>
    %cst_30 = arith.constant dense<0.000000e+00> : vector<5x8xf32>
    %83 = tpu.matmul %82, %68, %cst_30 {dimension_numbers = #tpu.dot_dimension_numbers<[1], [0], [0], [1], [0, 0, 1, 1], [], []>} : vector<5x5xbf16>, vector<5x8xbf16>, vector<5x8xf32> -> vector<5x8xf32>
    %c5 = arith.constant 5 : index
    %c0_31 = arith.constant 0 : index
    %84 = vector.load %arg16[%c5, %c0_31] : memref<10x32xf32, #tpu.memory_space<vmem>>, vector<5x8xf32>
    tpu.vector_store %arg16[%c5, %c0_31], %83 {strides = array<i32>} : memref<10x32xf32, #tpu.memory_space<vmem>>, vector<5x8xf32>,
    %85 = vector.extract_strided_slice %38 {offsets = [0, 8], sizes = [5, 8], strides = [1, 1]} : vector<10x32xf32> to vector<5x8xf32>
    %86 = arith.truncf %85 : vector<5x8xf32> to vector<5x8xbf16>
    %87 = vector.extract_strided_slice %39 {offsets = [0, 8], sizes = [5, 8], strides = [1, 1]} : vector<10x32xf32> to vector<5x8xf32>
    %88 = arith.truncf %87 : vector<5x8xf32> to vector<5x8xbf16>
    %89 = vector.extract_strided_slice %40 {offsets = [0, 8], sizes = [5, 8], strides = [1, 1]} : vector<10x32xf32> to vector<5x8xf32>
    %90 = arith.truncf %89 : vector<5x8xf32> to vector<5x8xbf16>
    %cst_32 = arith.constant dense<0.000000e+00> : vector<5x5xf32>
    %91 = tpu.matmul %86, %88, %cst_32 {dimension_numbers = #tpu.dot_dimension_numbers<[1], [1], [0], [0], [0, 0, 1, 0], [], []>} : vector<5x8xbf16>, vector<5x8xbf16>, vector<5x5xf32> -> vector<5x5xf32>
    %cst_33 = arith.constant 0.353553385 : f32
    %92 = vector.broadcast %cst_33 : f32 to vector<5x5xf32>
    %93 = arith.mulf %91, %92 : vector<5x5xf32>
    %cst_34 = arith.constant dense<0xFF800000> : vector<5xf32>
    %94 = vector.multi_reduction <maximumf>, %93, %cst_34 [1] : vector<5x5xf32> to vector<5xf32>
    %95 = vector.shape_cast %94 : vector<5xf32> to vector<5x1xf32>
    %96 = vector.broadcast %95 : vector<5x1xf32> to vector<5x5xf32>
    %97 = arith.subf %93, %96 : vector<5x5xf32>
    %98 = math.exp %97 : vector<5x5xf32>
    %cst_35 = arith.constant dense<0.000000e+00> : vector<5xf32>
    %99 = vector.multi_reduction <add>, %98, %cst_35 [1] : vector<5x5xf32> to vector<5xf32>
    %100 = vector.shape_cast %99 : vector<5xf32> to vector<5x1xf32>
    %101 = tpu.reciprocal %100 {approx = true} : vector<5x1xf32> -> vector<5x1xf32>
    %102 = vector.broadcast %101 : vector<5x1xf32> to vector<5x5xf32>
    %103 = arith.mulf %98, %102 : vector<5x5xf32>
    %104 = arith.truncf %103 : vector<5x5xf32> to vector<5x5xbf16>
    %cst_36 = arith.constant dense<0.000000e+00> : vector<5x8xf32>
    %105 = tpu.matmul %104, %90, %cst_36 {dimension_numbers = #tpu.dot_dimension_numbers<[1], [0], [0], [1], [0, 0, 1, 1], [], []>} : vector<5x5xbf16>, vector<5x8xbf16>, vector<5x8xf32> -> vector<5x8xf32>
    %c0_37 = arith.constant 0 : index
    %c8 = arith.constant 8 : index
    %106 = vector.load %arg16[%c0_37, %c8] : memref<10x32xf32, #tpu.memory_space<vmem>>, vector<5x8xf32>
    tpu.vector_store %arg16[%c0_37, %c8], %105 {strides = array<i32>} : memref<10x32xf32, #tpu.memory_space<vmem>>, vector<5x8xf32>,
    %107 = vector.extract_strided_slice %38 {offsets = [5, 8], sizes = [5, 8], strides = [1, 1]} : vector<10x32xf32> to vector<5x8xf32>
    %108 = arith.truncf %107 : vector<5x8xf32> to vector<5x8xbf16>
    %109 = vector.extract_strided_slice %39 {offsets = [5, 8], sizes = [5, 8], strides = [1, 1]} : vector<10x32xf32> to vector<5x8xf32>
    %110 = arith.truncf %109 : vector<5x8xf32> to vector<5x8xbf16>
    %111 = vector.extract_strided_slice %40 {offsets = [5, 8], sizes = [5, 8], strides = [1, 1]} : vector<10x32xf32> to vector<5x8xf32>
    %112 = arith.truncf %111 : vector<5x8xf32> to vector<5x8xbf16>
    %cst_38 = arith.constant dense<0.000000e+00> : vector<5x5xf32>
    %113 = tpu.matmul %108, %110, %cst_38 {dimension_numbers = #tpu.dot_dimension_numbers<[1], [1], [0], [0], [0, 0, 1, 0], [], []>} : vector<5x8xbf16>, vector<5x8xbf16>, vector<5x5xf32> -> vector<5x5xf32>
    %cst_39 = arith.constant 0.353553385 : f32
    %114 = vector.broadcast %cst_39 : f32 to vector<5x5xf32>
    %115 = arith.mulf %113, %114 : vector<5x5xf32>
    %cst_40 = arith.constant dense<0xFF800000> : vector<5xf32>
    %116 = vector.multi_reduction <maximumf>, %115, %cst_40 [1] : vector<5x5xf32> to vector<5xf32>
    %117 = vector.shape_cast %116 : vector<5xf32> to vector<5x1xf32>
    %118 = vector.broadcast %117 : vector<5x1xf32> to vector<5x5xf32>
    %119 = arith.subf %115, %118 : vector<5x5xf32>
    %120 = math.exp %119 : vector<5x5xf32>
    %cst_41 = arith.constant dense<0.000000e+00> : vector<5xf32>
    %121 = vector.multi_reduction <add>, %120, %cst_41 [1] : vector<5x5xf32> to vector<5xf32>
    %122 = vector.shape_cast %121 : vector<5xf32> to vector<5x1xf32>
    %123 = tpu.reciprocal %122 {approx = true} : vector<5x1xf32> -> vector<5x1xf32>
    %124 = vector.broadcast %123 : vector<5x1xf32> to vector<5x5xf32>
    %125 = arith.mulf %120, %124 : vector<5x5xf32>
    %126 = arith.truncf %125 : vector<5x5xf32> to vector<5x5xbf16>
    %cst_42 = arith.constant dense<0.000000e+00> : vector<5x8xf32>
    %127 = tpu.matmul %126, %112, %cst_42 {dimension_numbers = #tpu.dot_dimension_numbers<[1], [0], [0], [1], [0, 0, 1, 1], [], []>} : vector<5x5xbf16>, vector<5x8xbf16>, vector<5x8xf32> -> vector<5x8xf32>
    %c5_43 = arith.constant 5 : index
    %c8_44 = arith.constant 8 : index
    %128 = vector.load %arg16[%c5_43, %c8_44] : memref<10x32xf32, #tpu.memory_space<vmem>>, vector<5x8xf32>
    tpu.vector_store %arg16[%c5_43, %c8_44], %127 {strides = array<i32>} : memref<10x32xf32, #tpu.memory_space<vmem>>, vector<5x8xf32>,
    %129 = vector.extract_strided_slice %38 {offsets = [0, 16], sizes = [5, 8], strides = [1, 1]} : vector<10x32xf32> to vector<5x8xf32>
    %130 = arith.truncf %129 : vector<5x8xf32> to vector<5x8xbf16>
    %131 = vector.extract_strided_slice %39 {offsets = [0, 16], sizes = [5, 8], strides = [1, 1]} : vector<10x32xf32> to vector<5x8xf32>
    %132 = arith.truncf %131 : vector<5x8xf32> to vector<5x8xbf16>
    %133 = vector.extract_strided_slice %40 {offsets = [0, 16], sizes = [5, 8], strides = [1, 1]} : vector<10x32xf32> to vector<5x8xf32>
    %134 = arith.truncf %133 : vector<5x8xf32> to vector<5x8xbf16>
    %cst_45 = arith.constant dense<0.000000e+00> : vector<5x5xf32>
    %135 = tpu.matmul %130, %132, %cst_45 {dimension_numbers = #tpu.dot_dimension_numbers<[1], [1], [0], [0], [0, 0, 1, 0], [], []>} : vector<5x8xbf16>, vector<5x8xbf16>, vector<5x5xf32> -> vector<5x5xf32>
    %cst_46 = arith.constant 0.353553385 : f32
    %136 = vector.broadcast %cst_46 : f32 to vector<5x5xf32>
    %137 = arith.mulf %135, %136 : vector<5x5xf32>
    %cst_47 = arith.constant dense<0xFF800000> : vector<5xf32>
    %138 = vector.multi_reduction <maximumf>, %137, %cst_47 [1] : vector<5x5xf32> to vector<5xf32>
    %139 = vector.shape_cast %138 : vector<5xf32> to vector<5x1xf32>
    %140 = vector.broadcast %139 : vector<5x1xf32> to vector<5x5xf32>
    %141 = arith.subf %137, %140 : vector<5x5xf32>
    %142 = math.exp %141 : vector<5x5xf32>
    %cst_48 = arith.constant dense<0.000000e+00> : vector<5xf32>
    %143 = vector.multi_reduction <add>, %142, %cst_48 [1] : vector<5x5xf32> to vector<5xf32>
    %144 = vector.shape_cast %143 : vector<5xf32> to vector<5x1xf32>
    %145 = tpu.reciprocal %144 {approx = true} : vector<5x1xf32> -> vector<5x1xf32>
    %146 = vector.broadcast %145 : vector<5x1xf32> to vector<5x5xf32>
    %147 = arith.mulf %142, %146 : vector<5x5xf32>
    %148 = arith.truncf %147 : vector<5x5xf32> to vector<5x5xbf16>
    %cst_49 = arith.constant dense<0.000000e+00> : vector<5x8xf32>
    %149 = tpu.matmul %148, %134, %cst_49 {dimension_numbers = #tpu.dot_dimension_numbers<[1], [0], [0], [1], [0, 0, 1, 1], [], []>} : vector<5x5xbf16>, vector<5x8xbf16>, vector<5x8xf32> -> vector<5x8xf32>
    %c0_50 = arith.constant 0 : index
    %c16 = arith.constant 16 : index
    %150 = vector.load %arg16[%c0_50, %c16] : memref<10x32xf32, #tpu.memory_space<vmem>>, vector<5x8xf32>
    tpu.vector_store %arg16[%c0_50, %c16], %149 {strides = array<i32>} : memref<10x32xf32, #tpu.memory_space<vmem>>, vector<5x8xf32>,
    %151 = vector.extract_strided_slice %38 {offsets = [5, 16], sizes = [5, 8], strides = [1, 1]} : vector<10x32xf32> to vector<5x8xf32>
    %152 = arith.truncf %151 : vector<5x8xf32> to vector<5x8xbf16>
    %153 = vector.extract_strided_slice %39 {offsets = [5, 16], sizes = [5, 8], strides = [1, 1]} : vector<10x32xf32> to vector<5x8xf32>
    %154 = arith.truncf %153 : vector<5x8xf32> to vector<5x8xbf16>
    %155 = vector.extract_strided_slice %40 {offsets = [5, 16], sizes = [5, 8], strides = [1, 1]} : vector<10x32xf32> to vector<5x8xf32>
    %156 = arith.truncf %155 : vector<5x8xf32> to vector<5x8xbf16>
    %cst_51 = arith.constant dense<0.000000e+00> : vector<5x5xf32>
    %157 = tpu.matmul %152, %154, %cst_51 {dimension_numbers = #tpu.dot_dimension_numbers<[1], [1], [0], [0], [0, 0, 1, 0], [], []>} : vector<5x8xbf16>, vector<5x8xbf16>, vector<5x5xf32> -> vector<5x5xf32>
    %cst_52 = arith.constant 0.353553385 : f32
    %158 = vector.broadcast %cst_52 : f32 to vector<5x5xf32>
    %159 = arith.mulf %157, %158 : vector<5x5xf32>
    %cst_53 = arith.constant dense<0xFF800000> : vector<5xf32>
    %160 = vector.multi_reduction <maximumf>, %159, %cst_53 [1] : vector<5x5xf32> to vector<5xf32>
    %161 = vector.shape_cast %160 : vector<5xf32> to vector<5x1xf32>
    %162 = vector.broadcast %161 : vector<5x1xf32> to vector<5x5xf32>
    %163 = arith.subf %159, %162 : vector<5x5xf32>
    %164 = math.exp %163 : vector<5x5xf32>
    %cst_54 = arith.constant dense<0.000000e+00> : vector<5xf32>
    %165 = vector.multi_reduction <add>, %164, %cst_54 [1] : vector<5x5xf32> to vector<5xf32>
    %166 = vector.shape_cast %165 : vector<5xf32> to vector<5x1xf32>
    %167 = tpu.reciprocal %166 {approx = true} : vector<5x1xf32> -> vector<5x1xf32>
    %168 = vector.broadcast %167 : vector<5x1xf32> to vector<5x5xf32>
    %169 = arith.mulf %164, %168 : vector<5x5xf32>
    %170 = arith.truncf %169 : vector<5x5xf32> to vector<5x5xbf16>
    %cst_55 = arith.constant dense<0.000000e+00> : vector<5x8xf32>
    %171 = tpu.matmul %170, %156, %cst_55 {dimension_numbers = #tpu.dot_dimension_numbers<[1], [0], [0], [1], [0, 0, 1, 1], [], []>} : vector<5x5xbf16>, vector<5x8xbf16>, vector<5x8xf32> -> vector<5x8xf32>
    %c5_56 = arith.constant 5 : index
    %c16_57 = arith.constant 16 : index
    %172 = vector.load %arg16[%c5_56, %c16_57] : memref<10x32xf32, #tpu.memory_space<vmem>>, vector<5x8xf32>
    tpu.vector_store %arg16[%c5_56, %c16_57], %171 {strides = array<i32>} : memref<10x32xf32, #tpu.memory_space<vmem>>, vector<5x8xf32>,
    %173 = vector.extract_strided_slice %38 {offsets = [0, 24], sizes = [5, 8], strides = [1, 1]} : vector<10x32xf32> to vector<5x8xf32>
    %174 = arith.truncf %173 : vector<5x8xf32> to vector<5x8xbf16>
    %175 = vector.extract_strided_slice %39 {offsets = [0, 24], sizes = [5, 8], strides = [1, 1]} : vector<10x32xf32> to vector<5x8xf32>
    %176 = arith.truncf %175 : vector<5x8xf32> to vector<5x8xbf16>
    %177 = vector.extract_strided_slice %40 {offsets = [0, 24], sizes = [5, 8], strides = [1, 1]} : vector<10x32xf32> to vector<5x8xf32>
    %178 = arith.truncf %177 : vector<5x8xf32> to vector<5x8xbf16>
    %cst_58 = arith.constant dense<0.000000e+00> : vector<5x5xf32>
    %179 = tpu.matmul %174, %176, %cst_58 {dimension_numbers = #tpu.dot_dimension_numbers<[1], [1], [0], [0], [0, 0, 1, 0], [], []>} : vector<5x8xbf16>, vector<5x8xbf16>, vector<5x5xf32> -> vector<5x5xf32>
    %cst_59 = arith.constant 0.353553385 : f32
    %180 = vector.broadcast %cst_59 : f32 to vector<5x5xf32>
    %181 = arith.mulf %179, %180 : vector<5x5xf32>
    %cst_60 = arith.constant dense<0xFF800000> : vector<5xf32>
    %182 = vector.multi_reduction <maximumf>, %181, %cst_60 [1] : vector<5x5xf32> to vector<5xf32>
    %183 = vector.shape_cast %182 : vector<5xf32> to vector<5x1xf32>
    %184 = vector.broadcast %183 : vector<5x1xf32> to vector<5x5xf32>
    %185 = arith.subf %181, %184 : vector<5x5xf32>
    %186 = math.exp %185 : vector<5x5xf32>
    %cst_61 = arith.constant dense<0.000000e+00> : vector<5xf32>
    %187 = vector.multi_reduction <add>, %186, %cst_61 [1] : vector<5x5xf32> to vector<5xf32>
    %188 = vector.shape_cast %187 : vector<5xf32> to vector<5x1xf32>
    %189 = tpu.reciprocal %188 {approx = true} : vector<5x1xf32> -> vector<5x1xf32>
    %190 = vector.broadcast %189 : vector<5x1xf32> to vector<5x5xf32>
    %191 = arith.mulf %186, %190 : vector<5x5xf32>
    %192 = arith.truncf %191 : vector<5x5xf32> to vector<5x5xbf16>
    %cst_62 = arith.constant dense<0.000000e+00> : vector<5x8xf32>
    %193 = tpu.matmul %192, %178, %cst_62 {dimension_numbers = #tpu.dot_dimension_numbers<[1], [0], [0], [1], [0, 0, 1, 1], [], []>} : vector<5x5xbf16>, vector<5x8xbf16>, vector<5x8xf32> -> vector<5x8xf32>
    %c0_63 = arith.constant 0 : index
    %c24 = arith.constant 24 : index
    %194 = vector.load %arg16[%c0_63, %c24] : memref<10x32xf32, #tpu.memory_space<vmem>>, vector<5x8xf32>
    tpu.vector_store %arg16[%c0_63, %c24], %193 {strides = array<i32>} : memref<10x32xf32, #tpu.memory_space<vmem>>, vector<5x8xf32>,
    %195 = vector.extract_strided_slice %38 {offsets = [5, 24], sizes = [5, 8], strides = [1, 1]} : vector<10x32xf32> to vector<5x8xf32>
    %196 = arith.truncf %195 : vector<5x8xf32> to vector<5x8xbf16>
    %197 = vector.extract_strided_slice %39 {offsets = [5, 24], sizes = [5, 8], strides = [1, 1]} : vector<10x32xf32> to vector<5x8xf32>
    %198 = arith.truncf %197 : vector<5x8xf32> to vector<5x8xbf16>
    %199 = vector.extract_strided_slice %40 {offsets = [5, 24], sizes = [5, 8], strides = [1, 1]} : vector<10x32xf32> to vector<5x8xf32>
    %200 = arith.truncf %199 : vector<5x8xf32> to vector<5x8xbf16>
    %cst_64 = arith.constant dense<0.000000e+00> : vector<5x5xf32>
    %201 = tpu.matmul %196, %198, %cst_64 {dimension_numbers = #tpu.dot_dimension_numbers<[1], [1], [0], [0], [0, 0, 1, 0], [], []>} : vector<5x8xbf16>, vector<5x8xbf16>, vector<5x5xf32> -> vector<5x5xf32>
    %cst_65 = arith.constant 0.353553385 : f32
    %202 = vector.broadcast %cst_65 : f32 to vector<5x5xf32>
    %203 = arith.mulf %201, %202 : vector<5x5xf32>
    %cst_66 = arith.constant dense<0xFF800000> : vector<5xf32>
    %204 = vector.multi_reduction <maximumf>, %203, %cst_66 [1] : vector<5x5xf32> to vector<5xf32>
    %205 = vector.shape_cast %204 : vector<5xf32> to vector<5x1xf32>
    %206 = vector.broadcast %205 : vector<5x1xf32> to vector<5x5xf32>
    %207 = arith.subf %203, %206 : vector<5x5xf32>
    %208 = math.exp %207 : vector<5x5xf32>
    %cst_67 = arith.constant dense<0.000000e+00> : vector<5xf32>
    %209 = vector.multi_reduction <add>, %208, %cst_67 [1] : vector<5x5xf32> to vector<5xf32>
    %210 = vector.shape_cast %209 : vector<5xf32> to vector<5x1xf32>
    %211 = tpu.reciprocal %210 {approx = true} : vector<5x1xf32> -> vector<5x1xf32>
    %212 = vector.broadcast %211 : vector<5x1xf32> to vector<5x5xf32>
    %213 = arith.mulf %208, %212 : vector<5x5xf32>
    %214 = arith.truncf %213 : vector<5x5xf32> to vector<5x5xbf16>
    %cst_68 = arith.constant dense<0.000000e+00> : vector<5x8xf32>
    %215 = tpu.matmul %214, %200, %cst_68 {dimension_numbers = #tpu.dot_dimension_numbers<[1], [0], [0], [1], [0, 0, 1, 1], [], []>} : vector<5x5xbf16>, vector<5x8xbf16>, vector<5x8xf32> -> vector<5x8xf32>
    %c5_69 = arith.constant 5 : index
    %c24_70 = arith.constant 24 : index
    %216 = vector.load %arg16[%c5_69, %c24_70] : memref<10x32xf32, #tpu.memory_space<vmem>>, vector<5x8xf32>
    tpu.vector_store %arg16[%c5_69, %c24_70], %215 {strides = array<i32>} : memref<10x32xf32, #tpu.memory_space<vmem>>, vector<5x8xf32>,
    %c0_71 = arith.constant 0 : index
    %c0_72 = arith.constant 0 : index
    %217 = vector.load %arg16[%c0_71, %c0_72] : memref<10x32xf32, #tpu.memory_space<vmem>>, vector<10x32xf32>
    %c0_73 = arith.constant 0 : index
    %c0_74 = arith.constant 0 : index
    %c0_75 = arith.constant 0 : index
    %218 = vector.load %arg6[%c0_73, %c0_74, %c0_75] : memref<1x32x32xbf16, #tpu.memory_space<vmem>>, vector<1x32x32xbf16>
    %219 = vector.shape_cast %218 : vector<1x32x32xbf16> to vector<32x32xbf16>
    %220 = arith.truncf %217 : vector<10x32xf32> to vector<10x32xbf16>
    %cst_76 = arith.constant dense<0.000000e+00> : vector<10x32xf32>
    %221 = tpu.matmul %220, %219, %cst_76 {dimension_numbers = #tpu.dot_dimension_numbers<[1], [0], [0], [1], [0, 0, 1, 1], [], []>} : vector<10x32xbf16>, vector<32x32xbf16>, vector<10x32xf32> -> vector<10x32xf32>
    %222 = arith.addf %3, %221 : vector<10x32xf32>
    %c0_77 = arith.constant 0 : index
    %c0_78 = arith.constant 0 : index
    %c0_79 = arith.constant 0 : index
    %223 = vector.load %arg7[%c0_77, %c0_78, %c0_79] : memref<1x1x32xf32, #tpu.memory_space<vmem>>, vector<1x1x32xf32>
    %224 = vector.shape_cast %223 : vector<1x1x32xf32> to vector<1x32xf32>
    %225 = vector.broadcast %224 : vector<1x32xf32> to vector<10x32xf32>
    %226 = arith.addf %222, %225 : vector<10x32xf32>
    %c0_80 = arith.constant 0 : index
    %c0_81 = arith.constant 0 : index
    %c0_82 = arith.constant 0 : index
    %227 = vector.load %arg8[%c0_80, %c0_81, %c0_82] : memref<1x1x32xf32, #tpu.memory_space<vmem>>, vector<1x1x32xf32>
    %228 = vector.shape_cast %227 : vector<1x1x32xf32> to vector<1x32xf32>
    %c0_83 = arith.constant 0 : index
    %c0_84 = arith.constant 0 : index
    %c0_85 = arith.constant 0 : index
    %229 = vector.load %arg9[%c0_83, %c0_84, %c0_85] : memref<1x1x32xf32, #tpu.memory_space<vmem>>, vector<1x1x32xf32>
    %230 = vector.shape_cast %229 : vector<1x1x32xf32> to vector<1x32xf32>
    %cst_86 = arith.constant dense<0.000000e+00> : vector<10xf32>
    %231 = vector.multi_reduction <add>, %226, %cst_86 [1] : vector<10x32xf32> to vector<10xf32>
    %232 = vector.shape_cast %231 : vector<10xf32> to vector<10x1xf32>
    %cst_87 = arith.constant 3.200000e+01 : f32
    %233 = vector.broadcast %cst_87 : f32 to vector<10x1xf32>
    %234 = arith.divf %232, %233 : vector<10x1xf32>
    %235 = vector.broadcast %234 : vector<10x1xf32> to vector<10x32xf32>
    %236 = arith.subf %226, %235 : vector<10x32xf32>
    %237 = arith.mulf %236, %236 : vector<10x32xf32>
    %cst_88 = arith.constant dense<0.000000e+00> : vector<10xf32>
    %238 = vector.multi_reduction <add>, %237, %cst_88 [1] : vector<10x32xf32> to vector<10xf32>
    %239 = vector.shape_cast %238 : vector<10xf32> to vector<10x1xf32>
    %cst_89 = arith.constant 3.200000e+01 : f32
    %240 = vector.broadcast %cst_89 : f32 to vector<10x1xf32>
    %241 = arith.divf %239, %240 : vector<10x1xf32>
    %242 = vector.broadcast %234 : vector<10x1xf32> to vector<10x32xf32>
    %243 = arith.subf %226, %242 : vector<10x32xf32>
    %cst_90 = arith.constant 9.99999974E-6 : f32
    %244 = vector.broadcast %cst_90 : f32 to vector<10x1xf32>
    %245 = arith.addf %241, %244 : vector<10x1xf32>
    %246 = math.rsqrt %245 : vector<10x1xf32>
    %247 = vector.broadcast %246 : vector<10x1xf32> to vector<10x32xf32>
    %248 = arith.mulf %243, %247 : vector<10x32xf32>
    %249 = vector.broadcast %228 : vector<1x32xf32> to vector<10x32xf32>
    %250 = arith.mulf %248, %249 : vector<10x32xf32>
    %251 = vector.broadcast %230 : vector<1x32xf32> to vector<10x32xf32>
    %252 = arith.addf %250, %251 : vector<10x32xf32>
    %c0_91 = arith.constant 0 : index
    %c0_92 = arith.constant 0 : index
    %c0_93 = arith.constant 0 : index
    %253 = vector.load %arg10[%c0_91, %c0_92, %c0_93] : memref<1x32x128xbf16, #tpu.memory_space<vmem>>, vector<1x32x128xbf16>
    %254 = vector.shape_cast %253 : vector<1x32x128xbf16> to vector<32x128xbf16>
    %255 = arith.truncf %252 : vector<10x32xf32> to vector<10x32xbf16>
    %cst_94 = arith.constant dense<0.000000e+00> : vector<10x128xf32>
    %256 = tpu.matmul %255, %254, %cst_94 {dimension_numbers = #tpu.dot_dimension_numbers<[1], [0], [0], [1], [0, 0, 1, 1], [], []>} : vector<10x32xbf16>, vector<32x128xbf16>, vector<10x128xf32> -> vector<10x128xf32>
    %c0_95 = arith.constant 0 : index
    %c0_96 = arith.constant 0 : index
    %c0_97 = arith.constant 0 : index
    %257 = vector.load %arg11[%c0_95, %c0_96, %c0_97] : memref<1x1x128xf32, #tpu.memory_space<vmem>>, vector<1x1x128xf32>
    %258 = vector.shape_cast %257 : vector<1x1x128xf32> to vector<1x128xf32>
    %259 = vector.broadcast %258 : vector<1x128xf32> to vector<10x128xf32>
    %260 = arith.addf %256, %259 : vector<10x128xf32>
    %cst_98 = arith.constant 5.000000e-01 : f32
    %261 = vector.broadcast %cst_98 : f32 to vector<10x128xf32>
    %262 = arith.mulf %261, %260 : vector<10x128xf32>
    %cst_99 = arith.constant 4.471500e-02 : f32
    %263 = vector.broadcast %cst_99 : f32 to vector<10x128xf32>
    %264 = arith.mulf %263, %260 : vector<10x128xf32>
    %265 = arith.mulf %264, %260 : vector<10x128xf32>
    %266 = arith.mulf %265, %260 : vector<10x128xf32>
    %267 = arith.addf %260, %266 : vector<10x128xf32>
    %cst_100 = arith.constant 0.797884583 : f32
    %268 = vector.broadcast %cst_100 : f32 to vector<10x128xf32>
    %269 = arith.mulf %268, %267 : vector<10x128xf32>
    %270 = math.tanh %269 : vector<10x128xf32>
    %cst_101 = arith.constant 1.000000e+00 : f32
    %271 = vector.broadcast %cst_101 : f32 to vector<10x128xf32>
    %272 = arith.addf %271, %270 : vector<10x128xf32>
    %273 = arith.mulf %262, %272 : vector<10x128xf32>
    %c0_102 = arith.constant 0 : index
    %c0_103 = arith.constant 0 : index
    %c0_104 = arith.constant 0 : index
    %274 = vector.load %arg12[%c0_102, %c0_103, %c0_104] : memref<1x128x32xbf16, #tpu.memory_space<vmem>>, vector<1x128x32xbf16>
    %275 = vector.shape_cast %274 : vector<1x128x32xbf16> to vector<128x32xbf16>
    %276 = arith.truncf %273 : vector<10x128xf32> to vector<10x128xbf16>
    %cst_105 = arith.constant dense<0.000000e+00> : vector<10x32xf32>
    %277 = tpu.matmul %276, %275, %cst_105 {dimension_numbers = #tpu.dot_dimension_numbers<[1], [0], [0], [1], [0, 0, 1, 1], [], []>} : vector<10x128xbf16>, vector<128x32xbf16>, vector<10x32xf32> -> vector<10x32xf32>
    %278 = arith.addf %226, %277 : vector<10x32xf32>
    %c0_106 = arith.constant 0 : index
    %c0_107 = arith.constant 0 : index
    %c0_108 = arith.constant 0 : index
    %279 = vector.load %arg13[%c0_106, %c0_107, %c0_108] : memref<1x1x32xf32, #tpu.memory_space<vmem>>, vector<1x1x32xf32>
    %280 = vector.shape_cast %279 : vector<1x1x32xf32> to vector<1x32xf32>
    %281 = vector.broadcast %280 : vector<1x32xf32> to vector<10x32xf32>
    %282 = arith.addf %278, %281 : vector<10x32xf32>
    %c0_109 = arith.constant 0 : index
    %c0_110 = arith.constant 0 : index
    %283 = vector.load %arg15[%c0_109, %c0_110] : memref<10x32xf32, #tpu.memory_space<vmem>>, vector<10x32xf32>
    tpu.vector_store %arg15[%c0_109, %c0_110], %282 {strides = array<i32>} : memref<10x32xf32, #tpu.memory_space<vmem>>, vector<10x32xf32>,
    %c1_i32 = arith.constant 1 : i32
    %284 = arith.cmpi eq, %arg0, %c1_i32 : i32
    %285 = arith.extui %284 : i1 to i32
    %c0_i32_111 = arith.constant 0 : i32
    %286 = arith.cmpi ne, %285, %c0_i32_111 : i32
    scf.if %286 {
      %c0_112 = arith.constant 0 : index
      %c0_113 = arith.constant 0 : index
      %287 = vector.load %arg14[%c0_112, %c0_113] : memref<10x32xf32, #tpu.memory_space<vmem>>, vector<10x32xf32>
      tpu.vector_store %arg14[%c0_112, %c0_113], %282 {strides = array<i32>} : memref<10x32xf32, #tpu.memory_space<vmem>>, vector<10x32xf32>,
    } else {
    }
    return
  }
  func.func @transform_0(%arg0: i32) -> (i32, i32) {
    %c0_i32 = arith.constant 0 : i32
    %c0_i32_0 = arith.constant 0 : i32
    %c0_i32_1 = arith.constant 0 : i32
    return %c0_i32, %c0_i32_0 : i32, i32
  }
  func.func @transform_1(%arg0: i32) -> (i32, i32, i32) {
    %c0_i32 = arith.constant 0 : i32
    %c0_i32_0 = arith.constant 0 : i32
    %c0_i32_1 = arith.constant 0 : i32
    return %arg0, %c0_i32, %c0_i32_0 : i32, i32, i32
  }
  func.func @transform_2(%arg0: i32) -> (i32, i32, i32) {
    %c0_i32 = arith.constant 0 : i32
    %c0_i32_0 = arith.constant 0 : i32
    %c0_i32_1 = arith.constant 0 : i32
    return %arg0, %c0_i32, %c0_i32_0 : i32, i32, i32
  }
  func.func @transform_3(%arg0: i32) -> (i32, i32, i32) {
    %c0_i32 = arith.constant 0 : i32
    %c0_i32_0 = arith.constant 0 : i32
    %c0_i32_1 = arith.constant 0 : i32
    return %arg0, %c0_i32, %c0_i32_0 : i32, i32, i32
  }
  func.func @transform_4(%arg0: i32) -> (i32, i32, i32) {
    %c0_i32 = arith.constant 0 : i32
    %c0_i32_0 = arith.constant 0 : i32
    %c0_i32_1 = arith.constant 0 : i32
    return %arg0, %c0_i32, %c0_i32_0 : i32, i32, i32
  }
  func.func @transform_5(%arg0: i32) -> (i32, i32, i32) {
    %c0_i32 = arith.constant 0 : i32
    %c0_i32_0 = arith.constant 0 : i32
    %c0_i32_1 = arith.constant 0 : i32
    return %arg0, %c0_i32, %c0_i32_0 : i32, i32, i32
  }
  func.func @transform_6(%arg0: i32) -> (i32, i32, i32) {
    %c0_i32 = arith.constant 0 : i32
    %c0_i32_0 = arith.constant 0 : i32
    %c0_i32_1 = arith.constant 0 : i32
    return %arg0, %c0_i32, %c0_i32_0 : i32, i32, i32
  }
  func.func @transform_7(%arg0: i32) -> (i32, i32, i32) {
    %c0_i32 = arith.constant 0 : i32
    %c0_i32_0 = arith.constant 0 : i32
    %c0_i32_1 = arith.constant 0 : i32
    return %arg0, %c0_i32, %c0_i32_0 : i32, i32, i32
  }
  func.func @transform_8(%arg0: i32) -> (i32, i32, i32) {
    %c0_i32 = arith.constant 0 : i32
    %c0_i32_0 = arith.constant 0 : i32
    %c0_i32_1 = arith.constant 0 : i32
    return %arg0, %c0_i32, %c0_i32_0 : i32, i32, i32
  }
  func.func @transform_9(%arg0: i32) -> (i32, i32, i32) {
    %c0_i32 = arith.constant 0 : i32
    %c0_i32_0 = arith.constant 0 : i32
    %c0_i32_1 = arith.constant 0 : i32
    return %arg0, %c0_i32, %c0_i32_0 : i32, i32, i32
  }
  func.func @transform_10(%arg0: i32) -> (i32, i32, i32) {
    %c0_i32 = arith.constant 0 : i32
    %c0_i32_0 = arith.constant 0 : i32
    %c0_i32_1 = arith.constant 0 : i32
    return %arg0, %c0_i32, %c0_i32_0 : i32, i32, i32
  }
  func.func @transform_11(%arg0: i32) -> (i32, i32, i32) {
    %c0_i32 = arith.constant 0 : i32
    %c0_i32_0 = arith.constant 0 : i32
    %c0_i32_1 = arith.constant 0 : i32
    return %arg0, %c0_i32, %c0_i32_0 : i32, i32, i32
  }
  func.func @transform_12(%arg0: i32) -> (i32, i32, i32) {
    %c0_i32 = arith.constant 0 : i32
    %c0_i32_0 = arith.constant 0 : i32
    %c0_i32_1 = arith.constant 0 : i32
    return %arg0, %c0_i32, %c0_i32_0 : i32, i32, i32
  }
  func.func @transform_13(%arg0: i32) -> (i32, i32) {
    %c0_i32 = arith.constant 0 : i32
    %c0_i32_0 = arith.constant 0 : i32
    %c0_i32_1 = arith.constant 0 : i32
    return %c0_i32, %c0_i32_0 : i32, i32
  }
}

module attributes {stable_mosaic.version = 11 : i64} {
  func.func @_head_kernel(%arg0: i32, %arg1: memref<2x32xf32, #tpu.memory_space<vmem>>, %arg2: memref<1x32xf32, #tpu.memory_space<vmem>>, %arg3: memref<1x32xf32, #tpu.memory_space<vmem>>, %arg4: memref<64x32xbf16, #tpu.memory_space<vmem>>, %arg5: memref<2x64xf32, #tpu.memory_space<vmem>>) attributes {dimension_semantics = [#tpu.dimension_semantics<parallel>], iteration_bounds = array<i64: 1>, scalar_prefetch = 0 : i64, scratch_operands = 0 : i64, tpu.core_type = #tpu.core_type<tc>, window_params = [{pipeline_mode = #tpu.pipeline_mode<synchronous>, transform_indices = @transform_0, window_bounds = array<i64: 2, 32>}, {pipeline_mode = #tpu.pipeline_mode<synchronous>, transform_indices = @transform_1, window_bounds = array<i64: 1, 32>}, {pipeline_mode = #tpu.pipeline_mode<synchronous>, transform_indices = @transform_2, window_bounds = array<i64: 1, 32>}, {transform_indices = @transform_3, window_bounds = array<i64: 64, 32>}, {transform_indices = @transform_4, window_bounds = array<i64: 2, 64>}]} {
    %c0 = arith.constant 0 : index
    %c0_0 = arith.constant 0 : index
    %0 = vector.load %arg1[%c0, %c0_0] : memref<2x32xf32, #tpu.memory_space<vmem>>, vector<2x32xf32>
    %c0_1 = arith.constant 0 : index
    %c0_2 = arith.constant 0 : index
    %1 = vector.load %arg2[%c0_1, %c0_2] : memref<1x32xf32, #tpu.memory_space<vmem>>, vector<1x32xf32>
    %c0_3 = arith.constant 0 : index
    %c0_4 = arith.constant 0 : index
    %2 = vector.load %arg3[%c0_3, %c0_4] : memref<1x32xf32, #tpu.memory_space<vmem>>, vector<1x32xf32>
    %cst = arith.constant dense<0.000000e+00> : vector<2xf32>
    %3 = vector.multi_reduction <add>, %0, %cst [1] : vector<2x32xf32> to vector<2xf32>
    %4 = vector.shape_cast %3 : vector<2xf32> to vector<2x1xf32>
    %cst_5 = arith.constant 3.200000e+01 : f32
    %5 = vector.broadcast %cst_5 : f32 to vector<2x1xf32>
    %6 = arith.divf %4, %5 : vector<2x1xf32>
    %7 = vector.broadcast %6 : vector<2x1xf32> to vector<2x32xf32>
    %8 = arith.subf %0, %7 : vector<2x32xf32>
    %9 = arith.mulf %8, %8 : vector<2x32xf32>
    %cst_6 = arith.constant dense<0.000000e+00> : vector<2xf32>
    %10 = vector.multi_reduction <add>, %9, %cst_6 [1] : vector<2x32xf32> to vector<2xf32>
    %11 = vector.shape_cast %10 : vector<2xf32> to vector<2x1xf32>
    %cst_7 = arith.constant 3.200000e+01 : f32
    %12 = vector.broadcast %cst_7 : f32 to vector<2x1xf32>
    %13 = arith.divf %11, %12 : vector<2x1xf32>
    %14 = vector.broadcast %6 : vector<2x1xf32> to vector<2x32xf32>
    %15 = arith.subf %0, %14 : vector<2x32xf32>
    %cst_8 = arith.constant 9.99999974E-6 : f32
    %16 = vector.broadcast %cst_8 : f32 to vector<2x1xf32>
    %17 = arith.addf %13, %16 : vector<2x1xf32>
    %18 = math.rsqrt %17 : vector<2x1xf32>
    %19 = vector.broadcast %18 : vector<2x1xf32> to vector<2x32xf32>
    %20 = arith.mulf %15, %19 : vector<2x32xf32>
    %21 = vector.broadcast %1 : vector<1x32xf32> to vector<2x32xf32>
    %22 = arith.mulf %20, %21 : vector<2x32xf32>
    %23 = vector.broadcast %2 : vector<1x32xf32> to vector<2x32xf32>
    %24 = arith.addf %22, %23 : vector<2x32xf32>
    %25 = arith.truncf %24 : vector<2x32xf32> to vector<2x32xbf16>
    %c0_9 = arith.constant 0 : index
    %c0_10 = arith.constant 0 : index
    %26 = vector.load %arg4[%c0_9, %c0_10] : memref<64x32xbf16, #tpu.memory_space<vmem>>, vector<64x32xbf16>
    %cst_11 = arith.constant dense<0.000000e+00> : vector<2x64xf32>
    %27 = tpu.matmul %25, %26, %cst_11 {dimension_numbers = #tpu.dot_dimension_numbers<[1], [1], [0], [0], [0, 0, 1, 0], [], []>} : vector<2x32xbf16>, vector<64x32xbf16>, vector<2x64xf32> -> vector<2x64xf32>
    %c0_12 = arith.constant 0 : index
    %c0_13 = arith.constant 0 : index
    %28 = vector.load %arg5[%c0_12, %c0_13] : memref<2x64xf32, #tpu.memory_space<vmem>>, vector<2x64xf32>
    tpu.vector_store %arg5[%c0_12, %c0_13], %27 {strides = array<i32>} : memref<2x64xf32, #tpu.memory_space<vmem>>, vector<2x64xf32>,
    return
  }
  func.func @transform_0(%arg0: i32) -> (i32, i32) {
    %c0_i32 = arith.constant 0 : i32
    %c0_i32_0 = arith.constant 0 : i32
    %c0_i32_1 = arith.constant 0 : i32
    return %c0_i32, %c0_i32_0 : i32, i32
  }
  func.func @transform_1(%arg0: i32) -> (i32, i32) {
    %c0_i32 = arith.constant 0 : i32
    %c0_i32_0 = arith.constant 0 : i32
    %c0_i32_1 = arith.constant 0 : i32
    return %c0_i32, %c0_i32_0 : i32, i32
  }
  func.func @transform_2(%arg0: i32) -> (i32, i32) {
    %c0_i32 = arith.constant 0 : i32
    %c0_i32_0 = arith.constant 0 : i32
    %c0_i32_1 = arith.constant 0 : i32
    return %c0_i32, %c0_i32_0 : i32, i32
  }
  func.func @transform_3(%arg0: i32) -> (i32, i32) {
    %c0_i32 = arith.constant 0 : i32
    %c0_i32_0 = arith.constant 0 : i32
    return %arg0, %c0_i32 : i32, i32
  }
  func.func @transform_4(%arg0: i32) -> (i32, i32) {
    %c0_i32 = arith.constant 0 : i32
    %c0_i32_0 = arith.constant 0 : i32
    return %c0_i32, %arg0 : i32, i32
  }
}

module attributes {stable_mosaic.version = 11 : i64} {
  func.func @_gpt_stack_kernel(%arg0: i32, %arg1: memref<16x32xf32, #tpu.memory_space<vmem>>, %arg2: memref<10x32xbf16, #tpu.memory_space<vmem>>, %arg3: memref<1x1x32xf32, #tpu.memory_space<vmem>>, %arg4: memref<1x1x32xf32, #tpu.memory_space<vmem>>, %arg5: memref<1x32x96xbf16, #tpu.memory_space<vmem>>, %arg6: memref<1x1x96xf32, #tpu.memory_space<vmem>>, %arg7: memref<1x32x32xbf16, #tpu.memory_space<vmem>>, %arg8: memref<1x1x32xf32, #tpu.memory_space<vmem>>, %arg9: memref<1x1x32xf32, #tpu.memory_space<vmem>>, %arg10: memref<1x1x32xf32, #tpu.memory_space<vmem>>, %arg11: memref<1x32x32xbf16, #tpu.memory_space<vmem>>, %arg12: memref<1x1x32xf32, #tpu.memory_space<vmem>>, %arg13: memref<1x32x32xbf16, #tpu.memory_space<vmem>>, %arg14: memref<1x1x32xf32, #tpu.memory_space<vmem>>, %arg15: memref<1x32x32xbf16, #tpu.memory_space<vmem>>, %arg16: memref<1x1x32xf32, #tpu.memory_space<vmem>>, %arg17: memref<1x32x32xbf16, #tpu.memory_space<vmem>>, %arg18: memref<1x1x32xf32, #tpu.memory_space<vmem>>, %arg19: memref<1x1x32xf32, #tpu.memory_space<vmem>>, %arg20: memref<1x1x32xf32, #tpu.memory_space<vmem>>, %arg21: memref<1x32x128xbf16, #tpu.memory_space<vmem>>, %arg22: memref<1x1x128xf32, #tpu.memory_space<vmem>>, %arg23: memref<1x128x32xbf16, #tpu.memory_space<vmem>>, %arg24: memref<1x1x32xf32, #tpu.memory_space<vmem>>, %arg25: memref<16x32xf32, #tpu.memory_space<vmem>>, %arg26: memref<16x32xf32, #tpu.memory_space<vmem>>, %arg27: memref<16x32xf32, #tpu.memory_space<vmem>>) attributes {dimension_semantics = [#tpu.dimension_semantics<arbitrary>], iteration_bounds = array<i64: 2>, scalar_prefetch = 0 : i64, scratch_operands = 2 : i64, tpu.core_type = #tpu.core_type<tc>, window_params = [{pipeline_mode = #tpu.pipeline_mode<synchronous>, transform_indices = @transform_0, window_bounds = array<i64: 16, 32>}, {pipeline_mode = #tpu.pipeline_mode<synchronous>, transform_indices = @transform_1, window_bounds = array<i64: 10, 32>}, {transform_indices = @transform_2, window_bounds = array<i64: 1, 1, 32>}, {transform_indices = @transform_3, window_bounds = array<i64: 1, 1, 32>}, {transform_indices = @transform_4, window_bounds = array<i64: 1, 32, 96>}, {transform_indices = @transform_5, window_bounds = array<i64: 1, 1, 96>}, {transform_indices = @transform_6, window_bounds = array<i64: 1, 32, 32>}, {transform_indices = @transform_7, window_bounds = array<i64: 1, 1, 32>}, {transform_indices = @transform_8, window_bounds = array<i64: 1, 1, 32>}, {transform_indices = @transform_9, window_bounds = array<i64: 1, 1, 32>}, {transform_indices = @transform_10, window_bounds = array<i64: 1, 32, 32>}, {transform_indices = @transform_11, window_bounds = array<i64: 1, 1, 32>}, {transform_indices = @transform_12, window_bounds = array<i64: 1, 32, 32>}, {transform_indices = @transform_13, window_bounds = array<i64: 1, 1, 32>}, {transform_indices = @transform_14, window_bounds = array<i64: 1, 32, 32>}, {transform_indices = @transform_15, window_bounds = array<i64: 1, 1, 32>}, {transform_indices = @transform_16, window_bounds = array<i64: 1, 32, 32>}, {transform_indices = @transform_17, window_bounds = array<i64: 1, 1, 32>}, {transform_indices = @transform_18, window_bounds = array<i64: 1, 1, 32>}, {transform_indices = @transform_19, window_bounds = array<i64: 1, 1, 32>}, {transform_indices = @transform_20, window_bounds = array<i64: 1, 32, 128>}, {transform_indices = @transform_21, window_bounds = array<i64: 1, 1, 128>}, {transform_indices = @transform_22, window_bounds = array<i64: 1, 128, 32>}, {transform_indices = @transform_23, window_bounds = array<i64: 1, 1, 32>}, {pipeline_mode = #tpu.pipeline_mode<synchronous>, transform_indices = @transform_24, window_bounds = array<i64: 16, 32>}]} {
    %c0_i32 = arith.constant 0 : i32
    %0 = arith.cmpi eq, %arg0, %c0_i32 : i32
    %1 = arith.extui %0 : i1 to i32
    %c0_i32_0 = arith.constant 0 : i32
    %2 = arith.cmpi ne, %1, %c0_i32_0 : i32
    scf.if %2 {
      %c0_220 = arith.constant 0 : index
      %c0_221 = arith.constant 0 : index
      %541 = vector.load %arg1[%c0_220, %c0_221] : memref<16x32xf32, #tpu.memory_space<vmem>>, vector<16x32xf32>
      %c0_222 = arith.constant 0 : index
      %c0_223 = arith.constant 0 : index
      %542 = vector.load %arg26[%c0_222, %c0_223] : memref<16x32xf32, #tpu.memory_space<vmem>>, vector<16x32xf32>
      tpu.vector_store %arg26[%c0_222, %c0_223], %541 {strides = array<i32>} : memref<16x32xf32, #tpu.memory_space<vmem>>, vector<16x32xf32>,
    } else {
    }
    %c0 = arith.constant 0 : index
    %c0_1 = arith.constant 0 : index
    %3 = vector.load %arg26[%c0, %c0_1] : memref<16x32xf32, #tpu.memory_space<vmem>>, vector<16x32xf32>
    %c0_2 = arith.constant 0 : index
    %c0_3 = arith.constant 0 : index
    %4 = vector.load %arg2[%c0_2, %c0_3] : memref<10x32xbf16, #tpu.memory_space<vmem>>, vector<10x32xbf16>
    %c0_4 = arith.constant 0 : index
    %c0_5 = arith.constant 0 : index
    %c0_6 = arith.constant 0 : index
    %5 = vector.load %arg3[%c0_4, %c0_5, %c0_6] : memref<1x1x32xf32, #tpu.memory_space<vmem>>, vector<1x1x32xf32>
    %6 = vector.shape_cast %5 : vector<1x1x32xf32> to vector<1x32xf32>
    %c0_7 = arith.constant 0 : index
    %c0_8 = arith.constant 0 : index
    %c0_9 = arith.constant 0 : index
    %7 = vector.load %arg4[%c0_7, %c0_8, %c0_9] : memref<1x1x32xf32, #tpu.memory_space<vmem>>, vector<1x1x32xf32>
    %8 = vector.shape_cast %7 : vector<1x1x32xf32> to vector<1x32xf32>
    %cst = arith.constant dense<0.000000e+00> : vector<16xf32>
    %9 = vector.multi_reduction <add>, %3, %cst [1] : vector<16x32xf32> to vector<16xf32>
    %10 = vector.shape_cast %9 : vector<16xf32> to vector<16x1xf32>
    %cst_10 = arith.constant 3.200000e+01 : f32
    %11 = vector.broadcast %cst_10 : f32 to vector<16x1xf32>
    %12 = arith.divf %10, %11 : vector<16x1xf32>
    %13 = vector.broadcast %12 : vector<16x1xf32> to vector<16x32xf32>
    %14 = arith.subf %3, %13 : vector<16x32xf32>
    %15 = arith.mulf %14, %14 : vector<16x32xf32>
    %cst_11 = arith.constant dense<0.000000e+00> : vector<16xf32>
    %16 = vector.multi_reduction <add>, %15, %cst_11 [1] : vector<16x32xf32> to vector<16xf32>
    %17 = vector.shape_cast %16 : vector<16xf32> to vector<16x1xf32>
    %cst_12 = arith.constant 3.200000e+01 : f32
    %18 = vector.broadcast %cst_12 : f32 to vector<16x1xf32>
    %19 = arith.divf %17, %18 : vector<16x1xf32>
    %20 = vector.broadcast %12 : vector<16x1xf32> to vector<16x32xf32>
    %21 = arith.subf %3, %20 : vector<16x32xf32>
    %cst_13 = arith.constant 9.99999974E-6 : f32
    %22 = vector.broadcast %cst_13 : f32 to vector<16x1xf32>
    %23 = arith.addf %19, %22 : vector<16x1xf32>
    %24 = math.rsqrt %23 : vector<16x1xf32>
    %25 = vector.broadcast %24 : vector<16x1xf32> to vector<16x32xf32>
    %26 = arith.mulf %21, %25 : vector<16x32xf32>
    %27 = vector.broadcast %6 : vector<1x32xf32> to vector<16x32xf32>
    %28 = arith.mulf %26, %27 : vector<16x32xf32>
    %29 = vector.broadcast %8 : vector<1x32xf32> to vector<16x32xf32>
    %30 = arith.addf %28, %29 : vector<16x32xf32>
    %c0_14 = arith.constant 0 : index
    %c0_15 = arith.constant 0 : index
    %c0_16 = arith.constant 0 : index
    %31 = vector.load %arg5[%c0_14, %c0_15, %c0_16] : memref<1x32x96xbf16, #tpu.memory_space<vmem>>, vector<1x32x96xbf16>
    %32 = vector.shape_cast %31 : vector<1x32x96xbf16> to vector<32x96xbf16>
    %33 = arith.truncf %30 : vector<16x32xf32> to vector<16x32xbf16>
    %cst_17 = arith.constant dense<0.000000e+00> : vector<16x96xf32>
    %34 = tpu.matmul %33, %32, %cst_17 {dimension_numbers = #tpu.dot_dimension_numbers<[1], [0], [0], [1], [0, 0, 1, 1], [], []>} : vector<16x32xbf16>, vector<32x96xbf16>, vector<16x96xf32> -> vector<16x96xf32>
    %c0_18 = arith.constant 0 : index
    %c0_19 = arith.constant 0 : index
    %c0_20 = arith.constant 0 : index
    %35 = vector.load %arg6[%c0_18, %c0_19, %c0_20] : memref<1x1x96xf32, #tpu.memory_space<vmem>>, vector<1x1x96xf32>
    %36 = vector.shape_cast %35 : vector<1x1x96xf32> to vector<1x96xf32>
    %37 = vector.broadcast %36 : vector<1x96xf32> to vector<16x96xf32>
    %38 = arith.addf %34, %37 : vector<16x96xf32>
    %39 = vector.extract_strided_slice %38 {offsets = [0, 0], sizes = [16, 32], strides = [1, 1]} : vector<16x96xf32> to vector<16x32xf32>
    %40 = vector.extract_strided_slice %38 {offsets = [0, 32], sizes = [16, 32], strides = [1, 1]} : vector<16x96xf32> to vector<16x32xf32>
    %41 = vector.extract_strided_slice %38 {offsets = [0, 64], sizes = [16, 32], strides = [1, 1]} : vector<16x96xf32> to vector<16x32xf32>
    %42 = tpu.iota {dimensions = array<i32: 0>} : vector<8x8xi32>
    %43 = tpu.iota {dimensions = array<i32: 1>} : vector<8x8xi32>
    %44 = arith.cmpi sle, %43, %42 : vector<8x8xi32>
    %45 = vector.extract_strided_slice %39 {offsets = [0, 0], sizes = [8, 8], strides = [1, 1]} : vector<16x32xf32> to vector<8x8xf32>
    %46 = arith.truncf %45 : vector<8x8xf32> to vector<8x8xbf16>
    %47 = vector.extract_strided_slice %40 {offsets = [0, 0], sizes = [8, 8], strides = [1, 1]} : vector<16x32xf32> to vector<8x8xf32>
    %48 = arith.truncf %47 : vector<8x8xf32> to vector<8x8xbf16>
    %49 = vector.extract_strided_slice %41 {offsets = [0, 0], sizes = [8, 8], strides = [1, 1]} : vector<16x32xf32> to vector<8x8xf32>
    %50 = arith.truncf %49 : vector<8x8xf32> to vector<8x8xbf16>
    %cst_21 = arith.constant dense<0.000000e+00> : vector<8x8xf32>
    %51 = tpu.matmul %46, %48, %cst_21 {dimension_numbers = #tpu.dot_dimension_numbers<[1], [1], [0], [0], [0, 0, 1, 0], [], []>} : vector<8x8xbf16>, vector<8x8xbf16>, vector<8x8xf32> -> vector<8x8xf32>
    %cst_22 = arith.constant 0.353553385 : f32
    %52 = vector.broadcast %cst_22 : f32 to vector<8x8xf32>
    %53 = arith.mulf %51, %52 : vector<8x8xf32>
    %cst_23 = arith.constant -1.000000e+30 : f32
    %54 = vector.broadcast %cst_23 : f32 to vector<8x8xf32>
    %55 = arith.select %44, %53, %54 : vector<8x8xi1>, vector<8x8xf32>
    %cst_24 = arith.constant dense<0xFF800000> : vector<8xf32>
    %56 = vector.multi_reduction <maximumf>, %55, %cst_24 [1] : vector<8x8xf32> to vector<8xf32>
    %57 = vector.shape_cast %56 : vector<8xf32> to vector<8x1xf32>
    %58 = vector.broadcast %57 : vector<8x1xf32> to vector<8x8xf32>
    %59 = arith.subf %55, %58 : vector<8x8xf32>
    %60 = math.exp %59 : vector<8x8xf32>
    %cst_25 = arith.constant dense<0.000000e+00> : vector<8xf32>
    %61 = vector.multi_reduction <add>, %60, %cst_25 [1] : vector<8x8xf32> to vector<8xf32>
    %62 = vector.shape_cast %61 : vector<8xf32> to vector<8x1xf32>
    %63 = tpu.reciprocal %62 {approx = true} : vector<8x1xf32> -> vector<8x1xf32>
    %64 = vector.broadcast %63 : vector<8x1xf32> to vector<8x8xf32>
    %65 = arith.mulf %60, %64 : vector<8x8xf32>
    %66 = arith.truncf %65 : vector<8x8xf32> to vector<8x8xbf16>
    %cst_26 = arith.constant dense<0.000000e+00> : vector<8x8xf32>
    %67 = tpu.matmul %66, %50, %cst_26 {dimension_numbers = #tpu.dot_dimension_numbers<[1], [0], [0], [1], [0, 0, 1, 1], [], []>} : vector<8x8xbf16>, vector<8x8xbf16>, vector<8x8xf32> -> vector<8x8xf32>
    %c0_27 = arith.constant 0 : index
    %c0_28 = arith.constant 0 : index
    %68 = vector.load %arg27[%c0_27, %c0_28] : memref<16x32xf32, #tpu.memory_space<vmem>>, vector<8x8xf32>
    tpu.vector_store %arg27[%c0_27, %c0_28], %67 {strides = array<i32>} : memref<16x32xf32, #tpu.memory_space<vmem>>, vector<8x8xf32>,
    %69 = vector.extract_strided_slice %39 {offsets = [8, 0], sizes = [8, 8], strides = [1, 1]} : vector<16x32xf32> to vector<8x8xf32>
    %70 = arith.truncf %69 : vector<8x8xf32> to vector<8x8xbf16>
    %71 = vector.extract_strided_slice %40 {offsets = [8, 0], sizes = [8, 8], strides = [1, 1]} : vector<16x32xf32> to vector<8x8xf32>
    %72 = arith.truncf %71 : vector<8x8xf32> to vector<8x8xbf16>
    %73 = vector.extract_strided_slice %41 {offsets = [8, 0], sizes = [8, 8], strides = [1, 1]} : vector<16x32xf32> to vector<8x8xf32>
    %74 = arith.truncf %73 : vector<8x8xf32> to vector<8x8xbf16>
    %cst_29 = arith.constant dense<0.000000e+00> : vector<8x8xf32>
    %75 = tpu.matmul %70, %72, %cst_29 {dimension_numbers = #tpu.dot_dimension_numbers<[1], [1], [0], [0], [0, 0, 1, 0], [], []>} : vector<8x8xbf16>, vector<8x8xbf16>, vector<8x8xf32> -> vector<8x8xf32>
    %cst_30 = arith.constant 0.353553385 : f32
    %76 = vector.broadcast %cst_30 : f32 to vector<8x8xf32>
    %77 = arith.mulf %75, %76 : vector<8x8xf32>
    %cst_31 = arith.constant -1.000000e+30 : f32
    %78 = vector.broadcast %cst_31 : f32 to vector<8x8xf32>
    %79 = arith.select %44, %77, %78 : vector<8x8xi1>, vector<8x8xf32>
    %cst_32 = arith.constant dense<0xFF800000> : vector<8xf32>
    %80 = vector.multi_reduction <maximumf>, %79, %cst_32 [1] : vector<8x8xf32> to vector<8xf32>
    %81 = vector.shape_cast %80 : vector<8xf32> to vector<8x1xf32>
    %82 = vector.broadcast %81 : vector<8x1xf32> to vector<8x8xf32>
    %83 = arith.subf %79, %82 : vector<8x8xf32>
    %84 = math.exp %83 : vector<8x8xf32>
    %cst_33 = arith.constant dense<0.000000e+00> : vector<8xf32>
    %85 = vector.multi_reduction <add>, %84, %cst_33 [1] : vector<8x8xf32> to vector<8xf32>
    %86 = vector.shape_cast %85 : vector<8xf32> to vector<8x1xf32>
    %87 = tpu.reciprocal %86 {approx = true} : vector<8x1xf32> -> vector<8x1xf32>
    %88 = vector.broadcast %87 : vector<8x1xf32> to vector<8x8xf32>
    %89 = arith.mulf %84, %88 : vector<8x8xf32>
    %90 = arith.truncf %89 : vector<8x8xf32> to vector<8x8xbf16>
    %cst_34 = arith.constant dense<0.000000e+00> : vector<8x8xf32>
    %91 = tpu.matmul %90, %74, %cst_34 {dimension_numbers = #tpu.dot_dimension_numbers<[1], [0], [0], [1], [0, 0, 1, 1], [], []>} : vector<8x8xbf16>, vector<8x8xbf16>, vector<8x8xf32> -> vector<8x8xf32>
    %c8 = arith.constant 8 : index
    %c0_35 = arith.constant 0 : index
    %92 = vector.load %arg27[%c8, %c0_35] : memref<16x32xf32, #tpu.memory_space<vmem>>, vector<8x8xf32>
    tpu.vector_store %arg27[%c8, %c0_35], %91 {strides = array<i32>} : memref<16x32xf32, #tpu.memory_space<vmem>>, vector<8x8xf32>,
    %93 = vector.extract_strided_slice %39 {offsets = [0, 8], sizes = [8, 8], strides = [1, 1]} : vector<16x32xf32> to vector<8x8xf32>
    %94 = arith.truncf %93 : vector<8x8xf32> to vector<8x8xbf16>
    %95 = vector.extract_strided_slice %40 {offsets = [0, 8], sizes = [8, 8], strides = [1, 1]} : vector<16x32xf32> to vector<8x8xf32>
    %96 = arith.truncf %95 : vector<8x8xf32> to vector<8x8xbf16>
    %97 = vector.extract_strided_slice %41 {offsets = [0, 8], sizes = [8, 8], strides = [1, 1]} : vector<16x32xf32> to vector<8x8xf32>
    %98 = arith.truncf %97 : vector<8x8xf32> to vector<8x8xbf16>
    %cst_36 = arith.constant dense<0.000000e+00> : vector<8x8xf32>
    %99 = tpu.matmul %94, %96, %cst_36 {dimension_numbers = #tpu.dot_dimension_numbers<[1], [1], [0], [0], [0, 0, 1, 0], [], []>} : vector<8x8xbf16>, vector<8x8xbf16>, vector<8x8xf32> -> vector<8x8xf32>
    %cst_37 = arith.constant 0.353553385 : f32
    %100 = vector.broadcast %cst_37 : f32 to vector<8x8xf32>
    %101 = arith.mulf %99, %100 : vector<8x8xf32>
    %cst_38 = arith.constant -1.000000e+30 : f32
    %102 = vector.broadcast %cst_38 : f32 to vector<8x8xf32>
    %103 = arith.select %44, %101, %102 : vector<8x8xi1>, vector<8x8xf32>
    %cst_39 = arith.constant dense<0xFF800000> : vector<8xf32>
    %104 = vector.multi_reduction <maximumf>, %103, %cst_39 [1] : vector<8x8xf32> to vector<8xf32>
    %105 = vector.shape_cast %104 : vector<8xf32> to vector<8x1xf32>
    %106 = vector.broadcast %105 : vector<8x1xf32> to vector<8x8xf32>
    %107 = arith.subf %103, %106 : vector<8x8xf32>
    %108 = math.exp %107 : vector<8x8xf32>
    %cst_40 = arith.constant dense<0.000000e+00> : vector<8xf32>
    %109 = vector.multi_reduction <add>, %108, %cst_40 [1] : vector<8x8xf32> to vector<8xf32>
    %110 = vector.shape_cast %109 : vector<8xf32> to vector<8x1xf32>
    %111 = tpu.reciprocal %110 {approx = true} : vector<8x1xf32> -> vector<8x1xf32>
    %112 = vector.broadcast %111 : vector<8x1xf32> to vector<8x8xf32>
    %113 = arith.mulf %108, %112 : vector<8x8xf32>
    %114 = arith.truncf %113 : vector<8x8xf32> to vector<8x8xbf16>
    %cst_41 = arith.constant dense<0.000000e+00> : vector<8x8xf32>
    %115 = tpu.matmul %114, %98, %cst_41 {dimension_numbers = #tpu.dot_dimension_numbers<[1], [0], [0], [1], [0, 0, 1, 1], [], []>} : vector<8x8xbf16>, vector<8x8xbf16>, vector<8x8xf32> -> vector<8x8xf32>
    %c0_42 = arith.constant 0 : index
    %c8_43 = arith.constant 8 : index
    %116 = vector.load %arg27[%c0_42, %c8_43] : memref<16x32xf32, #tpu.memory_space<vmem>>, vector<8x8xf32>
    tpu.vector_store %arg27[%c0_42, %c8_43], %115 {strides = array<i32>} : memref<16x32xf32, #tpu.memory_space<vmem>>, vector<8x8xf32>,
    %117 = vector.extract_strided_slice %39 {offsets = [8, 8], sizes = [8, 8], strides = [1, 1]} : vector<16x32xf32> to vector<8x8xf32>
    %118 = arith.truncf %117 : vector<8x8xf32> to vector<8x8xbf16>
    %119 = vector.extract_strided_slice %40 {offsets = [8, 8], sizes = [8, 8], strides = [1, 1]} : vector<16x32xf32> to vector<8x8xf32>
    %120 = arith.truncf %119 : vector<8x8xf32> to vector<8x8xbf16>
    %121 = vector.extract_strided_slice %41 {offsets = [8, 8], sizes = [8, 8], strides = [1, 1]} : vector<16x32xf32> to vector<8x8xf32>
    %122 = arith.truncf %121 : vector<8x8xf32> to vector<8x8xbf16>
    %cst_44 = arith.constant dense<0.000000e+00> : vector<8x8xf32>
    %123 = tpu.matmul %118, %120, %cst_44 {dimension_numbers = #tpu.dot_dimension_numbers<[1], [1], [0], [0], [0, 0, 1, 0], [], []>} : vector<8x8xbf16>, vector<8x8xbf16>, vector<8x8xf32> -> vector<8x8xf32>
    %cst_45 = arith.constant 0.353553385 : f32
    %124 = vector.broadcast %cst_45 : f32 to vector<8x8xf32>
    %125 = arith.mulf %123, %124 : vector<8x8xf32>
    %cst_46 = arith.constant -1.000000e+30 : f32
    %126 = vector.broadcast %cst_46 : f32 to vector<8x8xf32>
    %127 = arith.select %44, %125, %126 : vector<8x8xi1>, vector<8x8xf32>
    %cst_47 = arith.constant dense<0xFF800000> : vector<8xf32>
    %128 = vector.multi_reduction <maximumf>, %127, %cst_47 [1] : vector<8x8xf32> to vector<8xf32>
    %129 = vector.shape_cast %128 : vector<8xf32> to vector<8x1xf32>
    %130 = vector.broadcast %129 : vector<8x1xf32> to vector<8x8xf32>
    %131 = arith.subf %127, %130 : vector<8x8xf32>
    %132 = math.exp %131 : vector<8x8xf32>
    %cst_48 = arith.constant dense<0.000000e+00> : vector<8xf32>
    %133 = vector.multi_reduction <add>, %132, %cst_48 [1] : vector<8x8xf32> to vector<8xf32>
    %134 = vector.shape_cast %133 : vector<8xf32> to vector<8x1xf32>
    %135 = tpu.reciprocal %134 {approx = true} : vector<8x1xf32> -> vector<8x1xf32>
    %136 = vector.broadcast %135 : vector<8x1xf32> to vector<8x8xf32>
    %137 = arith.mulf %132, %136 : vector<8x8xf32>
    %138 = arith.truncf %137 : vector<8x8xf32> to vector<8x8xbf16>
    %cst_49 = arith.constant dense<0.000000e+00> : vector<8x8xf32>
    %139 = tpu.matmul %138, %122, %cst_49 {dimension_numbers = #tpu.dot_dimension_numbers<[1], [0], [0], [1], [0, 0, 1, 1], [], []>} : vector<8x8xbf16>, vector<8x8xbf16>, vector<8x8xf32> -> vector<8x8xf32>
    %c8_50 = arith.constant 8 : index
    %c8_51 = arith.constant 8 : index
    %140 = vector.load %arg27[%c8_50, %c8_51] : memref<16x32xf32, #tpu.memory_space<vmem>>, vector<8x8xf32>
    tpu.vector_store %arg27[%c8_50, %c8_51], %139 {strides = array<i32>} : memref<16x32xf32, #tpu.memory_space<vmem>>, vector<8x8xf32>,
    %141 = vector.extract_strided_slice %39 {offsets = [0, 16], sizes = [8, 8], strides = [1, 1]} : vector<16x32xf32> to vector<8x8xf32>
    %142 = arith.truncf %141 : vector<8x8xf32> to vector<8x8xbf16>
    %143 = vector.extract_strided_slice %40 {offsets = [0, 16], sizes = [8, 8], strides = [1, 1]} : vector<16x32xf32> to vector<8x8xf32>
    %144 = arith.truncf %143 : vector<8x8xf32> to vector<8x8xbf16>
    %145 = vector.extract_strided_slice %41 {offsets = [0, 16], sizes = [8, 8], strides = [1, 1]} : vector<16x32xf32> to vector<8x8xf32>
    %146 = arith.truncf %145 : vector<8x8xf32> to vector<8x8xbf16>
    %cst_52 = arith.constant dense<0.000000e+00> : vector<8x8xf32>
    %147 = tpu.matmul %142, %144, %cst_52 {dimension_numbers = #tpu.dot_dimension_numbers<[1], [1], [0], [0], [0, 0, 1, 0], [], []>} : vector<8x8xbf16>, vector<8x8xbf16>, vector<8x8xf32> -> vector<8x8xf32>
    %cst_53 = arith.constant 0.353553385 : f32
    %148 = vector.broadcast %cst_53 : f32 to vector<8x8xf32>
    %149 = arith.mulf %147, %148 : vector<8x8xf32>
    %cst_54 = arith.constant -1.000000e+30 : f32
    %150 = vector.broadcast %cst_54 : f32 to vector<8x8xf32>
    %151 = arith.select %44, %149, %150 : vector<8x8xi1>, vector<8x8xf32>
    %cst_55 = arith.constant dense<0xFF800000> : vector<8xf32>
    %152 = vector.multi_reduction <maximumf>, %151, %cst_55 [1] : vector<8x8xf32> to vector<8xf32>
    %153 = vector.shape_cast %152 : vector<8xf32> to vector<8x1xf32>
    %154 = vector.broadcast %153 : vector<8x1xf32> to vector<8x8xf32>
    %155 = arith.subf %151, %154 : vector<8x8xf32>
    %156 = math.exp %155 : vector<8x8xf32>
    %cst_56 = arith.constant dense<0.000000e+00> : vector<8xf32>
    %157 = vector.multi_reduction <add>, %156, %cst_56 [1] : vector<8x8xf32> to vector<8xf32>
    %158 = vector.shape_cast %157 : vector<8xf32> to vector<8x1xf32>
    %159 = tpu.reciprocal %158 {approx = true} : vector<8x1xf32> -> vector<8x1xf32>
    %160 = vector.broadcast %159 : vector<8x1xf32> to vector<8x8xf32>
    %161 = arith.mulf %156, %160 : vector<8x8xf32>
    %162 = arith.truncf %161 : vector<8x8xf32> to vector<8x8xbf16>
    %cst_57 = arith.constant dense<0.000000e+00> : vector<8x8xf32>
    %163 = tpu.matmul %162, %146, %cst_57 {dimension_numbers = #tpu.dot_dimension_numbers<[1], [0], [0], [1], [0, 0, 1, 1], [], []>} : vector<8x8xbf16>, vector<8x8xbf16>, vector<8x8xf32> -> vector<8x8xf32>
    %c0_58 = arith.constant 0 : index
    %c16 = arith.constant 16 : index
    %164 = vector.load %arg27[%c0_58, %c16] : memref<16x32xf32, #tpu.memory_space<vmem>>, vector<8x8xf32>
    tpu.vector_store %arg27[%c0_58, %c16], %163 {strides = array<i32>} : memref<16x32xf32, #tpu.memory_space<vmem>>, vector<8x8xf32>,
    %165 = vector.extract_strided_slice %39 {offsets = [8, 16], sizes = [8, 8], strides = [1, 1]} : vector<16x32xf32> to vector<8x8xf32>
    %166 = arith.truncf %165 : vector<8x8xf32> to vector<8x8xbf16>
    %167 = vector.extract_strided_slice %40 {offsets = [8, 16], sizes = [8, 8], strides = [1, 1]} : vector<16x32xf32> to vector<8x8xf32>
    %168 = arith.truncf %167 : vector<8x8xf32> to vector<8x8xbf16>
    %169 = vector.extract_strided_slice %41 {offsets = [8, 16], sizes = [8, 8], strides = [1, 1]} : vector<16x32xf32> to vector<8x8xf32>
    %170 = arith.truncf %169 : vector<8x8xf32> to vector<8x8xbf16>
    %cst_59 = arith.constant dense<0.000000e+00> : vector<8x8xf32>
    %171 = tpu.matmul %166, %168, %cst_59 {dimension_numbers = #tpu.dot_dimension_numbers<[1], [1], [0], [0], [0, 0, 1, 0], [], []>} : vector<8x8xbf16>, vector<8x8xbf16>, vector<8x8xf32> -> vector<8x8xf32>
    %cst_60 = arith.constant 0.353553385 : f32
    %172 = vector.broadcast %cst_60 : f32 to vector<8x8xf32>
    %173 = arith.mulf %171, %172 : vector<8x8xf32>
    %cst_61 = arith.constant -1.000000e+30 : f32
    %174 = vector.broadcast %cst_61 : f32 to vector<8x8xf32>
    %175 = arith.select %44, %173, %174 : vector<8x8xi1>, vector<8x8xf32>
    %cst_62 = arith.constant dense<0xFF800000> : vector<8xf32>
    %176 = vector.multi_reduction <maximumf>, %175, %cst_62 [1] : vector<8x8xf32> to vector<8xf32>
    %177 = vector.shape_cast %176 : vector<8xf32> to vector<8x1xf32>
    %178 = vector.broadcast %177 : vector<8x1xf32> to vector<8x8xf32>
    %179 = arith.subf %175, %178 : vector<8x8xf32>
    %180 = math.exp %179 : vector<8x8xf32>
    %cst_63 = arith.constant dense<0.000000e+00> : vector<8xf32>
    %181 = vector.multi_reduction <add>, %180, %cst_63 [1] : vector<8x8xf32> to vector<8xf32>
    %182 = vector.shape_cast %181 : vector<8xf32> to vector<8x1xf32>
    %183 = tpu.reciprocal %182 {approx = true} : vector<8x1xf32> -> vector<8x1xf32>
    %184 = vector.broadcast %183 : vector<8x1xf32> to vector<8x8xf32>
    %185 = arith.mulf %180, %184 : vector<8x8xf32>
    %186 = arith.truncf %185 : vector<8x8xf32> to vector<8x8xbf16>
    %cst_64 = arith.constant dense<0.000000e+00> : vector<8x8xf32>
    %187 = tpu.matmul %186, %170, %cst_64 {dimension_numbers = #tpu.dot_dimension_numbers<[1], [0], [0], [1], [0, 0, 1, 1], [], []>} : vector<8x8xbf16>, vector<8x8xbf16>, vector<8x8xf32> -> vector<8x8xf32>
    %c8_65 = arith.constant 8 : index
    %c16_66 = arith.constant 16 : index
    %188 = vector.load %arg27[%c8_65, %c16_66] : memref<16x32xf32, #tpu.memory_space<vmem>>, vector<8x8xf32>
    tpu.vector_store %arg27[%c8_65, %c16_66], %187 {strides = array<i32>} : memref<16x32xf32, #tpu.memory_space<vmem>>, vector<8x8xf32>,
    %189 = vector.extract_strided_slice %39 {offsets = [0, 24], sizes = [8, 8], strides = [1, 1]} : vector<16x32xf32> to vector<8x8xf32>
    %190 = arith.truncf %189 : vector<8x8xf32> to vector<8x8xbf16>
    %191 = vector.extract_strided_slice %40 {offsets = [0, 24], sizes = [8, 8], strides = [1, 1]} : vector<16x32xf32> to vector<8x8xf32>
    %192 = arith.truncf %191 : vector<8x8xf32> to vector<8x8xbf16>
    %193 = vector.extract_strided_slice %41 {offsets = [0, 24], sizes = [8, 8], strides = [1, 1]} : vector<16x32xf32> to vector<8x8xf32>
    %194 = arith.truncf %193 : vector<8x8xf32> to vector<8x8xbf16>
    %cst_67 = arith.constant dense<0.000000e+00> : vector<8x8xf32>
    %195 = tpu.matmul %190, %192, %cst_67 {dimension_numbers = #tpu.dot_dimension_numbers<[1], [1], [0], [0], [0, 0, 1, 0], [], []>} : vector<8x8xbf16>, vector<8x8xbf16>, vector<8x8xf32> -> vector<8x8xf32>
    %cst_68 = arith.constant 0.353553385 : f32
    %196 = vector.broadcast %cst_68 : f32 to vector<8x8xf32>
    %197 = arith.mulf %195, %196 : vector<8x8xf32>
    %cst_69 = arith.constant -1.000000e+30 : f32
    %198 = vector.broadcast %cst_69 : f32 to vector<8x8xf32>
    %199 = arith.select %44, %197, %198 : vector<8x8xi1>, vector<8x8xf32>
    %cst_70 = arith.constant dense<0xFF800000> : vector<8xf32>
    %200 = vector.multi_reduction <maximumf>, %199, %cst_70 [1] : vector<8x8xf32> to vector<8xf32>
    %201 = vector.shape_cast %200 : vector<8xf32> to vector<8x1xf32>
    %202 = vector.broadcast %201 : vector<8x1xf32> to vector<8x8xf32>
    %203 = arith.subf %199, %202 : vector<8x8xf32>
    %204 = math.exp %203 : vector<8x8xf32>
    %cst_71 = arith.constant dense<0.000000e+00> : vector<8xf32>
    %205 = vector.multi_reduction <add>, %204, %cst_71 [1] : vector<8x8xf32> to vector<8xf32>
    %206 = vector.shape_cast %205 : vector<8xf32> to vector<8x1xf32>
    %207 = tpu.reciprocal %206 {approx = true} : vector<8x1xf32> -> vector<8x1xf32>
    %208 = vector.broadcast %207 : vector<8x1xf32> to vector<8x8xf32>
    %209 = arith.mulf %204, %208 : vector<8x8xf32>
    %210 = arith.truncf %209 : vector<8x8xf32> to vector<8x8xbf16>
    %cst_72 = arith.constant dense<0.000000e+00> : vector<8x8xf32>
    %211 = tpu.matmul %210, %194, %cst_72 {dimension_numbers = #tpu.dot_dimension_numbers<[1], [0], [0], [1], [0, 0, 1, 1], [], []>} : vector<8x8xbf16>, vector<8x8xbf16>, vector<8x8xf32> -> vector<8x8xf32>
    %c0_73 = arith.constant 0 : index
    %c24 = arith.constant 24 : index
    %212 = vector.load %arg27[%c0_73, %c24] : memref<16x32xf32, #tpu.memory_space<vmem>>, vector<8x8xf32>
    tpu.vector_store %arg27[%c0_73, %c24], %211 {strides = array<i32>} : memref<16x32xf32, #tpu.memory_space<vmem>>, vector<8x8xf32>,
    %213 = vector.extract_strided_slice %39 {offsets = [8, 24], sizes = [8, 8], strides = [1, 1]} : vector<16x32xf32> to vector<8x8xf32>
    %214 = arith.truncf %213 : vector<8x8xf32> to vector<8x8xbf16>
    %215 = vector.extract_strided_slice %40 {offsets = [8, 24], sizes = [8, 8], strides = [1, 1]} : vector<16x32xf32> to vector<8x8xf32>
    %216 = arith.truncf %215 : vector<8x8xf32> to vector<8x8xbf16>
    %217 = vector.extract_strided_slice %41 {offsets = [8, 24], sizes = [8, 8], strides = [1, 1]} : vector<16x32xf32> to vector<8x8xf32>
    %218 = arith.truncf %217 : vector<8x8xf32> to vector<8x8xbf16>
    %cst_74 = arith.constant dense<0.000000e+00> : vector<8x8xf32>
    %219 = tpu.matmul %214, %216, %cst_74 {dimension_numbers = #tpu.dot_dimension_numbers<[1], [1], [0], [0], [0, 0, 1, 0], [], []>} : vector<8x8xbf16>, vector<8x8xbf16>, vector<8x8xf32> -> vector<8x8xf32>
    %cst_75 = arith.constant 0.353553385 : f32
    %220 = vector.broadcast %cst_75 : f32 to vector<8x8xf32>
    %221 = arith.mulf %219, %220 : vector<8x8xf32>
    %cst_76 = arith.constant -1.000000e+30 : f32
    %222 = vector.broadcast %cst_76 : f32 to vector<8x8xf32>
    %223 = arith.select %44, %221, %222 : vector<8x8xi1>, vector<8x8xf32>
    %cst_77 = arith.constant dense<0xFF800000> : vector<8xf32>
    %224 = vector.multi_reduction <maximumf>, %223, %cst_77 [1] : vector<8x8xf32> to vector<8xf32>
    %225 = vector.shape_cast %224 : vector<8xf32> to vector<8x1xf32>
    %226 = vector.broadcast %225 : vector<8x1xf32> to vector<8x8xf32>
    %227 = arith.subf %223, %226 : vector<8x8xf32>
    %228 = math.exp %227 : vector<8x8xf32>
    %cst_78 = arith.constant dense<0.000000e+00> : vector<8xf32>
    %229 = vector.multi_reduction <add>, %228, %cst_78 [1] : vector<8x8xf32> to vector<8xf32>
    %230 = vector.shape_cast %229 : vector<8xf32> to vector<8x1xf32>
    %231 = tpu.reciprocal %230 {approx = true} : vector<8x1xf32> -> vector<8x1xf32>
    %232 = vector.broadcast %231 : vector<8x1xf32> to vector<8x8xf32>
    %233 = arith.mulf %228, %232 : vector<8x8xf32>
    %234 = arith.truncf %233 : vector<8x8xf32> to vector<8x8xbf16>
    %cst_79 = arith.constant dense<0.000000e+00> : vector<8x8xf32>
    %235 = tpu.matmul %234, %218, %cst_79 {dimension_numbers = #tpu.dot_dimension_numbers<[1], [0], [0], [1], [0, 0, 1, 1], [], []>} : vector<8x8xbf16>, vector<8x8xbf16>, vector<8x8xf32> -> vector<8x8xf32>
    %c8_80 = arith.constant 8 : index
    %c24_81 = arith.constant 24 : index
    %236 = vector.load %arg27[%c8_80, %c24_81] : memref<16x32xf32, #tpu.memory_space<vmem>>, vector<8x8xf32>
    tpu.vector_store %arg27[%c8_80, %c24_81], %235 {strides = array<i32>} : memref<16x32xf32, #tpu.memory_space<vmem>>, vector<8x8xf32>,
    %c0_82 = arith.constant 0 : index
    %c0_83 = arith.constant 0 : index
    %237 = vector.load %arg27[%c0_82, %c0_83] : memref<16x32xf32, #tpu.memory_space<vmem>>, vector<16x32xf32>
    %c0_84 = arith.constant 0 : index
    %c0_85 = arith.constant 0 : index
    %c0_86 = arith.constant 0 : index
    %238 = vector.load %arg7[%c0_84, %c0_85, %c0_86] : memref<1x32x32xbf16, #tpu.memory_space<vmem>>, vector<1x32x32xbf16>
    %239 = vector.shape_cast %238 : vector<1x32x32xbf16> to vector<32x32xbf16>
    %240 = arith.truncf %237 : vector<16x32xf32> to vector<16x32xbf16>
    %cst_87 = arith.constant dense<0.000000e+00> : vector<16x32xf32>
    %241 = tpu.matmul %240, %239, %cst_87 {dimension_numbers = #tpu.dot_dimension_numbers<[1], [0], [0], [1], [0, 0, 1, 1], [], []>} : vector<16x32xbf16>, vector<32x32xbf16>, vector<16x32xf32> -> vector<16x32xf32>
    %242 = arith.addf %3, %241 : vector<16x32xf32>
    %c0_88 = arith.constant 0 : index
    %c0_89 = arith.constant 0 : index
    %c0_90 = arith.constant 0 : index
    %243 = vector.load %arg8[%c0_88, %c0_89, %c0_90] : memref<1x1x32xf32, #tpu.memory_space<vmem>>, vector<1x1x32xf32>
    %244 = vector.shape_cast %243 : vector<1x1x32xf32> to vector<1x32xf32>
    %245 = vector.broadcast %244 : vector<1x32xf32> to vector<16x32xf32>
    %246 = arith.addf %242, %245 : vector<16x32xf32>
    %c0_91 = arith.constant 0 : index
    %c0_92 = arith.constant 0 : index
    %c0_93 = arith.constant 0 : index
    %247 = vector.load %arg9[%c0_91, %c0_92, %c0_93] : memref<1x1x32xf32, #tpu.memory_space<vmem>>, vector<1x1x32xf32>
    %248 = vector.shape_cast %247 : vector<1x1x32xf32> to vector<1x32xf32>
    %c0_94 = arith.constant 0 : index
    %c0_95 = arith.constant 0 : index
    %c0_96 = arith.constant 0 : index
    %249 = vector.load %arg10[%c0_94, %c0_95, %c0_96] : memref<1x1x32xf32, #tpu.memory_space<vmem>>, vector<1x1x32xf32>
    %250 = vector.shape_cast %249 : vector<1x1x32xf32> to vector<1x32xf32>
    %cst_97 = arith.constant dense<0.000000e+00> : vector<16xf32>
    %251 = vector.multi_reduction <add>, %246, %cst_97 [1] : vector<16x32xf32> to vector<16xf32>
    %252 = vector.shape_cast %251 : vector<16xf32> to vector<16x1xf32>
    %cst_98 = arith.constant 3.200000e+01 : f32
    %253 = vector.broadcast %cst_98 : f32 to vector<16x1xf32>
    %254 = arith.divf %252, %253 : vector<16x1xf32>
    %255 = vector.broadcast %254 : vector<16x1xf32> to vector<16x32xf32>
    %256 = arith.subf %246, %255 : vector<16x32xf32>
    %257 = arith.mulf %256, %256 : vector<16x32xf32>
    %cst_99 = arith.constant dense<0.000000e+00> : vector<16xf32>
    %258 = vector.multi_reduction <add>, %257, %cst_99 [1] : vector<16x32xf32> to vector<16xf32>
    %259 = vector.shape_cast %258 : vector<16xf32> to vector<16x1xf32>
    %cst_100 = arith.constant 3.200000e+01 : f32
    %260 = vector.broadcast %cst_100 : f32 to vector<16x1xf32>
    %261 = arith.divf %259, %260 : vector<16x1xf32>
    %262 = vector.broadcast %254 : vector<16x1xf32> to vector<16x32xf32>
    %263 = arith.subf %246, %262 : vector<16x32xf32>
    %cst_101 = arith.constant 9.99999974E-6 : f32
    %264 = vector.broadcast %cst_101 : f32 to vector<16x1xf32>
    %265 = arith.addf %261, %264 : vector<16x1xf32>
    %266 = math.rsqrt %265 : vector<16x1xf32>
    %267 = vector.broadcast %266 : vector<16x1xf32> to vector<16x32xf32>
    %268 = arith.mulf %263, %267 : vector<16x32xf32>
    %269 = vector.broadcast %248 : vector<1x32xf32> to vector<16x32xf32>
    %270 = arith.mulf %268, %269 : vector<16x32xf32>
    %271 = vector.broadcast %250 : vector<1x32xf32> to vector<16x32xf32>
    %272 = arith.addf %270, %271 : vector<16x32xf32>
    %c0_102 = arith.constant 0 : index
    %c0_103 = arith.constant 0 : index
    %c0_104 = arith.constant 0 : index
    %273 = vector.load %arg11[%c0_102, %c0_103, %c0_104] : memref<1x32x32xbf16, #tpu.memory_space<vmem>>, vector<1x32x32xbf16>
    %274 = vector.shape_cast %273 : vector<1x32x32xbf16> to vector<32x32xbf16>
    %275 = arith.truncf %272 : vector<16x32xf32> to vector<16x32xbf16>
    %cst_105 = arith.constant dense<0.000000e+00> : vector<16x32xf32>
    %276 = tpu.matmul %275, %274, %cst_105 {dimension_numbers = #tpu.dot_dimension_numbers<[1], [0], [0], [1], [0, 0, 1, 1], [], []>} : vector<16x32xbf16>, vector<32x32xbf16>, vector<16x32xf32> -> vector<16x32xf32>
    %c0_106 = arith.constant 0 : index
    %c0_107 = arith.constant 0 : index
    %c0_108 = arith.constant 0 : index
    %277 = vector.load %arg12[%c0_106, %c0_107, %c0_108] : memref<1x1x32xf32, #tpu.memory_space<vmem>>, vector<1x1x32xf32>
    %278 = vector.shape_cast %277 : vector<1x1x32xf32> to vector<1x32xf32>
    %279 = vector.broadcast %278 : vector<1x32xf32> to vector<16x32xf32>
    %280 = arith.addf %276, %279 : vector<16x32xf32>
    %c0_109 = arith.constant 0 : index
    %c0_110 = arith.constant 0 : index
    %c0_111 = arith.constant 0 : index
    %281 = vector.load %arg13[%c0_109, %c0_110, %c0_111] : memref<1x32x32xbf16, #tpu.memory_space<vmem>>, vector<1x32x32xbf16>
    %282 = vector.shape_cast %281 : vector<1x32x32xbf16> to vector<32x32xbf16>
    %cst_112 = arith.constant dense<0.000000e+00> : vector<10x32xf32>
    %283 = tpu.matmul %4, %282, %cst_112 {dimension_numbers = #tpu.dot_dimension_numbers<[1], [0], [0], [1], [0, 0, 1, 1], [], []>} : vector<10x32xbf16>, vector<32x32xbf16>, vector<10x32xf32> -> vector<10x32xf32>
    %c0_113 = arith.constant 0 : index
    %c0_114 = arith.constant 0 : index
    %c0_115 = arith.constant 0 : index
    %284 = vector.load %arg14[%c0_113, %c0_114, %c0_115] : memref<1x1x32xf32, #tpu.memory_space<vmem>>, vector<1x1x32xf32>
    %285 = vector.shape_cast %284 : vector<1x1x32xf32> to vector<1x32xf32>
    %286 = vector.broadcast %285 : vector<1x32xf32> to vector<10x32xf32>
    %287 = arith.addf %283, %286 : vector<10x32xf32>
    %c0_116 = arith.constant 0 : index
    %c0_117 = arith.constant 0 : index
    %c0_118 = arith.constant 0 : index
    %288 = vector.load %arg15[%c0_116, %c0_117, %c0_118] : memref<1x32x32xbf16, #tpu.memory_space<vmem>>, vector<1x32x32xbf16>
    %289 = vector.shape_cast %288 : vector<1x32x32xbf16> to vector<32x32xbf16>
    %cst_119 = arith.constant dense<0.000000e+00> : vector<10x32xf32>
    %290 = tpu.matmul %4, %289, %cst_119 {dimension_numbers = #tpu.dot_dimension_numbers<[1], [0], [0], [1], [0, 0, 1, 1], [], []>} : vector<10x32xbf16>, vector<32x32xbf16>, vector<10x32xf32> -> vector<10x32xf32>
    %c0_120 = arith.constant 0 : index
    %c0_121 = arith.constant 0 : index
    %c0_122 = arith.constant 0 : index
    %291 = vector.load %arg16[%c0_120, %c0_121, %c0_122] : memref<1x1x32xf32, #tpu.memory_space<vmem>>, vector<1x1x32xf32>
    %292 = vector.shape_cast %291 : vector<1x1x32xf32> to vector<1x32xf32>
    %293 = vector.broadcast %292 : vector<1x32xf32> to vector<10x32xf32>
    %294 = arith.addf %290, %293 : vector<10x32xf32>
    %295 = vector.extract_strided_slice %280 {offsets = [0, 0], sizes = [8, 8], strides = [1, 1]} : vector<16x32xf32> to vector<8x8xf32>
    %296 = arith.truncf %295 : vector<8x8xf32> to vector<8x8xbf16>
    %297 = vector.extract_strided_slice %287 {offsets = [0, 0], sizes = [5, 8], strides = [1, 1]} : vector<10x32xf32> to vector<5x8xf32>
    %298 = arith.truncf %297 : vector<5x8xf32> to vector<5x8xbf16>
    %299 = vector.extract_strided_slice %294 {offsets = [0, 0], sizes = [5, 8], strides = [1, 1]} : vector<10x32xf32> to vector<5x8xf32>
    %300 = arith.truncf %299 : vector<5x8xf32> to vector<5x8xbf16>
    %cst_123 = arith.constant dense<0.000000e+00> : vector<8x5xf32>
    %301 = tpu.matmul %296, %298, %cst_123 {dimension_numbers = #tpu.dot_dimension_numbers<[1], [1], [0], [0], [0, 0, 1, 0], [], []>} : vector<8x8xbf16>, vector<5x8xbf16>, vector<8x5xf32> -> vector<8x5xf32>
    %cst_124 = arith.constant 0.353553385 : f32
    %302 = vector.broadcast %cst_124 : f32 to vector<8x5xf32>
    %303 = arith.mulf %301, %302 : vector<8x5xf32>
    %cst_125 = arith.constant dense<0xFF800000> : vector<8xf32>
    %304 = vector.multi_reduction <maximumf>, %303, %cst_125 [1] : vector<8x5xf32> to vector<8xf32>
    %305 = vector.shape_cast %304 : vector<8xf32> to vector<8x1xf32>
    %306 = vector.broadcast %305 : vector<8x1xf32> to vector<8x5xf32>
    %307 = arith.subf %303, %306 : vector<8x5xf32>
    %308 = math.exp %307 : vector<8x5xf32>
    %cst_126 = arith.constant dense<0.000000e+00> : vector<8xf32>
    %309 = vector.multi_reduction <add>, %308, %cst_126 [1] : vector<8x5xf32> to vector<8xf32>
    %310 = vector.shape_cast %309 : vector<8xf32> to vector<8x1xf32>
    %311 = tpu.reciprocal %310 {approx = true} : vector<8x1xf32> -> vector<8x1xf32>
    %312 = vector.broadcast %311 : vector<8x1xf32> to vector<8x5xf32>
    %313 = arith.mulf %308, %312 : vector<8x5xf32>
    %314 = arith.truncf %313 : vector<8x5xf32> to vector<8x5xbf16>
    %cst_127 = arith.constant dense<0.000000e+00> : vector<8x8xf32>
    %315 = tpu.matmul %314, %300, %cst_127 {dimension_numbers = #tpu.dot_dimension_numbers<[1], [0], [0], [1], [0, 0, 1, 1], [], []>} : vector<8x5xbf16>, vector<5x8xbf16>, vector<8x8xf32> -> vector<8x8xf32>
    %c0_128 = arith.constant 0 : index
    %c0_129 = arith.constant 0 : index
    %316 = vector.load %arg27[%c0_128, %c0_129] : memref<16x32xf32, #tpu.memory_space<vmem>>, vector<8x8xf32>
    tpu.vector_store %arg27[%c0_128, %c0_129], %315 {strides = array<i32>} : memref<16x32xf32, #tpu.memory_space<vmem>>, vector<8x8xf32>,
    %317 = vector.extract_strided_slice %280 {offsets = [8, 0], sizes = [8, 8], strides = [1, 1]} : vector<16x32xf32> to vector<8x8xf32>
    %318 = arith.truncf %317 : vector<8x8xf32> to vector<8x8xbf16>
    %319 = vector.extract_strided_slice %287 {offsets = [5, 0], sizes = [5, 8], strides = [1, 1]} : vector<10x32xf32> to vector<5x8xf32>
    %320 = arith.truncf %319 : vector<5x8xf32> to vector<5x8xbf16>
    %321 = vector.extract_strided_slice %294 {offsets = [5, 0], sizes = [5, 8], strides = [1, 1]} : vector<10x32xf32> to vector<5x8xf32>
    %322 = arith.truncf %321 : vector<5x8xf32> to vector<5x8xbf16>
    %cst_130 = arith.constant dense<0.000000e+00> : vector<8x5xf32>
    %323 = tpu.matmul %318, %320, %cst_130 {dimension_numbers = #tpu.dot_dimension_numbers<[1], [1], [0], [0], [0, 0, 1, 0], [], []>} : vector<8x8xbf16>, vector<5x8xbf16>, vector<8x5xf32> -> vector<8x5xf32>
    %cst_131 = arith.constant 0.353553385 : f32
    %324 = vector.broadcast %cst_131 : f32 to vector<8x5xf32>
    %325 = arith.mulf %323, %324 : vector<8x5xf32>
    %cst_132 = arith.constant dense<0xFF800000> : vector<8xf32>
    %326 = vector.multi_reduction <maximumf>, %325, %cst_132 [1] : vector<8x5xf32> to vector<8xf32>
    %327 = vector.shape_cast %326 : vector<8xf32> to vector<8x1xf32>
    %328 = vector.broadcast %327 : vector<8x1xf32> to vector<8x5xf32>
    %329 = arith.subf %325, %328 : vector<8x5xf32>
    %330 = math.exp %329 : vector<8x5xf32>
    %cst_133 = arith.constant dense<0.000000e+00> : vector<8xf32>
    %331 = vector.multi_reduction <add>, %330, %cst_133 [1] : vector<8x5xf32> to vector<8xf32>
    %332 = vector.shape_cast %331 : vector<8xf32> to vector<8x1xf32>
    %333 = tpu.reciprocal %332 {approx = true} : vector<8x1xf32> -> vector<8x1xf32>
    %334 = vector.broadcast %333 : vector<8x1xf32> to vector<8x5xf32>
    %335 = arith.mulf %330, %334 : vector<8x5xf32>
    %336 = arith.truncf %335 : vector<8x5xf32> to vector<8x5xbf16>
    %cst_134 = arith.constant dense<0.000000e+00> : vector<8x8xf32>
    %337 = tpu.matmul %336, %322, %cst_134 {dimension_numbers = #tpu.dot_dimension_numbers<[1], [0], [0], [1], [0, 0, 1, 1], [], []>} : vector<8x5xbf16>, vector<5x8xbf16>, vector<8x8xf32> -> vector<8x8xf32>
    %c8_135 = arith.constant 8 : index
    %c0_136 = arith.constant 0 : index
    %338 = vector.load %arg27[%c8_135, %c0_136] : memref<16x32xf32, #tpu.memory_space<vmem>>, vector<8x8xf32>
    tpu.vector_store %arg27[%c8_135, %c0_136], %337 {strides = array<i32>} : memref<16x32xf32, #tpu.memory_space<vmem>>, vector<8x8xf32>,
    %339 = vector.extract_strided_slice %280 {offsets = [0, 8], sizes = [8, 8], strides = [1, 1]} : vector<16x32xf32> to vector<8x8xf32>
    %340 = arith.truncf %339 : vector<8x8xf32> to vector<8x8xbf16>
    %341 = vector.extract_strided_slice %287 {offsets = [0, 8], sizes = [5, 8], strides = [1, 1]} : vector<10x32xf32> to vector<5x8xf32>
    %342 = arith.truncf %341 : vector<5x8xf32> to vector<5x8xbf16>
    %343 = vector.extract_strided_slice %294 {offsets = [0, 8], sizes = [5, 8], strides = [1, 1]} : vector<10x32xf32> to vector<5x8xf32>
    %344 = arith.truncf %343 : vector<5x8xf32> to vector<5x8xbf16>
    %cst_137 = arith.constant dense<0.000000e+00> : vector<8x5xf32>
    %345 = tpu.matmul %340, %342, %cst_137 {dimension_numbers = #tpu.dot_dimension_numbers<[1], [1], [0], [0], [0, 0, 1, 0], [], []>} : vector<8x8xbf16>, vector<5x8xbf16>, vector<8x5xf32> -> vector<8x5xf32>
    %cst_138 = arith.constant 0.353553385 : f32
    %346 = vector.broadcast %cst_138 : f32 to vector<8x5xf32>
    %347 = arith.mulf %345, %346 : vector<8x5xf32>
    %cst_139 = arith.constant dense<0xFF800000> : vector<8xf32>
    %348 = vector.multi_reduction <maximumf>, %347, %cst_139 [1] : vector<8x5xf32> to vector<8xf32>
    %349 = vector.shape_cast %348 : vector<8xf32> to vector<8x1xf32>
    %350 = vector.broadcast %349 : vector<8x1xf32> to vector<8x5xf32>
    %351 = arith.subf %347, %350 : vector<8x5xf32>
    %352 = math.exp %351 : vector<8x5xf32>
    %cst_140 = arith.constant dense<0.000000e+00> : vector<8xf32>
    %353 = vector.multi_reduction <add>, %352, %cst_140 [1] : vector<8x5xf32> to vector<8xf32>
    %354 = vector.shape_cast %353 : vector<8xf32> to vector<8x1xf32>
    %355 = tpu.reciprocal %354 {approx = true} : vector<8x1xf32> -> vector<8x1xf32>
    %356 = vector.broadcast %355 : vector<8x1xf32> to vector<8x5xf32>
    %357 = arith.mulf %352, %356 : vector<8x5xf32>
    %358 = arith.truncf %357 : vector<8x5xf32> to vector<8x5xbf16>
    %cst_141 = arith.constant dense<0.000000e+00> : vector<8x8xf32>
    %359 = tpu.matmul %358, %344, %cst_141 {dimension_numbers = #tpu.dot_dimension_numbers<[1], [0], [0], [1], [0, 0, 1, 1], [], []>} : vector<8x5xbf16>, vector<5x8xbf16>, vector<8x8xf32> -> vector<8x8xf32>
    %c0_142 = arith.constant 0 : index
    %c8_143 = arith.constant 8 : index
    %360 = vector.load %arg27[%c0_142, %c8_143] : memref<16x32xf32, #tpu.memory_space<vmem>>, vector<8x8xf32>
    tpu.vector_store %arg27[%c0_142, %c8_143], %359 {strides = array<i32>} : memref<16x32xf32, #tpu.memory_space<vmem>>, vector<8x8xf32>,
    %361 = vector.extract_strided_slice %280 {offsets = [8, 8], sizes = [8, 8], strides = [1, 1]} : vector<16x32xf32> to vector<8x8xf32>
    %362 = arith.truncf %361 : vector<8x8xf32> to vector<8x8xbf16>
    %363 = vector.extract_strided_slice %287 {offsets = [5, 8], sizes = [5, 8], strides = [1, 1]} : vector<10x32xf32> to vector<5x8xf32>
    %364 = arith.truncf %363 : vector<5x8xf32> to vector<5x8xbf16>
    %365 = vector.extract_strided_slice %294 {offsets = [5, 8], sizes = [5, 8], strides = [1, 1]} : vector<10x32xf32> to vector<5x8xf32>
    %366 = arith.truncf %365 : vector<5x8xf32> to vector<5x8xbf16>
    %cst_144 = arith.constant dense<0.000000e+00> : vector<8x5xf32>
    %367 = tpu.matmul %362, %364, %cst_144 {dimension_numbers = #tpu.dot_dimension_numbers<[1], [1], [0], [0], [0, 0, 1, 0], [], []>} : vector<8x8xbf16>, vector<5x8xbf16>, vector<8x5xf32> -> vector<8x5xf32>
    %cst_145 = arith.constant 0.353553385 : f32
    %368 = vector.broadcast %cst_145 : f32 to vector<8x5xf32>
    %369 = arith.mulf %367, %368 : vector<8x5xf32>
    %cst_146 = arith.constant dense<0xFF800000> : vector<8xf32>
    %370 = vector.multi_reduction <maximumf>, %369, %cst_146 [1] : vector<8x5xf32> to vector<8xf32>
    %371 = vector.shape_cast %370 : vector<8xf32> to vector<8x1xf32>
    %372 = vector.broadcast %371 : vector<8x1xf32> to vector<8x5xf32>
    %373 = arith.subf %369, %372 : vector<8x5xf32>
    %374 = math.exp %373 : vector<8x5xf32>
    %cst_147 = arith.constant dense<0.000000e+00> : vector<8xf32>
    %375 = vector.multi_reduction <add>, %374, %cst_147 [1] : vector<8x5xf32> to vector<8xf32>
    %376 = vector.shape_cast %375 : vector<8xf32> to vector<8x1xf32>
    %377 = tpu.reciprocal %376 {approx = true} : vector<8x1xf32> -> vector<8x1xf32>
    %378 = vector.broadcast %377 : vector<8x1xf32> to vector<8x5xf32>
    %379 = arith.mulf %374, %378 : vector<8x5xf32>
    %380 = arith.truncf %379 : vector<8x5xf32> to vector<8x5xbf16>
    %cst_148 = arith.constant dense<0.000000e+00> : vector<8x8xf32>
    %381 = tpu.matmul %380, %366, %cst_148 {dimension_numbers = #tpu.dot_dimension_numbers<[1], [0], [0], [1], [0, 0, 1, 1], [], []>} : vector<8x5xbf16>, vector<5x8xbf16>, vector<8x8xf32> -> vector<8x8xf32>
    %c8_149 = arith.constant 8 : index
    %c8_150 = arith.constant 8 : index
    %382 = vector.load %arg27[%c8_149, %c8_150] : memref<16x32xf32, #tpu.memory_space<vmem>>, vector<8x8xf32>
    tpu.vector_store %arg27[%c8_149, %c8_150], %381 {strides = array<i32>} : memref<16x32xf32, #tpu.memory_space<vmem>>, vector<8x8xf32>,
    %383 = vector.extract_strided_slice %280 {offsets = [0, 16], sizes = [8, 8], strides = [1, 1]} : vector<16x32xf32> to vector<8x8xf32>
    %384 = arith.truncf %383 : vector<8x8xf32> to vector<8x8xbf16>
    %385 = vector.extract_strided_slice %287 {offsets = [0, 16], sizes = [5, 8], strides = [1, 1]} : vector<10x32xf32> to vector<5x8xf32>
    %386 = arith.truncf %385 : vector<5x8xf32> to vector<5x8xbf16>
    %387 = vector.extract_strided_slice %294 {offsets = [0, 16], sizes = [5, 8], strides = [1, 1]} : vector<10x32xf32> to vector<5x8xf32>
    %388 = arith.truncf %387 : vector<5x8xf32> to vector<5x8xbf16>
    %cst_151 = arith.constant dense<0.000000e+00> : vector<8x5xf32>
    %389 = tpu.matmul %384, %386, %cst_151 {dimension_numbers = #tpu.dot_dimension_numbers<[1], [1], [0], [0], [0, 0, 1, 0], [], []>} : vector<8x8xbf16>, vector<5x8xbf16>, vector<8x5xf32> -> vector<8x5xf32>
    %cst_152 = arith.constant 0.353553385 : f32
    %390 = vector.broadcast %cst_152 : f32 to vector<8x5xf32>
    %391 = arith.mulf %389, %390 : vector<8x5xf32>
    %cst_153 = arith.constant dense<0xFF800000> : vector<8xf32>
    %392 = vector.multi_reduction <maximumf>, %391, %cst_153 [1] : vector<8x5xf32> to vector<8xf32>
    %393 = vector.shape_cast %392 : vector<8xf32> to vector<8x1xf32>
    %394 = vector.broadcast %393 : vector<8x1xf32> to vector<8x5xf32>
    %395 = arith.subf %391, %394 : vector<8x5xf32>
    %396 = math.exp %395 : vector<8x5xf32>
    %cst_154 = arith.constant dense<0.000000e+00> : vector<8xf32>
    %397 = vector.multi_reduction <add>, %396, %cst_154 [1] : vector<8x5xf32> to vector<8xf32>
    %398 = vector.shape_cast %397 : vector<8xf32> to vector<8x1xf32>
    %399 = tpu.reciprocal %398 {approx = true} : vector<8x1xf32> -> vector<8x1xf32>
    %400 = vector.broadcast %399 : vector<8x1xf32> to vector<8x5xf32>
    %401 = arith.mulf %396, %400 : vector<8x5xf32>
    %402 = arith.truncf %401 : vector<8x5xf32> to vector<8x5xbf16>
    %cst_155 = arith.constant dense<0.000000e+00> : vector<8x8xf32>
    %403 = tpu.matmul %402, %388, %cst_155 {dimension_numbers = #tpu.dot_dimension_numbers<[1], [0], [0], [1], [0, 0, 1, 1], [], []>} : vector<8x5xbf16>, vector<5x8xbf16>, vector<8x8xf32> -> vector<8x8xf32>
    %c0_156 = arith.constant 0 : index
    %c16_157 = arith.constant 16 : index
    %404 = vector.load %arg27[%c0_156, %c16_157] : memref<16x32xf32, #tpu.memory_space<vmem>>, vector<8x8xf32>
    tpu.vector_store %arg27[%c0_156, %c16_157], %403 {strides = array<i32>} : memref<16x32xf32, #tpu.memory_space<vmem>>, vector<8x8xf32>,
    %405 = vector.extract_strided_slice %280 {offsets = [8, 16], sizes = [8, 8], strides = [1, 1]} : vector<16x32xf32> to vector<8x8xf32>
    %406 = arith.truncf %405 : vector<8x8xf32> to vector<8x8xbf16>
    %407 = vector.extract_strided_slice %287 {offsets = [5, 16], sizes = [5, 8], strides = [1, 1]} : vector<10x32xf32> to vector<5x8xf32>
    %408 = arith.truncf %407 : vector<5x8xf32> to vector<5x8xbf16>
    %409 = vector.extract_strided_slice %294 {offsets = [5, 16], sizes = [5, 8], strides = [1, 1]} : vector<10x32xf32> to vector<5x8xf32>
    %410 = arith.truncf %409 : vector<5x8xf32> to vector<5x8xbf16>
    %cst_158 = arith.constant dense<0.000000e+00> : vector<8x5xf32>
    %411 = tpu.matmul %406, %408, %cst_158 {dimension_numbers = #tpu.dot_dimension_numbers<[1], [1], [0], [0], [0, 0, 1, 0], [], []>} : vector<8x8xbf16>, vector<5x8xbf16>, vector<8x5xf32> -> vector<8x5xf32>
    %cst_159 = arith.constant 0.353553385 : f32
    %412 = vector.broadcast %cst_159 : f32 to vector<8x5xf32>
    %413 = arith.mulf %411, %412 : vector<8x5xf32>
    %cst_160 = arith.constant dense<0xFF800000> : vector<8xf32>
    %414 = vector.multi_reduction <maximumf>, %413, %cst_160 [1] : vector<8x5xf32> to vector<8xf32>
    %415 = vector.shape_cast %414 : vector<8xf32> to vector<8x1xf32>
    %416 = vector.broadcast %415 : vector<8x1xf32> to vector<8x5xf32>
    %417 = arith.subf %413, %416 : vector<8x5xf32>
    %418 = math.exp %417 : vector<8x5xf32>
    %cst_161 = arith.constant dense<0.000000e+00> : vector<8xf32>
    %419 = vector.multi_reduction <add>, %418, %cst_161 [1] : vector<8x5xf32> to vector<8xf32>
    %420 = vector.shape_cast %419 : vector<8xf32> to vector<8x1xf32>
    %421 = tpu.reciprocal %420 {approx = true} : vector<8x1xf32> -> vector<8x1xf32>
    %422 = vector.broadcast %421 : vector<8x1xf32> to vector<8x5xf32>
    %423 = arith.mulf %418, %422 : vector<8x5xf32>
    %424 = arith.truncf %423 : vector<8x5xf32> to vector<8x5xbf16>
    %cst_162 = arith.constant dense<0.000000e+00> : vector<8x8xf32>
    %425 = tpu.matmul %424, %410, %cst_162 {dimension_numbers = #tpu.dot_dimension_numbers<[1], [0], [0], [1], [0, 0, 1, 1], [], []>} : vector<8x5xbf16>, vector<5x8xbf16>, vector<8x8xf32> -> vector<8x8xf32>
    %c8_163 = arith.constant 8 : index
    %c16_164 = arith.constant 16 : index
    %426 = vector.load %arg27[%c8_163, %c16_164] : memref<16x32xf32, #tpu.memory_space<vmem>>, vector<8x8xf32>
    tpu.vector_store %arg27[%c8_163, %c16_164], %425 {strides = array<i32>} : memref<16x32xf32, #tpu.memory_space<vmem>>, vector<8x8xf32>,
    %427 = vector.extract_strided_slice %280 {offsets = [0, 24], sizes = [8, 8], strides = [1, 1]} : vector<16x32xf32> to vector<8x8xf32>
    %428 = arith.truncf %427 : vector<8x8xf32> to vector<8x8xbf16>
    %429 = vector.extract_strided_slice %287 {offsets = [0, 24], sizes = [5, 8], strides = [1, 1]} : vector<10x32xf32> to vector<5x8xf32>
    %430 = arith.truncf %429 : vector<5x8xf32> to vector<5x8xbf16>
    %431 = vector.extract_strided_slice %294 {offsets = [0, 24], sizes = [5, 8], strides = [1, 1]} : vector<10x32xf32> to vector<5x8xf32>
    %432 = arith.truncf %431 : vector<5x8xf32> to vector<5x8xbf16>
    %cst_165 = arith.constant dense<0.000000e+00> : vector<8x5xf32>
    %433 = tpu.matmul %428, %430, %cst_165 {dimension_numbers = #tpu.dot_dimension_numbers<[1], [1], [0], [0], [0, 0, 1, 0], [], []>} : vector<8x8xbf16>, vector<5x8xbf16>, vector<8x5xf32> -> vector<8x5xf32>
    %cst_166 = arith.constant 0.353553385 : f32
    %434 = vector.broadcast %cst_166 : f32 to vector<8x5xf32>
    %435 = arith.mulf %433, %434 : vector<8x5xf32>
    %cst_167 = arith.constant dense<0xFF800000> : vector<8xf32>
    %436 = vector.multi_reduction <maximumf>, %435, %cst_167 [1] : vector<8x5xf32> to vector<8xf32>
    %437 = vector.shape_cast %436 : vector<8xf32> to vector<8x1xf32>
    %438 = vector.broadcast %437 : vector<8x1xf32> to vector<8x5xf32>
    %439 = arith.subf %435, %438 : vector<8x5xf32>
    %440 = math.exp %439 : vector<8x5xf32>
    %cst_168 = arith.constant dense<0.000000e+00> : vector<8xf32>
    %441 = vector.multi_reduction <add>, %440, %cst_168 [1] : vector<8x5xf32> to vector<8xf32>
    %442 = vector.shape_cast %441 : vector<8xf32> to vector<8x1xf32>
    %443 = tpu.reciprocal %442 {approx = true} : vector<8x1xf32> -> vector<8x1xf32>
    %444 = vector.broadcast %443 : vector<8x1xf32> to vector<8x5xf32>
    %445 = arith.mulf %440, %444 : vector<8x5xf32>
    %446 = arith.truncf %445 : vector<8x5xf32> to vector<8x5xbf16>
    %cst_169 = arith.constant dense<0.000000e+00> : vector<8x8xf32>
    %447 = tpu.matmul %446, %432, %cst_169 {dimension_numbers = #tpu.dot_dimension_numbers<[1], [0], [0], [1], [0, 0, 1, 1], [], []>} : vector<8x5xbf16>, vector<5x8xbf16>, vector<8x8xf32> -> vector<8x8xf32>
    %c0_170 = arith.constant 0 : index
    %c24_171 = arith.constant 24 : index
    %448 = vector.load %arg27[%c0_170, %c24_171] : memref<16x32xf32, #tpu.memory_space<vmem>>, vector<8x8xf32>
    tpu.vector_store %arg27[%c0_170, %c24_171], %447 {strides = array<i32>} : memref<16x32xf32, #tpu.memory_space<vmem>>, vector<8x8xf32>,
    %449 = vector.extract_strided_slice %280 {offsets = [8, 24], sizes = [8, 8], strides = [1, 1]} : vector<16x32xf32> to vector<8x8xf32>
    %450 = arith.truncf %449 : vector<8x8xf32> to vector<8x8xbf16>
    %451 = vector.extract_strided_slice %287 {offsets = [5, 24], sizes = [5, 8], strides = [1, 1]} : vector<10x32xf32> to vector<5x8xf32>
    %452 = arith.truncf %451 : vector<5x8xf32> to vector<5x8xbf16>
    %453 = vector.extract_strided_slice %294 {offsets = [5, 24], sizes = [5, 8], strides = [1, 1]} : vector<10x32xf32> to vector<5x8xf32>
    %454 = arith.truncf %453 : vector<5x8xf32> to vector<5x8xbf16>
    %cst_172 = arith.constant dense<0.000000e+00> : vector<8x5xf32>
    %455 = tpu.matmul %450, %452, %cst_172 {dimension_numbers = #tpu.dot_dimension_numbers<[1], [1], [0], [0], [0, 0, 1, 0], [], []>} : vector<8x8xbf16>, vector<5x8xbf16>, vector<8x5xf32> -> vector<8x5xf32>
    %cst_173 = arith.constant 0.353553385 : f32
    %456 = vector.broadcast %cst_173 : f32 to vector<8x5xf32>
    %457 = arith.mulf %455, %456 : vector<8x5xf32>
    %cst_174 = arith.constant dense<0xFF800000> : vector<8xf32>
    %458 = vector.multi_reduction <maximumf>, %457, %cst_174 [1] : vector<8x5xf32> to vector<8xf32>
    %459 = vector.shape_cast %458 : vector<8xf32> to vector<8x1xf32>
    %460 = vector.broadcast %459 : vector<8x1xf32> to vector<8x5xf32>
    %461 = arith.subf %457, %460 : vector<8x5xf32>
    %462 = math.exp %461 : vector<8x5xf32>
    %cst_175 = arith.constant dense<0.000000e+00> : vector<8xf32>
    %463 = vector.multi_reduction <add>, %462, %cst_175 [1] : vector<8x5xf32> to vector<8xf32>
    %464 = vector.shape_cast %463 : vector<8xf32> to vector<8x1xf32>
    %465 = tpu.reciprocal %464 {approx = true} : vector<8x1xf32> -> vector<8x1xf32>
    %466 = vector.broadcast %465 : vector<8x1xf32> to vector<8x5xf32>
    %467 = arith.mulf %462, %466 : vector<8x5xf32>
    %468 = arith.truncf %467 : vector<8x5xf32> to vector<8x5xbf16>
    %cst_176 = arith.constant dense<0.000000e+00> : vector<8x8xf32>
    %469 = tpu.matmul %468, %454, %cst_176 {dimension_numbers = #tpu.dot_dimension_numbers<[1], [0], [0], [1], [0, 0, 1, 1], [], []>} : vector<8x5xbf16>, vector<5x8xbf16>, vector<8x8xf32> -> vector<8x8xf32>
    %c8_177 = arith.constant 8 : index
    %c24_178 = arith.constant 24 : index
    %470 = vector.load %arg27[%c8_177, %c24_178] : memref<16x32xf32, #tpu.memory_space<vmem>>, vector<8x8xf32>
    tpu.vector_store %arg27[%c8_177, %c24_178], %469 {strides = array<i32>} : memref<16x32xf32, #tpu.memory_space<vmem>>, vector<8x8xf32>,
    %c0_179 = arith.constant 0 : index
    %c0_180 = arith.constant 0 : index
    %471 = vector.load %arg27[%c0_179, %c0_180] : memref<16x32xf32, #tpu.memory_space<vmem>>, vector<16x32xf32>
    %c0_181 = arith.constant 0 : index
    %c0_182 = arith.constant 0 : index
    %c0_183 = arith.constant 0 : index
    %472 = vector.load %arg17[%c0_181, %c0_182, %c0_183] : memref<1x32x32xbf16, #tpu.memory_space<vmem>>, vector<1x32x32xbf16>
    %473 = vector.shape_cast %472 : vector<1x32x32xbf16> to vector<32x32xbf16>
    %474 = arith.truncf %471 : vector<16x32xf32> to vector<16x32xbf16>
    %cst_184 = arith.constant dense<0.000000e+00> : vector<16x32xf32>
    %475 = tpu.matmul %474, %473, %cst_184 {dimension_numbers = #tpu.dot_dimension_numbers<[1], [0], [0], [1], [0, 0, 1, 1], [], []>} : vector<16x32xbf16>, vector<32x32xbf16>, vector<16x32xf32> -> vector<16x32xf32>
    %476 = arith.addf %246, %475 : vector<16x32xf32>
    %c0_185 = arith.constant 0 : index
    %c0_186 = arith.constant 0 : index
    %c0_187 = arith.constant 0 : index
    %477 = vector.load %arg18[%c0_185, %c0_186, %c0_187] : memref<1x1x32xf32, #tpu.memory_space<vmem>>, vector<1x1x32xf32>
    %478 = vector.shape_cast %477 : vector<1x1x32xf32> to vector<1x32xf32>
    %479 = vector.broadcast %478 : vector<1x32xf32> to vector<16x32xf32>
    %480 = arith.addf %476, %479 : vector<16x32xf32>
    %c0_188 = arith.constant 0 : index
    %c0_189 = arith.constant 0 : index
    %c0_190 = arith.constant 0 : index
    %481 = vector.load %arg19[%c0_188, %c0_189, %c0_190] : memref<1x1x32xf32, #tpu.memory_space<vmem>>, vector<1x1x32xf32>
    %482 = vector.shape_cast %481 : vector<1x1x32xf32> to vector<1x32xf32>
    %c0_191 = arith.constant 0 : index
    %c0_192 = arith.constant 0 : index
    %c0_193 = arith.constant 0 : index
    %483 = vector.load %arg20[%c0_191, %c0_192, %c0_193] : memref<1x1x32xf32, #tpu.memory_space<vmem>>, vector<1x1x32xf32>
    %484 = vector.shape_cast %483 : vector<1x1x32xf32> to vector<1x32xf32>
    %cst_194 = arith.constant dense<0.000000e+00> : vector<16xf32>
    %485 = vector.multi_reduction <add>, %480, %cst_194 [1] : vector<16x32xf32> to vector<16xf32>
    %486 = vector.shape_cast %485 : vector<16xf32> to vector<16x1xf32>
    %cst_195 = arith.constant 3.200000e+01 : f32
    %487 = vector.broadcast %cst_195 : f32 to vector<16x1xf32>
    %488 = arith.divf %486, %487 : vector<16x1xf32>
    %489 = vector.broadcast %488 : vector<16x1xf32> to vector<16x32xf32>
    %490 = arith.subf %480, %489 : vector<16x32xf32>
    %491 = arith.mulf %490, %490 : vector<16x32xf32>
    %cst_196 = arith.constant dense<0.000000e+00> : vector<16xf32>
    %492 = vector.multi_reduction <add>, %491, %cst_196 [1] : vector<16x32xf32> to vector<16xf32>
    %493 = vector.shape_cast %492 : vector<16xf32> to vector<16x1xf32>
    %cst_197 = arith.constant 3.200000e+01 : f32
    %494 = vector.broadcast %cst_197 : f32 to vector<16x1xf32>
    %495 = arith.divf %493, %494 : vector<16x1xf32>
    %496 = vector.broadcast %488 : vector<16x1xf32> to vector<16x32xf32>
    %497 = arith.subf %480, %496 : vector<16x32xf32>
    %cst_198 = arith.constant 9.99999974E-6 : f32
    %498 = vector.broadcast %cst_198 : f32 to vector<16x1xf32>
    %499 = arith.addf %495, %498 : vector<16x1xf32>
    %500 = math.rsqrt %499 : vector<16x1xf32>
    %501 = vector.broadcast %500 : vector<16x1xf32> to vector<16x32xf32>
    %502 = arith.mulf %497, %501 : vector<16x32xf32>
    %503 = vector.broadcast %482 : vector<1x32xf32> to vector<16x32xf32>
    %504 = arith.mulf %502, %503 : vector<16x32xf32>
    %505 = vector.broadcast %484 : vector<1x32xf32> to vector<16x32xf32>
    %506 = arith.addf %504, %505 : vector<16x32xf32>
    %c0_199 = arith.constant 0 : index
    %c0_200 = arith.constant 0 : index
    %c0_201 = arith.constant 0 : index
    %507 = vector.load %arg21[%c0_199, %c0_200, %c0_201] : memref<1x32x128xbf16, #tpu.memory_space<vmem>>, vector<1x32x128xbf16>
    %508 = vector.shape_cast %507 : vector<1x32x128xbf16> to vector<32x128xbf16>
    %509 = arith.truncf %506 : vector<16x32xf32> to vector<16x32xbf16>
    %cst_202 = arith.constant dense<0.000000e+00> : vector<16x128xf32>
    %510 = tpu.matmul %509, %508, %cst_202 {dimension_numbers = #tpu.dot_dimension_numbers<[1], [0], [0], [1], [0, 0, 1, 1], [], []>} : vector<16x32xbf16>, vector<32x128xbf16>, vector<16x128xf32> -> vector<16x128xf32>
    %c0_203 = arith.constant 0 : index
    %c0_204 = arith.constant 0 : index
    %c0_205 = arith.constant 0 : index
    %511 = vector.load %arg22[%c0_203, %c0_204, %c0_205] : memref<1x1x128xf32, #tpu.memory_space<vmem>>, vector<1x1x128xf32>
    %512 = vector.shape_cast %511 : vector<1x1x128xf32> to vector<1x128xf32>
    %513 = vector.broadcast %512 : vector<1x128xf32> to vector<16x128xf32>
    %514 = arith.addf %510, %513 : vector<16x128xf32>
    %cst_206 = arith.constant 5.000000e-01 : f32
    %515 = vector.broadcast %cst_206 : f32 to vector<16x128xf32>
    %516 = arith.mulf %515, %514 : vector<16x128xf32>
    %cst_207 = arith.constant 4.471500e-02 : f32
    %517 = vector.broadcast %cst_207 : f32 to vector<16x128xf32>
    %518 = arith.mulf %517, %514 : vector<16x128xf32>
    %519 = arith.mulf %518, %514 : vector<16x128xf32>
    %520 = arith.mulf %519, %514 : vector<16x128xf32>
    %521 = arith.addf %514, %520 : vector<16x128xf32>
    %cst_208 = arith.constant 0.797884583 : f32
    %522 = vector.broadcast %cst_208 : f32 to vector<16x128xf32>
    %523 = arith.mulf %522, %521 : vector<16x128xf32>
    %524 = math.tanh %523 : vector<16x128xf32>
    %cst_209 = arith.constant 1.000000e+00 : f32
    %525 = vector.broadcast %cst_209 : f32 to vector<16x128xf32>
    %526 = arith.addf %525, %524 : vector<16x128xf32>
    %527 = arith.mulf %516, %526 : vector<16x128xf32>
    %c0_210 = arith.constant 0 : index
    %c0_211 = arith.constant 0 : index
    %c0_212 = arith.constant 0 : index
    %528 = vector.load %arg23[%c0_210, %c0_211, %c0_212] : memref<1x128x32xbf16, #tpu.memory_space<vmem>>, vector<1x128x32xbf16>
    %529 = vector.shape_cast %528 : vector<1x128x32xbf16> to vector<128x32xbf16>
    %530 = arith.truncf %527 : vector<16x128xf32> to vector<16x128xbf16>
    %cst_213 = arith.constant dense<0.000000e+00> : vector<16x32xf32>
    %531 = tpu.matmul %530, %529, %cst_213 {dimension_numbers = #tpu.dot_dimension_numbers<[1], [0], [0], [1], [0, 0, 1, 1], [], []>} : vector<16x128xbf16>, vector<128x32xbf16>, vector<16x32xf32> -> vector<16x32xf32>
    %532 = arith.addf %480, %531 : vector<16x32xf32>
    %c0_214 = arith.constant 0 : index
    %c0_215 = arith.constant 0 : index
    %c0_216 = arith.constant 0 : index
    %533 = vector.load %arg24[%c0_214, %c0_215, %c0_216] : memref<1x1x32xf32, #tpu.memory_space<vmem>>, vector<1x1x32xf32>
    %534 = vector.shape_cast %533 : vector<1x1x32xf32> to vector<1x32xf32>
    %535 = vector.broadcast %534 : vector<1x32xf32> to vector<16x32xf32>
    %536 = arith.addf %532, %535 : vector<16x32xf32>
    %c0_217 = arith.constant 0 : index
    %c0_218 = arith.constant 0 : index
    %537 = vector.load %arg26[%c0_217, %c0_218] : memref<16x32xf32, #tpu.memory_space<vmem>>, vector<16x32xf32>
    tpu.vector_store %arg26[%c0_217, %c0_218], %536 {strides = array<i32>} : memref<16x32xf32, #tpu.memory_space<vmem>>, vector<16x32xf32>,
    %c1_i32 = arith.constant 1 : i32
    %538 = arith.cmpi eq, %arg0, %c1_i32 : i32
    %539 = arith.extui %538 : i1 to i32
    %c0_i32_219 = arith.constant 0 : i32
    %540 = arith.cmpi ne, %539, %c0_i32_219 : i32
    scf.if %540 {
      %c0_220 = arith.constant 0 : index
      %c0_221 = arith.constant 0 : index
      %541 = vector.load %arg25[%c0_220, %c0_221] : memref<16x32xf32, #tpu.memory_space<vmem>>, vector<16x32xf32>
      tpu.vector_store %arg25[%c0_220, %c0_221], %536 {strides = array<i32>} : memref<16x32xf32, #tpu.memory_space<vmem>>, vector<16x32xf32>,
    } else {
    }
    return
  }
  func.func @transform_0(%arg0: i32) -> (i32, i32) {
    %c0_i32 = arith.constant 0 : i32
    %c0_i32_0 = arith.constant 0 : i32
    %c0_i32_1 = arith.constant 0 : i32
    return %c0_i32, %c0_i32_0 : i32, i32
  }
  func.func @transform_1(%arg0: i32) -> (i32, i32) {
    %c0_i32 = arith.constant 0 : i32
    %c0_i32_0 = arith.constant 0 : i32
    %c0_i32_1 = arith.constant 0 : i32
    return %c0_i32, %c0_i32_0 : i32, i32
  }
  func.func @transform_2(%arg0: i32) -> (i32, i32, i32) {
    %c0_i32 = arith.constant 0 : i32
    %c0_i32_0 = arith.constant 0 : i32
    %c0_i32_1 = arith.constant 0 : i32
    return %arg0, %c0_i32, %c0_i32_0 : i32, i32, i32
  }
  func.func @transform_3(%arg0: i32) -> (i32, i32, i32) {
    %c0_i32 = arith.constant 0 : i32
    %c0_i32_0 = arith.constant 0 : i32
    %c0_i32_1 = arith.constant 0 : i32
    return %arg0, %c0_i32, %c0_i32_0 : i32, i32, i32
  }
  func.func @transform_4(%arg0: i32) -> (i32, i32, i32) {
    %c0_i32 = arith.constant 0 : i32
    %c0_i32_0 = arith.constant 0 : i32
    %c0_i32_1 = arith.constant 0 : i32
    return %arg0, %c0_i32, %c0_i32_0 : i32, i32, i32
  }
  func.func @transform_5(%arg0: i32) -> (i32, i32, i32) {
    %c0_i32 = arith.constant 0 : i32
    %c0_i32_0 = arith.constant 0 : i32
    %c0_i32_1 = arith.constant 0 : i32
    return %arg0, %c0_i32, %c0_i32_0 : i32, i32, i32
  }
  func.func @transform_6(%arg0: i32) -> (i32, i32, i32) {
    %c0_i32 = arith.constant 0 : i32
    %c0_i32_0 = arith.constant 0 : i32
    %c0_i32_1 = arith.constant 0 : i32
    return %arg0, %c0_i32, %c0_i32_0 : i32, i32, i32
  }
  func.func @transform_7(%arg0: i32) -> (i32, i32, i32) {
    %c0_i32 = arith.constant 0 : i32
    %c0_i32_0 = arith.constant 0 : i32
    %c0_i32_1 = arith.constant 0 : i32
    return %arg0, %c0_i32, %c0_i32_0 : i32, i32, i32
  }
  func.func @transform_8(%arg0: i32) -> (i32, i32, i32) {
    %c0_i32 = arith.constant 0 : i32
    %c0_i32_0 = arith.constant 0 : i32
    %c0_i32_1 = arith.constant 0 : i32
    return %arg0, %c0_i32, %c0_i32_0 : i32, i32, i32
  }
  func.func @transform_9(%arg0: i32) -> (i32, i32, i32) {
    %c0_i32 = arith.constant 0 : i32
    %c0_i32_0 = arith.constant 0 : i32
    %c0_i32_1 = arith.constant 0 : i32
    return %arg0, %c0_i32, %c0_i32_0 : i32, i32, i32
  }
  func.func @transform_10(%arg0: i32) -> (i32, i32, i32) {
    %c0_i32 = arith.constant 0 : i32
    %c0_i32_0 = arith.constant 0 : i32
    %c0_i32_1 = arith.constant 0 : i32
    return %arg0, %c0_i32, %c0_i32_0 : i32, i32, i32
  }
  func.func @transform_11(%arg0: i32) -> (i32, i32, i32) {
    %c0_i32 = arith.constant 0 : i32
    %c0_i32_0 = arith.constant 0 : i32
    %c0_i32_1 = arith.constant 0 : i32
    return %arg0, %c0_i32, %c0_i32_0 : i32, i32, i32
  }
  func.func @transform_12(%arg0: i32) -> (i32, i32, i32) {
    %c0_i32 = arith.constant 0 : i32
    %c0_i32_0 = arith.constant 0 : i32
    %c0_i32_1 = arith.constant 0 : i32
    return %arg0, %c0_i32, %c0_i32_0 : i32, i32, i32
  }
  func.func @transform_13(%arg0: i32) -> (i32, i32, i32) {
    %c0_i32 = arith.constant 0 : i32
    %c0_i32_0 = arith.constant 0 : i32
    %c0_i32_1 = arith.constant 0 : i32
    return %arg0, %c0_i32, %c0_i32_0 : i32, i32, i32
  }
  func.func @transform_14(%arg0: i32) -> (i32, i32, i32) {
    %c0_i32 = arith.constant 0 : i32
    %c0_i32_0 = arith.constant 0 : i32
    %c0_i32_1 = arith.constant 0 : i32
    return %arg0, %c0_i32, %c0_i32_0 : i32, i32, i32
  }
  func.func @transform_15(%arg0: i32) -> (i32, i32, i32) {
    %c0_i32 = arith.constant 0 : i32
    %c0_i32_0 = arith.constant 0 : i32
    %c0_i32_1 = arith.constant 0 : i32
    return %arg0, %c0_i32, %c0_i32_0 : i32, i32, i32
  }
  func.func @transform_16(%arg0: i32) -> (i32, i32, i32) {
    %c0_i32 = arith.constant 0 : i32
    %c0_i32_0 = arith.constant 0 : i32
    %c0_i32_1 = arith.constant 0 : i32
    return %arg0, %c0_i32, %c0_i32_0 : i32, i32, i32
  }
  func.func @transform_17(%arg0: i32) -> (i32, i32, i32) {
    %c0_i32 = arith.constant 0 : i32
    %c0_i32_0 = arith.constant 0 : i32
    %c0_i32_1 = arith.constant 0 : i32
    return %arg0, %c0_i32, %c0_i32_0 : i32, i32, i32
  }
  func.func @transform_18(%arg0: i32) -> (i32, i32, i32) {
    %c0_i32 = arith.constant 0 : i32
    %c0_i32_0 = arith.constant 0 : i32
    %c0_i32_1 = arith.constant 0 : i32
    return %arg0, %c0_i32, %c0_i32_0 : i32, i32, i32
  }
  func.func @transform_19(%arg0: i32) -> (i32, i32, i32) {
    %c0_i32 = arith.constant 0 : i32
    %c0_i32_0 = arith.constant 0 : i32
    %c0_i32_1 = arith.constant 0 : i32
    return %arg0, %c0_i32, %c0_i32_0 : i32, i32, i32
  }
  func.func @transform_20(%arg0: i32) -> (i32, i32, i32) {
    %c0_i32 = arith.constant 0 : i32
    %c0_i32_0 = arith.constant 0 : i32
    %c0_i32_1 = arith.constant 0 : i32
    return %arg0, %c0_i32, %c0_i32_0 : i32, i32, i32
  }
  func.func @transform_21(%arg0: i32) -> (i32, i32, i32) {
    %c0_i32 = arith.constant 0 : i32
    %c0_i32_0 = arith.constant 0 : i32
    %c0_i32_1 = arith.constant 0 : i32
    return %arg0, %c0_i32, %c0_i32_0 : i32, i32, i32
  }
  func.func @transform_22(%arg0: i32) -> (i32, i32, i32) {
    %c0_i32 = arith.constant 0 : i32
    %c0_i32_0 = arith.constant 0 : i32
    %c0_i32_1 = arith.constant 0 : i32
    return %arg0, %c0_i32, %c0_i32_0 : i32, i32, i32
  }
  func.func @transform_23(%arg0: i32) -> (i32, i32, i32) {
    %c0_i32 = arith.constant 0 : i32
    %c0_i32_0 = arith.constant 0 : i32
    %c0_i32_1 = arith.constant 0 : i32
    return %arg0, %c0_i32, %c0_i32_0 : i32, i32, i32
  }
  func.func @transform_24(%arg0: i32) -> (i32, i32) {
    %c0_i32 = arith.constant 0 : i32
    %c0_i32_0 = arith.constant 0 : i32
    %c0_i32_1 = arith.constant 0 : i32
    return %c0_i32, %c0_i32_0 : i32, i32
  }
}

</mosaic_0001>

<bundles_post_ra>
// kernel: tile.9
= control target key start
LH: loop header
LB: loop body
LE: loop exit
PB: predicated region body
PF: predicated region fallthrough
CT: control target
= control target key end

     0   :  { %vm3_vm0 = vcmask 261120   ;;  %s34_s0 = inlined_call_operand.vmem [shape: f32[2,5,32], index: 0, kind: input, shape index: {}]   ;;  %s35_s1 = inlined_call_operand.vmem [shape: f32[10,32], index: 1, kind: output, shape index: {}]  }
   0x1   :  { %v2_v0 = vld [vmem:[%s34_s0] sm:$0x1f]   ;;  %v10_v1 = vld [vmem:[%s34_s0 + $0x8] sm:$0x1f]  }
   0x2   :  { %4 = vst.msk [vmem:[%s35_s1] sm:$0x1f] %vm3_vm0, %v2_v0   ;;  %11 = vst.msk [vmem:[%s35_s1 + $0x5] sm:$0x1f] %vm3_vm0, %v10_v1  }

// kernel: _lambda_.4
= control target key start
LH: loop header
LB: loop body
LE: loop exit
PB: predicated region body
PF: predicated region fallthrough
CT: control target
= control target key end

     0   :  { %v219_v0 = vmov 0   ;;  %vm128_vm0 = vcmask 523264   ;;  %vm176_vm1 = vcmask 253952   ;;  %vm179_vm2 = vcmask 257024   ;;  %s316_s1 = inlined_call_operand.vmem [shape: bf16[192,32], index: 1, kind: input, shape index: {}]   ;;  %s317_s0 = inlined_call_operand.vmem [shape: f32[8,192], index: 0, kind: input, shape index: {}]   ;;  %s318_s3 = inlined_call_operand.vmem [shape: f32[1,32], index: 3, kind: input, shape index: {}]   ;;  %s319_s4 = inlined_call_operand.vmem [shape: f32[5,32], index: 4, kind: input, shape index: {}]   ;;  %s320_s5 = inlined_call_operand.vmem [shape: f32[10,32], index: 5, kind: output, shape index: {}]   ;;  %s321_s2 = inlined_call_operand.vmem [shape: f32[1,32], index: 2, kind: input, shape index: {}]  }
   0x1   :  { %132 = vmatprep.subr.bf16.mxu0 %v219_v0  ;;  %v207_v1 = vld [vmem:[%s316_s1] sm:$0xff]   ;;  %v208_v2 = vld [vmem:[%s316_s1 + $0x8] sm:$0xff]   ;;  %v209_v3 = vld [vmem:[%s316_s1 + $0x10] sm:$0xff]   ;;  %vm186_vm3 = vcmask 261124  }
   0x2   :  { %133 = vmatpush1.bf16.msra.mxu0 %v207_v1  ;;  %v210_v4 = vld [vmem:[%s316_s1 + $0x18] sm:$0xff]   ;;  %v22_v5 = vld [vmem:[%s317_s0 + $0x8] sm:$0xff]  ;;  %v211_v7 = vld [vmem:[%s316_s1 + $0x20] sm:$0xff]  }
   0x3   :  { %134 = vmatprep.subr.bf16.mxu0 %v219_v0  ;;  %v48_v6 = vpack.c.bf16 %v22_v5, %v22_v5  ;;  %v212_v8 = vld [vmem:[%s316_s1 + $0x28] sm:$0xff]   ;;  %v213_v9 = vld [vmem:[%s316_s1 + $0x30] sm:$0xff]   ;;  %v214_v10 = vld [vmem:[%s316_s1 + $0x38] sm:$0xff]  }
   0x4   :  { %v215_v11 = vld [vmem:[%s316_s1 + $0x40] sm:$0xff]   ;;  %v216_v12 = vld [vmem:[%s316_s1 + $0x48] sm:$0xff]   ;;  %v217_v13 = vld [vmem:[%s316_s1 + $0x50] sm:$0xff]  }
   0x5   :  { %205 = vmatprep.mubr.msk.bf16.mxu0 %vm128_vm0, %v48_v6  ;;  %v218_v14 = vld [vmem:[%s316_s1 + $0x58] sm:$0xff]   ;;  %v21_v15 = vld [vmem:[%s317_s0] sm:$0xff] }
   0x6   :  { %135 = vmatpush1.bf16.msra.mxu0 %v208_v2  ;;  %v47_v16 = vpack.c.bf16 %v21_v15, %v21_v15  ;;  %v172_v17 = vld [vmem:[%s318_s3] sm:$0x1]  ;;  %v175_v20 = vld [vmem:[%s319_s4 + $0x1] sm:$0xf] }
   0x7   :  { %136 = vmatprep.subr.bf16.mxu0 %v219_v0  ;;  %v173_v18 = vld [vmem:[%s319_s4] sm:$0x1]  ;;  %v183_v22 = vrot.slane %v175_v20, 4 }
   0x8   :  { %v174_v19 = vadd.f32 %v173_v18, %v172_v17  ;;  %v192_v21 = vld [vmem:[%s321_s2] ss:$0 sm:$0xff] }
   0xa   :  { %137 = vmatpush1.bf16.msra.mxu0 %v209_v3  ;;  %177 = vst.msk [vmem:[%s320_s5] sm:$0x1] %vm176_vm1, %v174_v19  ;;  %181 = vst.msk [vmem:[%s320_s5 + $0x5] sm:$0x1] %vm176_vm1, %v174_v19 }
   0xb   :  { %138 = vmatprep.subr.bf16.mxu0 %v219_v0 }
   0xe   :  { %139 = vmatpush1.bf16.msra.mxu0 %v210_v4 }
   0xf   :  { %140 = vmatprep.subr.bf16.mxu0 %v219_v0 }
  0x12   :  { %141 = vmatpush1.bf16.msra.mxu0 %v211_v7 }
  0x13   :  { %142 = vmatprep.subr.bf16.mxu0 %v219_v0 }
  0x16   :  { %143 = vmatpush1.bf16.msra.mxu0 %v212_v8 }
  0x17   :  { %144 = vmatprep.subr.bf16.mxu0 %v219_v0 }
  0x1a   :  { %145 = vmatpush1.bf16.msra.mxu0 %v213_v9 }
  0x1b   :  { %146 = vmatprep.subr.bf16.mxu0 %v219_v0 }
  0x1e   :  { %147 = vmatpush1.bf16.msra.mxu0 %v214_v10 }
  0x1f   :  { %148 = vmatprep.subr.bf16.mxu0 %v219_v0 }
  0x22   :  { %149 = vmatpush1.bf16.msra.mxu0 %v215_v11 }
  0x23   :  { %150 = vmatprep.subr.bf16.mxu0 %v219_v0 }
  0x26   :  { %151 = vmatpush1.bf16.msra.mxu0 %v216_v12 }
  0x27   :  { %152 = vmatprep.subr.bf16.mxu0 %v219_v0 }
  0x2a   :  { %153 = vmatpush1.bf16.msra.mxu0 %v217_v13 }
  0x2b   :  { %154 = vmatprep.subr.bf16.mxu0 %v219_v0 }
  0x2e   :  { %155 = vmatpush1.bf16.msra.mxu0 %v218_v14 }
  0x31   :  { %165 = vmatmul.mubr.bf16.vlgmr.msra.gmra.mrb[0].mxu0 %v47_v16 }
 0x104   :  { %v166_v23 = vpop.f32.mrb[0].mxu0 }
 0x105   :  { %v167_v24 = vadd.f32 %v192_v21, %v166_v23  ;;  %v168_v25 = vpop.f32.mrb[1].mxu0 }
 0x106   :  { %v169_v26 = vpop.f32.mrb[2].mxu0 }
 0x107   :  { %v178_v27 = vadd.f32 %v175_v20, %v167_v24  ;;  %v185_v28 = vadd.f32 %v183_v22, %v167_v24  ;;  %v170_v29 = vpop.f32.mrb[3].mxu0 }
 0x109   :  { %180 = vst.msk [vmem:[%s320_s5 + $0x1] sm:$0xf] %vm179_vm2, %v178_v27 }
 0x10a   :  { %187 = vst.msk [vmem:[%s320_s5 + $0x2] sm:$0xf0] %vm186_vm3, %v185_v28 }

// kernel: _lambda_.7
= control target key start
LH: loop header
LB: loop body
LE: loop exit
PB: predicated region body
PF: predicated region fallthrough
CT: control target
= control target key end

     0   :  { %vm22_vm0 = vcmask 254976   ;;  %s275_s0 = inlined_call_operand.vmem [shape: f32[2,32], index: 0, kind: input, shape index: {}]   ;;  %s276_s1 = inlined_call_operand.vmem [shape: f32[1,32], index: 1, kind: input, shape index: {}]   ;;  %s277_s2 = inlined_call_operand.vmem [shape: f32[1,32], index: 2, kind: input, shape index: {}]   ;;  %s278_s3 = inlined_call_operand.vmem [shape: bf16[64,32], index: 3, kind: input, shape index: {}]   ;;  %s279_s4 = inlined_call_operand.hbm [shape: f32[2,64], index: 4, kind: output, shape index: {}]  }
   0x1   :  { %v19_v0 = vld [vmem:[%s275_s0] sm:$0x3] }
   0x2   :  { %v23_v1 = vsel %vm22_vm0, %v19_v0, 0.0 }
   0x3   :  { %24 = vadd.xlane.f32.xlu0 %v23_v1 }
   0x4   :  { %9 = vsyncpa [#allocation3], 0  ;;  %v179_v2 = vld [vmem:[%s278_s3] sm:$0xff]   ;;  %vm80_vm1 = vcmask 261120   ;;  %v209_v3 = vmov 0.0   ;;  %v180_v10 = vld [vmem:[%s278_s3 + $0x8] sm:$0xff]  }
   0x5   :  { %164 = vmatprep.subr.bf16.mxu0 %v209_v3  ;;  %v85_v4 = vsel %vm80_vm1, %v179_v2, 0  ;;  %v88_v11 = vsel %vm80_vm1, %v180_v10, 0  ;;  %v181_v12 = vld [vmem:[%s278_s3 + $0x10] sm:$0xff]   ;;  %v182_v14 = vld [vmem:[%s278_s3 + $0x18] sm:$0xff]   ;;  %vm210_vm2 = vmmov 0   ;;  %s211_s3 = smov [#allocation2]  }
   0x6   :  { %165 = vmatpush3.bf16.xpose.msra.mxu0 %v85_v4  ;;  %v91_v13 = vsel %vm80_vm1, %v181_v12, 0  ;;  %v94_v15 = vsel %vm80_vm1, %v182_v14, 0  ;;  %172 = vmatprep.mubr.msk.bf16.mxu0 %vm210_vm2, %v209_v3  ;;  %v152_v20 = vld [vmem:[%s276_s1] ss:$0 sm:$0xff]  ;;  %s144_s28 = sshll.u32 %s211_s3, 4  ;;  %vm136_vm3 = vcmask 517120   ;;  %s145_s28 = int_to_ptr.vmem [resolvable:$true] %s144_s28 }
   0x7   :  { %166 = vmatprep.subr.bf16.mxu0 %v209_v3  ;;  %v153_v22 = vld [vmem:[%s277_s2] ss:$0 sm:$0xff]  ;;  %s185_s29 = scalar_lea.vmem %s145_s28, 32  ;;  %p190_p1 = scmp.lt.s32.totalorder %s145_s28, %s145_s28 }
   0x8   :  { %p186_p0 = scmp.ne.s32.totalorder %s145_s28, %s185_s29  ;;  %p191_p2 = scmp.lt.s32.totalorder %s185_s29, %s185_s29 }
   0xa   :  { %p192_p3 = por %p191_p2, %p190_p1 }
   0xc   :  { %p193_p4 = pnand %p192_p3, %p186_p0 }
   0xe   :  { %167 = vmatpush3.bf16.xpose.msra.mxu0 %v88_v11 }
   0xf   :  { %168 = vmatprep.subr.bf16.mxu0 %v209_v3 }
  0x16   :  { %169 = vmatpush3.bf16.xpose.msra.mxu0 %v91_v13 }
  0x17   :  { %170 = vmatprep.subr.bf16.mxu0 %v209_v3 }
  0x1e   :  { %171 = vmatpush3.bf16.xpose.msra.mxu0 %v94_v15 }
  0x90   :  { %v25_v5 = vpop.xlane.xlu0 %24 }
  0x91   :  { %v27_v6 = vmul.f32 0.03125, %v25_v5 }
  0x93   :  { %v28_v7 = vsub.f32 %v19_v0, %v27_v6 }
  0x95   :  { %v29_v8 = vmul.f32 %v28_v7, %v28_v7 }
  0x97   :  { %v30_v9 = vsel %vm22_vm0, %v29_v8, 0.0 }
  0x98   :  { %31 = vadd.xlane.f32.xlu0 %v30_v9 }
 0x125   :  { %v32_v16 = vpop.xlane.xlu0 %31 }
 0x126   :  { %v33_v17 = vmul.f32 0.03125, %v32_v16 }
 0x128   :  { %v34_v18 = vadd.f32 1e-05, %v33_v17 }
 0x12a   :  { %183 = vrsqrt.f32 %v34_v18 }
 0x134   :  { %v184_v19 = vpop.eup %183 }
 0x135   :  { %v36_v21 = vmul.f32 %v184_v19, %v28_v7 }
 0x137   :  { %v43_v23 = vmul.f32 %v152_v20, %v36_v21 }
 0x139   :  { %v50_v24 = vadd.f32 %v153_v22, %v43_v23 }
 0x13b   :  { %v51_v25 = vpack.c.bf16 %v50_v24, %v50_v24 }
 0x13d   :  { %173 = vmatmul.mubr.msk.bf16.vlgmr.msra.gmra.mrb[0].mxu0 %vm80_vm1, %v51_v25 }
 0x210   :  { %v130_v26 = vpop.f32.mrb[0].mxu0 }
 0x211   :  { %137 = vst.msk [vmem:[#allocation2] sm:$0x3] %vm136_vm3, %v130_v26  ;;  %v174_v27 = vpop.f32.mrb[1].mxu0 }
 0x212   :  { %v133_v28 = vpop.f32.mrb[2].mxu0 }
 0x213   :  { %196 = shalt.err (!%p193_p4)
}
 0x214   :  { %s197_s30 = scalar_lea.hbm %s279_s4, 32 }
 0x215   :  { %p198_p5 = scmp.ne.s32.totalorder %s279_s4, %s197_s30  ;;  %p201_p6 = scmp.lt.u32.totalorder %s197_s30, %s279_s4 }
 0x217   :  { %p203_p7 = pnand %p201_p6, %p198_p5 }
 0x219   :  { %206 = shalt.err (!%p203_p7)
}
 0x21a   :  { %147 = dma.vmem_to_hbm [thread:$0]  %s145_s28, 32, %s279_s4, [#allocation3]   ;;  %v175_v29 = vpop.f32.mrb[3].mxu0 }
 0x21b   :  { %207 = dma.done.wait [#allocation3], 32  }
 0x21c   :  { %208 = vsyncadd [#allocation3], 4294967264 }
 0x21d   :  { %151 = vsyncpa [#allocation3], 1 }

// kernel: _lambda_.5
= control target key start
LH: loop header
LB: loop body
LE: loop exit
PB: predicated region body
PF: predicated region fallthrough
CT: control target
= control target key end

     0   :  { %s2558_s25 = smov 0   ;;  %s2926_s0 = inlined_call_operand.vmem [shape: f32[10,32], index: 0, kind: input, shape index: {}]   ;;  %s2927_s1 = inlined_call_operand.vmem [shape: f32[2,1,32], index: 1, kind: input, shape index: {}]   ;;  %s2928_s2 = inlined_call_operand.vmem [shape: f32[2,1,32], index: 2, kind: input, shape index: {}]   ;;  %s2929_s3 = inlined_call_operand.vmem [shape: bf16[2,32,96], index: 3, kind: input, shape index: {}]   ;;  %s2930_s4 = inlined_call_operand.vmem [shape: f32[2,1,96], index: 4, kind: input, shape index: {}]   ;;  %s2931_s5 = inlined_call_operand.vmem [shape: bf16[2,32,32], index: 5, kind: input, shape index: {}]   ;;  %s2932_s6 = inlined_call_operand.vmem [shape: f32[2,1,32], index: 6, kind: input, shape index: {}]   ;;  %s2933_s7 = inlined_call_operand.vmem [shape: f32[2,1,32], index: 7, kind: input, shape index: {}]   ;;  %s2934_s8 = inlined_call_operand.vmem [shape: f32[2,1,32], index: 8, kind: input, shape index: {}]   ;;  %s2935_s9 = inlined_call_operand.vmem [shape: bf16[2,32,128], index: 9, kind: input, shape index: {}]   ;;  %s2936_s10 = inlined_call_operand.vmem [shape: f32[2,1,128], index: 10, kind: input, shape index: {}]   ;;  %s2937_s11 = inlined_call_operand.vmem [shape: bf16[2,128,32], index: 11, kind: input, shape index: {}]   ;;  %s2938_s12 = inlined_call_operand.vmem [shape: f32[2,1,32], index: 12, kind: input, shape index: {}]   ;;  %s2939_s13 = inlined_call_operand.vmem [shape: f32[10,32], index: 13, kind: output, shape index: {}]  }
   0x1   :  { %2943 = sst [smem:[#allocation6_spill]] %s2929_s3 }
   0x2   :  { %2944 = sst [smem:[#allocation7_spill]] %s2931_s5 }
   0x3   :  { %2945 = sst [smem:[#allocation8_spill]] %s2939_s13 }
   0x4 LB: > { %2946 = sst [smem:[#allocation4_spill]] %s2469_s25  ;;  %s2564_s26 = sadd.s32 4294967295, %s2469_s25   ;;  %s2469_s25 = sphi %s2558_s25, %s23_s25  }
   0x5   : > { %p2132_p0 = scmp.ge.s32.totalorder %s2469_s25, 1  ;;  %p476_p1 = scmp.lt.s32.totalorder %s2469_s25, 3 }
   0x7   : > { %p477_p2 = pnand %p2132_p0, %p476_p1 }
   0x9   : > { %480 = sbr.rel (%p477_p2) target bundleno = 2643 (0xa53), region = 72 }
  0x10   : > { %p554_p3 = scmp.lt.s32.totalorder %s2564_s26, 1  ;;  %s2947_s3 = sld [smem:[#allocation6_spill]] }
  0x11   : > { %s2948_s5 = sld [smem:[#allocation7_spill]]  ;;  %p2141_p4 = scmp.ne.s32.totalorder %s2564_s26, 0 }
  0x12   : > { %s2570_s27 = scalar_select %p554_p3, %s2564_s26, 1 }
  0x13   : > { %602 = sbr.rel (%p2141_p4) target bundleno = 26 (0x1a), region = 76  ;;  %v603_v0 = vld [vmem:[%s2926_s0] sm:$0xff] (!%p2141_p4)  ;;  %vm605_vm0 = vcmask (!%p2141_p4), 261120   ;;  %v604_v1 = vld [vmem:[%s2926_s0 + $0x8] sm:$0x3] (!%p2141_p4)  ;;  %vm607_vm1 = vcmask (!%p2141_p4), 254976  }
  0x14   : > { %s2186_s17 = sshll.u32 %s2570_s27, 4  ;;  %s578_s13 = scalar_lea.vmem %s2933_s7, %s2570_s27  ;;  %606 = vst.msk [vmem:[#allocation2] sm:$0xff] (!%p2141_p4), %vm605_vm0, %v603_v0 }
  0x15   : > { %s581_s20 = scalar_lea.vmem %s2934_s8, %s2570_s27  ;;  %s597_s18 = scalar_lea.vmem %s2938_s12, %s2570_s27  ;;  %608 = vst.msk [vmem:[#allocation2 + $0x8] sm:$0x3] (!%p2141_p4), %vm607_vm1, %v604_v1 }
  0x16   : > { %s2588_s23 = scalar_lea.vmem %s2947_s3, %s2186_s17  ;;  %s2610_s3 = scalar_lea.vmem %s2935_s9, %s2186_s17 }
  0x17   : > { %s2593_s29 = scalar_lea.vmem %s2948_s5, %s2186_s17  ;;  %s589_s5 = scalar_lea.vmem %s2936_s10, %s2570_s27 }
  0x18   : > { %2949 = sst [smem:[#allocation5_spill]] %s2593_s29  ;;  %s2189_s29 = sshll.u32 %s2570_s27, 6 }
  0x19   : > { %s2620_s14 = scalar_lea.vmem %s2937_s11, %s2189_s29 }
  0x1a PF: > { %vm613_vm2 = vcmask 261120   ;;  %vm617_vm3 = vcmask 254976   ;;  %v2405_v16 = vld [vmem:[%s2588_s23] sm:$0xff]   ;;  %v2471_v17 = vmov 0.0   ;;  %v2406_v18 = vld [vmem:[%s2588_s23 + $0x8] sm:$0xff]   ;;  %vm2472_vm4 = vmmov 0   ;;  %s2950_s24 = scalar_lea.vmem %s2927_s1, %s2570_s27  ;;  %s2951_s30 = scalar_lea.vmem %s2928_s2, %s2570_s27 }
  0x1b   : > { %v2633_v2 = vld [vmem:[#allocation2] sm:$0xff]  ;;  %2240 = vmatprep.subr.bf16.mxu0 %v2471_v17  ;;  %2260 = vmatprep.subr.bf16.mxu1 %v2471_v17  ;;  %s2952_s19 = scalar_lea.vmem %s2930_s4, %s2570_s27  ;;  %s2473_s17 = smov 96   ;;  %vm730_vm5 = vcmask 64512   ;;  %vm778_vm6 = vcmask 36864   ;;  %vm797_vm7 = vcmask 1041408   ;;  %vm798_vm8 = vcmask 1042432  }
  0x1c   : > { %v2635_v3 = vld [vmem:[#allocation2 + $0x8] sm:$0x3]  ;;  %v614_v4 = vsel %vm613_vm2, %v2633_v2, 0.0  ;;  %2241 = vmatpush3.bf16.msra.mxu0 %v2405_v16  ;;  %2244 = vmatprep.mubr.msk.bf16.mxu0 %vm2472_vm4, %v2471_v17  ;;  %v2142_v27 = vld [vmem:[%s2950_s24] ss:$0 sm:$0xff]  ;;  %s2474_s21 = smov 88  }
  0x1d   : > { %v618_v5 = vsel %vm617_vm3, %v2635_v3, 0.0  ;;  %615 = vadd.xlane.f32.xlu0 %v614_v4  ;;  %2242 = vmatprep.subr.bf16.mxu0 %v2471_v17  ;;  %v2143_v31 = vld [vmem:[%s2951_s30] ss:$0 sm:$0xff]  ;;  %s2475_s22 = smov 80   ;;  %s2476_s23 = smov 120   ;;  %vm793_vm9 = vcmask 39936  }
  0x1e   : > { %2262 = vmatprep.mubr.msk.bf16.mxu1 %vm2472_vm4, %v2471_v17  ;;  %v2144_v36 = vld [vmem:[%s2952_s19] ss:$0 sm:$0xff]  ;;  %s2477_s29 = smov 72   ;;  %s2478_s24 = smov 112   ;;  %vm844_vm10 = vcmask 61440   ;;  %vm1080_vm11 = vcmask 127040  }
  0x1f   : > { %s2479_s28 = smov 104   ;;  %s2480_s25 = smov 64   ;;  %vm1313_vm12 = vcmask 192640   ;;  %vm1546_vm13 = vcmask 258240  }
  0x20   : > { %2243 = vmatpush3.bf16.msra.mxu0 %v2406_v18  ;;  %s2481_s30 = smov 56   ;;  %s2483_s16 = smov 48  }
  0x21   : > { %619 = vadd.xlane.f32.xlu0 %v618_v5  ;;  %2248 = vmatprep.subr.bf16.mxu0 %v2471_v17  ;;  %s2484_s15 = smov 40   ;;  %s2485_s19 = smov 8  }
  0x22   : > { %p2183_p5 = scmp.ne.s32.totalorder %s2564_s26, 1 }
  0xaa   : > { %v616_v6 = vpop.xlane.xlu0 %615 }
  0xab   : > { %v622_v7 = vmul.f32 0.03125, %v616_v6 }
  0xad   : > { %v624_v8 = vsub.f32 %v2633_v2, %v622_v7 }
  0xae   : > { %v620_v9 = vpop.xlane.xlu0 %619 }
  0xaf   : > { %v623_v10 = vmul.f32 0.03125, %v620_v9  ;;  %v626_v11 = vmul.f32 %v624_v8, %v624_v8 }
  0xb1   : > { %v625_v12 = vsub.f32 %v2635_v3, %v623_v10  ;;  %v628_v13 = vsel %vm613_vm2, %v626_v11, 0.0 }
  0xb2   : > { %629 = vadd.xlane.f32.xlu1 %v628_v13 }
  0xb3   : > { %v627_v14 = vmul.f32 %v625_v12, %v625_v12 }
  0xb5   : > { %v631_v15 = vsel %vm617_vm3, %v627_v14, 0.0 }
  0xb6   : > { %632 = vadd.xlane.f32.xlu1 %v631_v15 }
 0x13f   : > { %v630_v19 = vpop.xlane.xlu1 %629 }
 0x140   : > { %v634_v20 = vmul.f32 0.03125, %v630_v19 }
 0x142   : > { %v636_v21 = vadd.f32 1e-05, %v634_v20 }
 0x143   : > { %v633_v22 = vpop.xlane.xlu1 %632 }
 0x144   : > { %2419 = vrsqrt.f32 %v636_v21  ;;  %v635_v23 = vmul.f32 0.03125, %v633_v22 }
 0x146   : > { %v637_v24 = vadd.f32 1e-05, %v635_v23 }
 0x148   : > { %2421 = vrsqrt.f32 %v637_v24 }
 0x14e   : > { %v2420_v25 = vpop.eup %2419 }
 0x14f   : > { %v640_v26 = vmul.f32 %v2420_v25, %v624_v8 }
 0x151   : > { %v648_v30 = vmul.f32 %v2142_v27, %v640_v26 }
 0x152   : > { %v2422_v28 = vpop.eup %2421 }
 0x153   : > { %v641_v29 = vmul.f32 %v2422_v28, %v625_v12  ;;  %v656_v33 = vadd.f32 %v2143_v31, %v648_v30 }
 0x155   : > { %v649_v32 = vmul.f32 %v2142_v27, %v641_v29 }
 0x157   : > { %v657_v34 = vadd.f32 %v2143_v31, %v649_v32 }
 0x159   : > { %v662_v35 = vpack.c.bf16 %v657_v34, %v656_v33 }
 0x15b   : > { %2245 = vmatmul.mubr.msk.bf16.vlgmr.msra.gmra.mrb[0].mxu0 %vm613_vm2, %v662_v35 }
 0x15c   : > { %2250 = vmatprep.mubr.msk.bf16.mxu0 %vm2472_vm4, %v2471_v17 }
 0x22e   : > { %v719_v37 = vpop.f32.mrb[0].mxu0 }
 0x22f   : > { %v720_v38 = vadd.f32 %v2144_v36, %v719_v37  ;;  %v2246_v39 = vpop.f32.mrb[1].mxu0 }
 0x230   : > { %v722_v40 = vpop.f32.mrb[2].mxu0 }
 0x231   : > { %v2673_v41 = vpack.c.bf16 %v720_v38, %v720_v38  ;;  %v723_v42 = vadd.f32 %v2144_v36, %v722_v40  ;;  %v2247_v43 = vpop.f32.mrb[3].mxu0 }
 0x233   : > { %v846_v44 = vpack.c.bf16 %v723_v42, %v720_v38  ;;  %728 = vrot.lane.b32.xlu0 %v2673_v41, %s2473_s17 }
 0x235   : > { %v848_v45 = vshrl.u32 %v846_v44, 16  ;;  %v851_v46 = vshll.u32 %v846_v44, 16 }
 0x237   : > { %v850_v47 = vrot.slane %v848_v45, 2  ;;  %v853_v48 = vrot.slane %v851_v46, 3 }
 0x239   : > { %v2676_v49 = vor.u32 %v853_v48, %v850_v47 }
 0x23b   : > { %1084 = vrot.lane.b32.xlu0 %v2676_v49, %s2474_s21  ;;  %855 = vrot.lane.b32.xlu1 %v2676_v49, %s2473_s17  ;;  %s2953_s17 = sld [smem:[#allocation5_spill]] }
 0x23f   : > { %1200 = vrot.lane.b32.xlu0 %v2673_v41, %s2475_s22  ;;  %967 = vrot.lane.b32.xlu1 %v2673_v41, %s2474_s21  ;;  %s2486_s21 = smov 16  }
 0x243   : > { %1317 = vrot.lane.b32.xlu0 %v2676_v49, %s2475_s22  ;;  %965 = vrot.lane.b32.xlu1 %v2673_v41, %s2476_s23  ;;  %s2487_s22 = smov 24  }
 0x247   : > { %1433 = vrot.lane.b32.xlu0 %v2673_v41, %s2477_s29  ;;  %1082 = vrot.lane.b32.xlu1 %v2676_v49, %s2476_s23 }
 0x24b   : > { %1550 = vrot.lane.b32.xlu0 %v2676_v49, %s2477_s29  ;;  %1198 = vrot.lane.b32.xlu1 %v2673_v41, %s2478_s24 }
 0x24f   : > { %1315 = vrot.lane.b32.xlu1 %v2676_v49, %s2478_s24  ;;  %s2954_s24 = scalar_lea.vmem %s2932_s6, %s2570_s27 }
 0x253   : > { %1431 = vrot.lane.b32.xlu1 %v2673_v41, %s2479_s28 }
 0x257   : > { %1548 = vrot.lane.b32.xlu1 %v2676_v49, %s2479_s28 }
 0x2a5   : > { %v729_v50 = vpop.permute.xlu0 %728 }
 0x2a6   : > { %v735_v51 = vsel %vm730_vm5, %v729_v50, 0 }
 0x2a7   : > { %2249 = vmatpush3.bf16.xpose.msra.mxu0 %v735_v51 }
 0x2a8   : > { %2254 = vmatprep.subr.bf16.mxu0 %v2471_v17 }
 0x2ad   : > { %v856_v52 = vpop.permute.xlu1 %855  ;;  %v1085_v56 = vpop.permute.xlu0 %1084 }
 0x2ae   : > { %2251 = vmatmul.mubr.msk.bf16.vlgmr.msra.gmra.mrb[4].mxu0 %vm730_vm5, %v2673_v41  ;;  %v861_v53 = vsel %vm730_vm5, %v856_v52, 0  ;;  %v1090_v58 = vsel %vm730_vm5, %v1085_v56, 0 }
 0x2af   : > { %2261 = vmatpush3.bf16.xpose.msra.mxu1 %v861_v53  ;;  %2256 = vmatprep.mubr.msk.bf16.mxu0 %vm2472_vm4, %v2471_v17 }
 0x2b0   : > { %2272 = vmatprep.subr.bf16.mxu1 %v2471_v17 }
 0x2b1   : > { %v968_v54 = vpop.permute.xlu1 %967  ;;  %v1201_v59 = vpop.permute.xlu0 %1200 }
 0x2b2   : > { %v973_v55 = vsel %vm730_vm5, %v968_v54, 0  ;;  %v1206_v61 = vsel %vm730_vm5, %v1201_v59, 0 }
 0x2b5   : > { %v966_v57 = vpop.permute.xlu1 %965  ;;  %v1318_v62 = vpop.permute.xlu0 %1317 }
 0x2b6   : > { %2263 = vmatmul.mubr.msk.bf16.vlgmr.msra.gmra.mrb[0].mxu1 %vm730_vm5, %v2676_v49  ;;  %v1323_v0 = vsel %vm730_vm5, %v1318_v62, 0 }
 0x2b7   : > { %2273 = vmatpush3.bf16.xpose.msra.mxu1 %v973_v55  ;;  %2274 = vmatprep.mubr.msk.bf16.mxu1 %vm2472_vm4, %v2471_v17 }
 0x2b8   : > { %2284 = vmatprep.subr.bf16.mxu1 %v2471_v17 }
 0x2b9   : > { %v1083_v60 = vpop.permute.xlu1 %1082  ;;  %v1434_v1 = vpop.permute.xlu0 %1433 }
 0x2ba   : > { %v1439_v5 = vsel %vm730_vm5, %v1434_v1, 0 }
 0x2bd   : > { %v1199_v63 = vpop.permute.xlu1 %1198  ;;  %v1551_v6 = vpop.permute.xlu0 %1550 }
 0x2be   : > { %2275 = vmatmul.mubr.msk.bf16.vlgmr.msra.gmra.mrb[4].mxu1 %vm730_vm5, %v966_v57  ;;  %v1556_v8 = vsel %vm730_vm5, %v1551_v6, 0 }
 0x2bf   : > { %2285 = vmatpush3.bf16.xpose.msra.mxu1 %v1090_v58  ;;  %2286 = vmatprep.mubr.msk.bf16.mxu1 %vm2472_vm4, %v2471_v17 }
 0x2c0   : > { %2296 = vmatprep.subr.bf16.mxu1 %v2471_v17 }
 0x2c1   : > { %v1316_v4 = vpop.permute.xlu1 %1315 }
 0x2c5   : > { %v1432_v7 = vpop.permute.xlu1 %1431 }
 0x2c6   : > { %2287 = vmatmul.mubr.msk.bf16.vlgmr.msra.gmra.mrb[8].mxu1 %vm730_vm5, %v1083_v60 }
 0x2c7   : > { %2297 = vmatpush3.bf16.xpose.msra.mxu1 %v1206_v61  ;;  %2298 = vmatprep.mubr.msk.bf16.mxu1 %vm2472_vm4, %v2471_v17 }
 0x2c8   : > { %2308 = vmatprep.subr.bf16.mxu1 %v2471_v17 }
 0x2c9   : > { %v1549_v9 = vpop.permute.xlu1 %1548 }
 0x2ce   : > { %2299 = vmatmul.mubr.msk.bf16.vlgmr.msra.gmra.mrb[12].mxu1 %vm730_vm5, %v1199_v63 }
 0x2cf   : > { %2309 = vmatpush3.bf16.xpose.msra.mxu1 %v1323_v0  ;;  %2310 = vmatprep.mubr.msk.bf16.mxu1 %vm2472_vm4, %v2471_v17 }
 0x2d0   : > { %2320 = vmatprep.subr.bf16.mxu1 %v2471_v17 }
 0x2d6   : > { %2311 = vmatmul.mubr.msk.bf16.vlgmr.msra.gmra.mrb[16].mxu1 %vm730_vm5, %v1316_v4 }
 0x2d7   : > { %2321 = vmatpush3.bf16.xpose.msra.mxu1 %v1439_v5  ;;  %2322 = vmatprep.mubr.msk.bf16.mxu1 %vm2472_vm4, %v2471_v17 }
 0x2d8   : > { %2332 = vmatprep.subr.bf16.mxu1 %v2471_v17 }
 0x2de   : > { %2323 = vmatmul.mubr.msk.bf16.vlgmr.msra.gmra.mrb[20].mxu1 %vm730_vm5, %v1432_v7 }
 0x2df   : > { %2333 = vmatpush3.bf16.xpose.msra.mxu1 %v1556_v8  ;;  %2334 = vmatprep.mubr.msk.bf16.mxu1 %vm2472_vm4, %v2471_v17 }
 0x2e0   : > { %2344 = vmatprep.subr.bf16.mxu1 %v2471_v17 }
 0x2e6   : > { %2335 = vmatmul.mubr.msk.bf16.vlgmr.msra.gmra.mrb[24].mxu1 %vm730_vm5, %v1549_v9 }
 0x2e7   : > { %2348 = vmatprep.mubr.msk.bf16.mxu1 %vm2472_vm4, %v2471_v17 }
 0x381   : > { %v771_v10 = vpop.f32.mrb[4].mxu0 }
 0x382   : > { %v777_v11 = vmul.f32 0.35355338, %v771_v10  ;;  %v2252_v12 = vpop.f32.mrb[5].mxu0 }
 0x383   : > { %v774_v13 = vpop.f32.mrb[6].mxu0 }
 0x384   : > { %v2253_v14 = vpop.f32.mrb[7].mxu0  ;;  %v779_v15 = vsel %vm778_vm6, %v777_v11, -inf }
 0x385   : > { %780 = vmax.xlane.f32.xlu0 %v779_v15 }
 0x389   : > { %v897_v16 = vpop.f32.mrb[0].mxu1 }
 0x38a   : > { %v903_v18 = vmul.f32 0.35355338, %v897_v16  ;;  %v2264_v19 = vpop.f32.mrb[1].mxu1 }
 0x38b   : > { %v900_v20 = vpop.f32.mrb[2].mxu1 }
 0x38c   : > { %v2265_v21 = vpop.f32.mrb[3].mxu1  ;;  %v904_v22 = vsel %vm778_vm6, %v903_v18, -inf }
 0x38d   : > { %905 = vmax.xlane.f32.xlu1 %v904_v22 }
 0x391   : > { %v1009_v23 = vpop.f32.mrb[4].mxu1 }
 0x392   : > { %v1015_v24 = vmul.f32 0.35355338, %v1009_v23  ;;  %v2276_v25 = vpop.f32.mrb[5].mxu1 }
 0x393   : > { %v1012_v26 = vpop.f32.mrb[6].mxu1 }
 0x394   : > { %v2277_v27 = vpop.f32.mrb[7].mxu1  ;;  %v1016_v28 = vsel %vm778_vm6, %v1015_v24, -inf }
 0x395   : > { %1017 = vmax.xlane.f32.xlu0 %v1016_v28  ;;  %v2482_v27 = vmov 65535  }
 0x396   : > { %v799_v28 = vsel %vm797_vm7, 4294967295, %v2482_v27 }
 0x399   : > { %v1126_v29 = vpop.f32.mrb[8].mxu1 }
 0x39a   : > { %v1132_v30 = vmul.f32 0.35355338, %v1126_v29  ;;  %v2288_v31 = vpop.f32.mrb[9].mxu1  ;;  %v2774_v29 = vsel %vm798_vm8, %v799_v28, 0 }
 0x39b   : > { %v1129_v32 = vpop.f32.mrb[10].mxu1 }
 0x39c   : > { %v2289_v33 = vpop.f32.mrb[11].mxu1  ;;  %v1133_v34 = vsel %vm778_vm6, %v1132_v30, -inf }
 0x39d   : > { %1134 = vmax.xlane.f32.xlu0 %v1133_v34 }
 0x3a1   : > { %v1242_v35 = vpop.f32.mrb[12].mxu1 }
 0x3a2   : > { %v1248_v36 = vmul.f32 0.35355338, %v1242_v35  ;;  %v2300_v37 = vpop.f32.mrb[13].mxu1 }
 0x3a3   : > { %v1245_v38 = vpop.f32.mrb[14].mxu1 }
 0x3a4   : > { %v2301_v39 = vpop.f32.mrb[15].mxu1  ;;  %v1249_v40 = vsel %vm778_vm6, %v1248_v36, -inf }
 0x3a5   : > { %1250 = vmax.xlane.f32.xlu0 %v1249_v40 }
 0x3a9   : > { %v1359_v42 = vpop.f32.mrb[16].mxu1 }
 0x3aa   : > { %v2738_v43 = vmul.f32 0.35355338, %v1359_v42  ;;  %v2312_v44 = vpop.f32.mrb[17].mxu1 }
 0x3ab   : > { %v1362_v45 = vpop.f32.mrb[18].mxu1 }
 0x3ac   : > { %v2313_v46 = vpop.f32.mrb[19].mxu1  ;;  %v1366_v47 = vsel %vm778_vm6, %v2738_v43, -inf }
 0x3ad   : > { %1367 = vmax.xlane.f32.xlu1 %v1366_v47 }
 0x3b1   : > { %v1475_v48 = vpop.f32.mrb[20].mxu1 }
 0x3b2   : > { %v2742_v50 = vmul.f32 0.35355338, %v1475_v48  ;;  %v2324_v51 = vpop.f32.mrb[21].mxu1 }
 0x3b3   : > { %v1478_v52 = vpop.f32.mrb[22].mxu1 }
 0x3b4   : > { %v2325_v53 = vpop.f32.mrb[23].mxu1  ;;  %v1482_v54 = vsel %vm778_vm6, %v2742_v50, -inf }
 0x3b5   : > { %1483 = vmax.xlane.f32.xlu0 %v1482_v54 }
 0x3b9   : > { %v1592_v55 = vpop.f32.mrb[24].mxu1 }
 0x3ba   : > { %v2746_v56 = vmul.f32 0.35355338, %v1592_v55  ;;  %v2336_v57 = vpop.f32.mrb[25].mxu1 }
 0x3bb   : > { %v1595_v58 = vpop.f32.mrb[26].mxu1 }
 0x3bc   : > { %v2337_v59 = vpop.f32.mrb[27].mxu1  ;;  %v1599_v60 = vsel %vm778_vm6, %v2746_v56, -inf }
 0x3bd   : > { %1600 = vmax.xlane.f32.xlu1 %v1599_v60 }
 0x3cb   : > { %916 = vrot.lane.b32.xlu0 %v2676_v49, %s2480_s25 }
 0x3ce   : > { %791 = vrot.lane.b32.xlu1 %v2673_v41, %s2480_s25 }
 0x3cf   : > { %1028 = vrot.lane.b32.xlu0 %v2673_v41, %s2481_s30 }
 0x412   : > { %v781_v61 = vpop.xlane.xlu0 %780 }
 0x413   : > { %v782_v62 = vsub.f32 %v777_v11, %v781_v61 }
 0x415   : > { %v783_v63 = vmul.f32 1.442695, %v782_v62 }
 0x417   : > { %2423 = vpow2.f32 %v783_v63 }
 0x41a   : > { %v906_v0 = vpop.xlane.xlu1 %905 }
 0x41b   : > { %v907_v1 = vsub.f32 %v903_v18, %v906_v0 }
 0x41d   : > { %v908_v4 = vmul.f32 1.442695, %v907_v1 }
 0x41f   : > { %2425 = vpow2.f32 %v908_v4 }
 0x421   : > { %v2754_v5 = vpop.eup %2423 }
 0x422   : > { %v1018_v6 = vpop.xlane.xlu0 %1017  ;;  %v785_v7 = vsel %vm778_vm6, %v2754_v5, 0.0 }
 0x423   : > { %v1019_v8 = vsub.f32 %v1015_v24, %v1018_v6  ;;  %786 = vadd.xlane.f32.xlu0 %v785_v7 }
 0x425   : > { %v1020_v9 = vmul.f32 1.442695, %v1019_v8 }
 0x427   : > { %2427 = vpow2.f32 %v1020_v9 }
 0x429   : > { %v2758_v10 = vpop.eup %2425 }
 0x42a   : > { %v1135_v12 = vpop.xlane.xlu0 %1134  ;;  %v910_v11 = vsel %vm778_vm6, %v2758_v10, 0.0 }
 0x42b   : > { %v1136_v13 = vsub.f32 %v1132_v30, %v1135_v12  ;;  %911 = vadd.xlane.f32.xlu1 %v910_v11 }
 0x42d   : > { %v1137_v14 = vmul.f32 1.442695, %v1136_v13 }
 0x42f   : > { %2429 = vpow2.f32 %v1137_v14 }
 0x431   : > { %v2762_v15 = vpop.eup %2427 }
 0x432   : > { %v1251_v16 = vpop.xlane.xlu0 %1250  ;;  %v1022_v18 = vsel %vm778_vm6, %v2762_v15, 0.0 }
 0x433   : > { %v1252_v19 = vsub.f32 %v1248_v36, %v1251_v16  ;;  %1023 = vadd.xlane.f32.xlu0 %v1022_v18 }
 0x435   : > { %v1253_v20 = vmul.f32 1.442695, %v1252_v19 }
 0x437   : > { %2431 = vpow2.f32 %v1253_v20 }
 0x439   : > { %v2766_v21 = vpop.eup %2429 }
 0x43a   : > { %v1139_v22 = vsel %vm778_vm6, %v2766_v21, 0.0  ;;  %v1368_v25 = vpop.xlane.xlu1 %1367 }
 0x43b   : > { %1140 = vadd.xlane.f32.xlu0 %v1139_v22  ;;  %v1369_v32 = vsub.f32 %v2738_v43, %v1368_v25 }
 0x43d   : > { %v1370_v34 = vmul.f32 1.442695, %v1369_v32 }
 0x43f   : > { %2433 = vpow2.f32 %v1370_v34 }
 0x441   : > { %v2770_v23 = vpop.eup %2431 }
 0x442   : > { %v1255_v24 = vsel %vm778_vm6, %v2770_v23, 0.0  ;;  %v1484_v33 = vpop.xlane.xlu0 %1483 }
 0x443   : > { %1256 = vadd.xlane.f32.xlu1 %v1255_v24  ;;  %v1485_v35 = vsub.f32 %v2742_v50, %v1484_v33 }
 0x445   : > { %v1486_v36 = vmul.f32 1.442695, %v1485_v35 }
 0x446   : > { %v917_v46 = vpop.permute.xlu0 %916 }
 0x447   : > { %2435 = vpow2.f32 %v1486_v36  ;;  %v922_v54 = vand.u32 %v917_v46, %v2774_v29 }
 0x449   : > { %v2784_v39 = vpop.eup %2433 }
 0x44a   : > { %v1601_v26 = vpop.xlane.xlu1 %1600  ;;  %v1372_v40 = vsel %vm778_vm6, %v2784_v39, 0.0  ;;  %v1029_v47 = vpop.permute.xlu0 %1028 }
 0x44b   : > { %v1602_v37 = vsub.f32 %v2746_v56, %v1601_v26  ;;  %v1034_v57 = vand.u32 %v1029_v47, %v2774_v29 }
 0x44d   : > { %v1603_v38 = vmul.f32 1.442695, %v1602_v37 }
 0x44e   : > { %v792_v30 = vpop.permute.xlu1 %791 }
 0x44f   : > { %v802_v31 = vand.u32 %v2774_v29, %v792_v30  ;;  %2437 = vpow2.f32 %v1603_v38 }
 0x451   : > { %2255 = vmatpush3.bf16.msra.mxu0 %v802_v31  ;;  %1261 = vrot.lane.b32.xlu0 %v2673_v41, %s2483_s16  ;;  %v2788_v42 = vpop.eup %2435 }
 0x452   : > { %2266 = vmatprep.subr.bf16.mxu0 %v2471_v17  ;;  %v1488_v43 = vsel %vm778_vm6, %v2788_v42, 0.0 }
 0x454   : > { %1145 = vrot.lane.b32.xlu1 %v2676_v49, %s2481_s30 }
 0x459   : > { %v2792_v44 = vpop.eup %2437 }
 0x45a   : > { %v1605_v45 = vsel %vm778_vm6, %v2792_v44, 0.0 }
 0x470   : > { %1373 = vadd.xlane.f32.xlu0 %v1372_v40 }
 0x474   : > { %1489 = vadd.xlane.f32.xlu0 %v1488_v43 }
 0x478   : > { %1606 = vadd.xlane.f32.xlu1 %v1605_v45 }
 0x48a   : > { %1378 = vrot.lane.b32.xlu0 %v2676_v49, %s2483_s16 }
 0x48e   : > { %1494 = vrot.lane.b32.xlu0 %v2673_v41, %s2484_s15 }
 0x492   : > { %1611 = vrot.lane.b32.xlu0 %v2676_v49, %s2484_s15 }
 0x4b0   : > { %v787_v48 = vpop.xlane.xlu0 %786 }
 0x4b1   : > { %2439 = vrcp.f32 %v787_v48 }
 0x4b8   : > { %v912_v50 = vpop.xlane.xlu1 %911 }
 0x4b9   : > { %2441 = vrcp.f32 %v912_v50 }
 0x4bb   : > { %v2440_v51 = vpop.eup %2439 }
 0x4bc   : > { %v789_v52 = vmul.f32 %v2440_v51, %v2754_v5 }
 0x4be   : > { %v790_v53 = vpack.c.bf16 %v789_v52, %v789_v52 }
 0x4c0   : > { %2257 = vmatmul.mubr.msk.bf16.vlgmr.msra.gmra.mrb[8].mxu0 %vm793_vm9, %v790_v53  ;;  %v1024_v55 = vpop.xlane.xlu0 %1023 }
 0x4c1   : > { %2267 = vmatpush3.bf16.msra.mxu0 %v922_v54  ;;  %2443 = vrcp.f32 %v1024_v55  ;;  %2268 = vmatprep.mubr.msk.bf16.mxu0 %vm2472_vm4, %v2471_v17 }
 0x4c2   : > { %2278 = vmatprep.subr.bf16.mxu0 %v2471_v17 }
 0x4c3   : > { %v2442_v41 = vpop.eup %2441 }
 0x4c4   : > { %v914_v49 = vmul.f32 %v2442_v41, %v2758_v10  ;;  %v2407_v41 = vld [vmem:[%s2953_s17] sm:$0xff]  }
 0x4c5   : > { %2345 = vmatpush3.bf16.msra.mxu1 %v2407_v41  ;;  %v2415_v41 = vld [vmem:[%s2620_s14 + $0x20] sm:$0xff]  }
 0x4c6   : > { %v915_v56 = vpack.c.bf16 %v914_v49, %v914_v49  ;;  %v2408_v49 = vld [vmem:[%s2953_s17 + $0x8] sm:$0xff]   ;;  %2346 = vmatprep.subr.bf16.mxu1 %v2471_v17 }
 0x4c8   : > { %2269 = vmatmul.mubr.msk.bf16.vlgmr.msra.gmra.mrb[12].mxu0 %vm793_vm9, %v915_v56  ;;  %v1141_v58 = vpop.xlane.xlu0 %1140 }
 0x4c9   : > { %2279 = vmatpush3.bf16.msra.mxu0 %v1034_v57  ;;  %2445 = vrcp.f32 %v1141_v58  ;;  %2280 = vmatprep.mubr.msk.bf16.mxu0 %vm2472_vm4, %v2471_v17 }
 0x4ca   : > { %2290 = vmatprep.subr.bf16.mxu0 %v2471_v17  ;;  %2347 = vmatpush3.bf16.msra.mxu1 %v2408_v49  ;;  %v2416_v49 = vld [vmem:[%s2620_s14 + $0x28] sm:$0xff]  }
 0x4cb   : > { %v2444_v59 = vpop.eup %2443  ;;  %2360 = vmatprep.subr.bf16.mxu1 %v2471_v17 }
 0x4cc   : > { %v1026_v60 = vmul.f32 %v2444_v59, %v2762_v15  ;;  %v1262_v5 = vpop.permute.xlu0 %1261 }
 0x4cd   : > { %v1267_v7 = vand.u32 %v1262_v5, %v2774_v29 }
 0x4ce   : > { %v1027_v61 = vpack.c.bf16 %v1026_v60, %v1026_v60 }
 0x4d0   : > { %v1257_v62 = vpop.xlane.xlu1 %1256  ;;  %2281 = vmatmul.mubr.msk.bf16.vlgmr.msra.gmra.mrb[16].mxu0 %vm793_vm9, %v1027_v61 }
 0x4d1   : > { %2447 = vrcp.f32 %v1257_v62  ;;  %2292 = vmatprep.mubr.msk.bf16.mxu0 %vm2472_vm4, %v2471_v17 }
 0x4d3   : > { %v2446_v63 = vpop.eup %2445 }
 0x4d4   : > { %v1143_v0 = vmul.f32 %v2446_v63, %v2766_v21  ;;  %v1146_v1 = vpop.permute.xlu1 %1145 }
 0x4d5   : > { %v1151_v4 = vand.u32 %v1146_v1, %v2774_v29 }
 0x4d6   : > { %v1144_v6 = vpack.c.bf16 %v1143_v0, %v1143_v0 }
 0x4d7   : > { %2291 = vmatpush3.bf16.msra.mxu0 %v1151_v4 }
 0x4d8   : > { %2302 = vmatprep.subr.bf16.mxu0 %v2471_v17 }
 0x4da   : > { %2293 = vmatmul.mubr.msk.bf16.vlgmr.msra.gmra.mrb[20].mxu0 %vm793_vm9, %v1144_v6 }
 0x4db   : > { %v2448_v8 = vpop.eup %2447  ;;  %2303 = vmatpush3.bf16.msra.mxu0 %v1267_v7  ;;  %2304 = vmatprep.mubr.msk.bf16.mxu0 %vm2472_vm4, %v2471_v17 }
 0x4dc   : > { %v1259_v9 = vmul.f32 %v2448_v8, %v2770_v23  ;;  %2314 = vmatprep.subr.bf16.mxu0 %v2471_v17 }
 0x4de   : > { %v1260_v10 = vpack.c.bf16 %v1259_v9, %v1259_v9 }
 0x4e2   : > { %2305 = vmatmul.mubr.msk.bf16.vlgmr.msra.gmra.mrb[24].mxu0 %vm793_vm9, %v1260_v10 }
 0x4e3   : > { %2316 = vmatprep.mubr.msk.bf16.mxu0 %vm2472_vm4, %v2471_v17 }
 0x4fd   : > { %v1374_v12 = vpop.xlane.xlu0 %1373 }
 0x4fe   : > { %2449 = vrcp.f32 %v1374_v12 }
 0x501   : > { %v1490_v11 = vpop.xlane.xlu0 %1489 }
 0x502   : > { %2451 = vrcp.f32 %v1490_v11  ;;  %v2167_v11 = vld [vmem:[%s2954_s24] ss:$0 sm:$0xff] }
 0x505   : > { %v1379_v13 = vpop.permute.xlu0 %1378  ;;  %v1607_v15 = vpop.xlane.xlu1 %1606 }
 0x506   : > { %v1384_v14 = vand.u32 %v1379_v13, %v2774_v29  ;;  %2453 = vrcp.f32 %v1607_v15 }
 0x508   : > { %v2450_v16 = vpop.eup %2449  ;;  %2315 = vmatpush3.bf16.msra.mxu0 %v1384_v14 }
 0x509   : > { %v1376_v18 = vmul.f32 %v2450_v16, %v2784_v39  ;;  %v1495_v19 = vpop.permute.xlu0 %1494  ;;  %2326 = vmatprep.subr.bf16.mxu0 %v2471_v17 }
 0x50a   : > { %v1500_v20 = vand.u32 %v1495_v19, %v2774_v29 }
 0x50b   : > { %v1377_v21 = vpack.c.bf16 %v1376_v18, %v1376_v18 }
 0x50c   : > { %v2452_v22 = vpop.eup %2451 }
 0x50d   : > { %2317 = vmatmul.mubr.msk.bf16.vlgmr.msra.gmra.mrb[28].mxu0 %vm793_vm9, %v1377_v21  ;;  %v1492_v23 = vmul.f32 %v2452_v22, %v2788_v42  ;;  %v1612_v24 = vpop.permute.xlu0 %1611 }
 0x50e   : > { %2327 = vmatpush3.bf16.msra.mxu0 %v1500_v20  ;;  %2328 = vmatprep.mubr.msk.bf16.mxu0 %vm2472_vm4, %v2471_v17  ;;  %v1617_v27 = vand.u32 %v1612_v24, %v2774_v29 }
 0x50f   : > { %2338 = vmatprep.subr.bf16.mxu0 %v2471_v17  ;;  %v1493_v25 = vpack.c.bf16 %v1492_v23, %v1492_v23 }
 0x510   : > { %v2454_v26 = vpop.eup %2453 }
 0x511   : > { %v1609_v28 = vmul.f32 %v2454_v26, %v2792_v44 }
 0x513   : > { %v1610_v30 = vpack.c.bf16 %v1609_v28, %v1609_v28 }
 0x515   : > { %2329 = vmatmul.mubr.msk.bf16.vlgmr.msra.gmra.mrb[32].mxu0 %vm793_vm9, %v1493_v25 }
 0x516   : > { %2339 = vmatpush3.bf16.msra.mxu0 %v1617_v27  ;;  %2340 = vmatprep.mubr.msk.bf16.mxu0 %vm2472_vm4, %v2471_v17 }
 0x517   : > { %2352 = vmatprep.subr.bf16.mxu0 %v2471_v17 }
 0x51d   : > { %2341 = vmatmul.mubr.msk.bf16.vlgmr.msra.gmra.mrb[36].mxu0 %vm793_vm9, %v1610_v30 }
 0x51e   : > { %2356 = vmatprep.mubr.msk.bf16.mxu0 %vm2472_vm4, %v2471_v17 }
 0x593   : > { %v838_v31 = vpop.f32.mrb[8].mxu0 }
 0x594   : > { %845 = vst.msk [vmem:[#allocation3] sm:$0x1f] %vm844_vm10, %v838_v31  ;;  %v2258_v29 = vpop.f32.mrb[9].mxu0 }
 0x595   : > { %v841_v32 = vpop.f32.mrb[10].mxu0  ;;  %v2409_v29 = vld [vmem:[%s2610_s3] sm:$0xff]  }
 0x596   : > { %v2259_v33 = vpop.f32.mrb[11].mxu0  ;;  %2353 = vmatpush3.bf16.msra.mxu0 %v2409_v29  ;;  %v2410_v32 = vld [vmem:[%s2610_s3 + $0x8] sm:$0xff]  }
 0x597   : > { %2354 = vmatprep.subr.bf16.mxu0 %v2471_v17 }
 0x59a   : > { %2355 = vmatpush3.bf16.msra.mxu0 %v2410_v32 }
 0x59b   : > { %v958_v34 = vpop.f32.mrb[12].mxu0 }
 0x59c   : > { %964 = vst.msk [vmem:[#allocation3 + $0x5] sm:$0x1f] %vm844_vm10, %v958_v34  ;;  %v2270_v35 = vpop.f32.mrb[13].mxu0 }
 0x59d   : > { %v961_v36 = vpop.f32.mrb[14].mxu0 }
 0x59e   : > { %v2271_v37 = vpop.f32.mrb[15].mxu0 }
 0x5a3   : > { %v1070_v38 = vpop.f32.mrb[16].mxu0 }
 0x5a4   : > { %1077 = vrot.lane.b32.xlu0 %v1070_v38, %s2485_s19  ;;  %v2282_v39 = vpop.f32.mrb[17].mxu0 }
 0x5a5   : > { %v1073_v40 = vpop.f32.mrb[18].mxu0 }
 0x5a6   : > { %v2283_v42 = vpop.f32.mrb[19].mxu0 }
 0x5a7   : > { %v2168_v42 = vld [vmem:[%s578_s13] ss:$0 sm:$0xff] }
 0x5ad   : > { %v1187_v43 = vpop.f32.mrb[20].mxu0 }
 0x5ae   : > { %1194 = vrot.lane.b32.xlu1 %v1187_v43, %s2485_s19  ;;  %v2294_v44 = vpop.f32.mrb[21].mxu0 }
 0x5af   : > { %v1190_v45 = vpop.f32.mrb[22].mxu0 }
 0x5b0   : > { %v2295_v46 = vpop.f32.mrb[23].mxu0 }
 0x5b1   : > { %v2169_v46 = vld [vmem:[%s581_s20] ss:$0 sm:$0xff] }
 0x5b5   : > { %v1303_v47 = vpop.f32.mrb[24].mxu0 }
 0x5b6   : > { %1310 = vrot.lane.b32.xlu0 %v1303_v47, %s2486_s21  ;;  %v2306_v48 = vpop.f32.mrb[25].mxu0 }
 0x5b7   : > { %v1306_v50 = vpop.f32.mrb[26].mxu0 }
 0x5b8   : > { %v2307_v51 = vpop.f32.mrb[27].mxu0 }
 0x5e0   : > { %v1420_v52 = vpop.f32.mrb[28].mxu0 }
 0x5e1   : > { %1427 = vrot.lane.b32.xlu0 %v1420_v52, %s2486_s21  ;;  %v2318_v53 = vpop.f32.mrb[29].mxu0  ;;  %v2411_v52 = vld [vmem:[%s2620_s14] sm:$0xff]  }
 0x5e2   : > { %v1423_v54 = vpop.f32.mrb[30].mxu0  ;;  %v2412_v53 = vld [vmem:[%s2620_s14 + $0x8] sm:$0xff]  }
 0x5e3   : > { %v2319_v55 = vpop.f32.mrb[31].mxu0  ;;  %v2413_v54 = vld [vmem:[%s2620_s14 + $0x10] sm:$0xff]  }
 0x5e4   : > { %v2414_v55 = vld [vmem:[%s2620_s14 + $0x18] sm:$0xff]  }
 0x5e8   : > { %v1536_v56 = vpop.f32.mrb[32].mxu0 }
 0x5e9   : > { %1543 = vrot.lane.b32.xlu0 %v1536_v56, %s2487_s22  ;;  %v2330_v57 = vpop.f32.mrb[33].mxu0  ;;  %v2417_v56 = vld [vmem:[%s2620_s14 + $0x30] sm:$0xff]  }
 0x5ea   : > { %v1539_v58 = vpop.f32.mrb[34].mxu0  ;;  %v2418_v57 = vld [vmem:[%s2620_s14 + $0x38] sm:$0xff]  }
 0x5eb   : > { %v2331_v59 = vpop.f32.mrb[35].mxu0  ;;  %v2170_v58 = vld [vmem:[%s589_s5] ss:$0 sm:$0xff] }
 0x5f0   : > { %v1653_v60 = vpop.f32.mrb[36].mxu0 }
 0x5f1   : > { %1660 = vrot.lane.b32.xlu0 %v1653_v60, %s2487_s22  ;;  %v2342_v61 = vpop.f32.mrb[37].mxu0 }
 0x5f2   : > { %v1656_v62 = vpop.f32.mrb[38].mxu0 }
 0x5f3   : > { %v2343_v63 = vpop.f32.mrb[39].mxu0 }
 0x616   : > { %v1078_v0 = vpop.permute.xlu0 %1077 }
 0x617   : > { %1081 = vst.msk [vmem:[#allocation3] sm:$0x1f] %vm1080_vm11, %v1078_v0 }
 0x620   : > { %v1195_v1 = vpop.permute.xlu1 %1194 }
 0x621   : > { %1197 = vst.msk [vmem:[#allocation3 + $0x5] sm:$0x1f] %vm1080_vm11, %v1195_v1 }
 0x628   : > { %v1311_v4 = vpop.permute.xlu0 %1310 }
 0x629   : > { %1314 = vst.msk [vmem:[#allocation3] sm:$0x1f] %vm1313_vm12, %v1311_v4 }
 0x653   : > { %v1428_v5 = vpop.permute.xlu0 %1427 }
 0x654   : > { %1430 = vst.msk [vmem:[#allocation3 + $0x5] sm:$0x1f] %vm1313_vm12, %v1428_v5 }
 0x65b   : > { %v1544_v6 = vpop.permute.xlu0 %1543 }
 0x65c   : > { %1547 = vst.msk [vmem:[#allocation3] sm:$0x1f] %vm1546_vm13, %v1544_v6 }
 0x663   : > { %v1661_v7 = vpop.permute.xlu0 %1660 }
 0x664   : > { %1663 = vst.msk [vmem:[#allocation3 + $0x5] sm:$0x1f] %vm1546_vm13, %v1661_v7 }
 0x66b   : > { %v1664_v8 = vld [vmem:[#allocation3] sm:$0xff]  ;;  %v1665_v9 = vld [vmem:[#allocation3 + $0x8] sm:$0x3] }
 0x66c   : > { %v1670_v10 = vpack.c.bf16 %v1665_v9, %v1664_v8 }
 0x66e   : > { %2349 = vmatmul.mubr.msk.bf16.vlgmr.msra.gmra.mrb[28].mxu1 %vm613_vm2, %v1670_v10 }
 0x66f   : > { %2376 = vmatprep.mubr.msk.bf16.mxu1 %vm2472_vm4, %v2471_v17  ;;  %2361 = vmatpush3.bf16.msra.mxu1 %v2411_v52 }
 0x670   : > { %2362 = vmatprep.subr.bf16.mxu1 %v2471_v17 }
 0x673   : > { %2363 = vmatpush3.bf16.msra.mxu1 %v2412_v53 }
 0x674   : > { %2364 = vmatprep.subr.bf16.mxu1 %v2471_v17 }
 0x677   : > { %2365 = vmatpush3.bf16.msra.mxu1 %v2413_v54 }
 0x678   : > { %2366 = vmatprep.subr.bf16.mxu1 %v2471_v17 }
 0x67b   : > { %2367 = vmatpush3.bf16.msra.mxu1 %v2414_v55 }
 0x67c   : > { %2368 = vmatprep.subr.bf16.mxu1 %v2471_v17 }
 0x67f   : > { %2369 = vmatpush3.bf16.msra.mxu1 %v2415_v41 }
 0x680   : > { %2370 = vmatprep.subr.bf16.mxu1 %v2471_v17 }
 0x683   : > { %2371 = vmatpush3.bf16.msra.mxu1 %v2416_v49 }
 0x684   : > { %2372 = vmatprep.subr.bf16.mxu1 %v2471_v17 }
 0x687   : > { %2373 = vmatpush3.bf16.msra.mxu1 %v2417_v56 }
 0x688   : > { %2374 = vmatprep.subr.bf16.mxu1 %v2471_v17 }
 0x68b   : > { %2375 = vmatpush3.bf16.msra.mxu1 %v2418_v57 }
 0x741   : > { %v1720_v12 = vpop.f32.mrb[28].mxu1 }
 0x742   : > { %v1727_v13 = vadd.f32 %v1720_v12, %v2633_v2  ;;  %v2350_v14 = vpop.f32.mrb[29].mxu1 }
 0x743   : > { %v1723_v15 = vpop.f32.mrb[30].mxu1 }
 0x744   : > { %v2858_v16 = vadd.f32 %v2167_v11, %v1727_v13  ;;  %v1728_v18 = vadd.f32 %v1723_v15, %v2635_v3  ;;  %v2351_v19 = vpop.f32.mrb[31].mxu1 }
 0x746   : > { %v2861_v20 = vadd.f32 %v2167_v11, %v1728_v18  ;;  %v1740_v21 = vsel %vm613_vm2, %v2858_v16, 0.0 }
 0x747   : > { %1741 = vadd.xlane.f32.xlu0 %v1740_v21 }
 0x748   : > { %v1743_v22 = vsel %vm617_vm3, %v2861_v20, 0.0 }
 0x749   : > { %1744 = vadd.xlane.f32.xlu1 %v1743_v22 }
 0x7d4   : > { %v1742_v2 = vpop.xlane.xlu0 %1741 }
 0x7d5   : > { %v1746_v23 = vmul.f32 0.03125, %v1742_v2 }
 0x7d6   : > { %v1745_v24 = vpop.xlane.xlu1 %1744 }
 0x7d7   : > { %v1748_v25 = vsub.f32 %v2858_v16, %v1746_v23  ;;  %v1747_v26 = vmul.f32 0.03125, %v1745_v24  ;;  %v2182_v24 = vld [vmem:[%s597_s18] ss:$0 sm:$0xff]  ;;  %s2955_s18 = sld [smem:[#allocation8_spill]] (!%p2183_p5) }
 0x7d9   : > { %v1749_v3 = vsub.f32 %v2861_v20, %v1747_v26  ;;  %v1750_v27 = vmul.f32 %v1748_v25, %v1748_v25 }
 0x7db   : > { %v1752_v28 = vsel %vm613_vm2, %v1750_v27, 0.0  ;;  %v1751_v30 = vmul.f32 %v1749_v3, %v1749_v3 }
 0x7dc   : > { %1753 = vadd.xlane.f32.xlu0 %v1752_v28 }
 0x7dd   : > { %v1755_v31 = vsel %vm617_vm3, %v1751_v30, 0.0 }
 0x7e0   : > { %1756 = vadd.xlane.f32.xlu0 %v1755_v31 }
 0x869   : > { %v1754_v33 = vpop.xlane.xlu0 %1753 }
 0x86a   : > { %v1758_v34 = vmul.f32 0.03125, %v1754_v33 }
 0x86c   : > { %v1760_v35 = vadd.f32 1e-05, %v1758_v34 }
 0x86d   : > { %v1757_v36 = vpop.xlane.xlu0 %1756 }
 0x86e   : > { %2455 = vrsqrt.f32 %v1760_v35  ;;  %v1759_v37 = vmul.f32 0.03125, %v1757_v36 }
 0x870   : > { %v1761_v38 = vadd.f32 1e-05, %v1759_v37 }
 0x872   : > { %2457 = vrsqrt.f32 %v1761_v38 }
 0x878   : > { %v2456_v39 = vpop.eup %2455 }
 0x879   : > { %v1764_v40 = vmul.f32 %v2456_v39, %v1748_v25 }
 0x87b   : > { %v1772_v44 = vmul.f32 %v2168_v42, %v1764_v40 }
 0x87c   : > { %v2458_v43 = vpop.eup %2457 }
 0x87d   : > { %v1765_v45 = vmul.f32 %v2458_v43, %v1749_v3  ;;  %v1780_v48 = vadd.f32 %v2169_v46, %v1772_v44 }
 0x87f   : > { %v1773_v47 = vmul.f32 %v2168_v42, %v1765_v45 }
 0x881   : > { %v1781_v50 = vadd.f32 %v2169_v46, %v1773_v47 }
 0x883   : > { %v1786_v51 = vpack.c.bf16 %v1781_v50, %v1780_v48 }
 0x885   : > { %2357 = vmatmul.mubr.msk.bf16.vlgmr.msra.gmra.mrb[40].mxu0 %vm613_vm2, %v1786_v51 }
 0x958   : > { %v1843_v59 = vpop.f32.mrb[40].mxu0 }
 0x959   : > { %v1844_v60 = vadd.f32 %v2170_v58, %v1843_v59  ;;  %v2358_v61 = vpop.f32.mrb[41].mxu0 }
 0x95a   : > { %v1846_v62 = vpop.f32.mrb[42].mxu0 }
 0x95b   : > { %v1852_v63 = vmul.f32 0.044715, %v1844_v60  ;;  %v1847_v0 = vadd.f32 %v2170_v58, %v1846_v62  ;;  %v2359_v1 = vpop.f32.mrb[43].mxu0  ;;  %v1850_v15 = vmul.f32 0.5, %v1844_v60 }
 0x95d   : > { %v1854_v4 = vmul.f32 %v1852_v63, %v1844_v60  ;;  %v1853_v5 = vmul.f32 0.044715, %v1847_v0  ;;  %v1851_v18 = vmul.f32 0.5, %v1847_v0 }
 0x95f   : > { %v1856_v6 = vmul.f32 %v1854_v4, %v1844_v60  ;;  %v1855_v7 = vmul.f32 %v1853_v5, %v1847_v0 }
 0x961   : > { %v1858_v8 = vadd.f32 %v1856_v6, %v1844_v60  ;;  %v1857_v9 = vmul.f32 %v1855_v7, %v1847_v0 }
 0x963   : > { %v1860_v17 = vmul.f32 0.7978846, %v1858_v8  ;;  %v1859_v10 = vadd.f32 %v1857_v9, %v1847_v0 }
 0x965   : > { %2459 = vtanh.f32 %v1860_v17  ;;  %v1861_v12 = vmul.f32 0.7978846, %v1859_v10 }
 0x967   : > { %2461 = vtanh.f32 %v1861_v12 }
 0x96f   : > { %v2460_v11 = vpop.eup %2459 }
 0x970   : > { %v1864_v13 = vadd.f32 1.0, %v2460_v11 }
 0x971   : > { %v2462_v14 = vpop.eup %2461 }
 0x972   : > { %v1865_v19 = vadd.f32 1.0, %v2462_v14  ;;  %v1866_v21 = vmul.f32 %v1864_v13, %v1850_v15 }
 0x974   : > { %v1867_v22 = vmul.f32 %v1865_v19, %v1851_v18 }
 0x976   : > { %v1884_v2 = vpack.c.bf16 %v1867_v22, %v1866_v21 }
 0x978   : > { %2377 = vmatmul.mubr.bf16.vlgmr.msra.gmra.mrb[32].mxu1 %v1884_v2 }
 0xa4b   : > { %v1967_v23 = vpop.f32.mrb[32].mxu1 }
 0xa4c   : > { %v1974_v25 = vadd.f32 %v1967_v23, %v2858_v16  ;;  %v2378_v26 = vpop.f32.mrb[33].mxu1  ;;  %1990 = sbr.rel (%p2183_p5) target bundleno = 2643 (0xa53), region = 80 }
 0xa4d   : > { %v1970_v3 = vpop.f32.mrb[34].mxu1 }
 0xa4e   : > { %v1983_v27 = vadd.f32 %v2182_v24, %v1974_v25  ;;  %v1975_v28 = vadd.f32 %v1970_v3, %v2861_v20  ;;  %v2379_v30 = vpop.f32.mrb[35].mxu1 }
 0xa50   : > { %1985 = vst.msk [vmem:[#allocation2] sm:$0xff] %vm613_vm2, %v1983_v27  ;;  %v1984_v31 = vadd.f32 %v2182_v24, %v1975_v28  ;;  %1991 = vst.msk [vmem:[%s2955_s18] sm:$0xff] (!%p2183_p5), %vm613_vm2, %v1983_v27 }
 0xa52   : > { %1986 = vst.msk [vmem:[#allocation2 + $0x8] sm:$0x3] %vm617_vm3, %v1984_v31  ;;  %1992 = vst.msk [vmem:[%s2955_s18 + $0x8] sm:$0x3] (!%p2183_p5), %vm617_vm3, %v1984_v31 }
 0xa53 PF: > { %s2956_s17 = sld [smem:[#allocation4_spill]] }
 0xa59   : > { %s23_s25 = sadd.s32 1, %s2956_s17  }
 0xa5a   : > { %p20_p6 = scmp.ge.s32.totalorder %s23_s25, 4  }
 0xa5c   :  { %22 = sbr.rel (!%p20_p6) target bundleno = 4 (0x4), region = 139 }

// kernel: _lambda_.6
= control target key start
LH: loop header
LB: loop body
LE: loop exit
PB: predicated region body
PF: predicated region fallthrough
CT: control target
= control target key end

     0   :  { %s5423_s0 = inlined_call_operand.vmem [shape: f32[16,32], index: 0, kind: input, shape index: {}]   ;;  %s5424_s1 = inlined_call_operand.vmem [shape: bf16[10,32], index: 1, kind: input, shape index: {}]   ;;  %s5425_s2 = inlined_call_operand.vmem [shape: f32[2,1,32], index: 2, kind: input, shape index: {}]   ;;  %s5426_s3 = inlined_call_operand.vmem [shape: f32[2,1,32], index: 3, kind: input, shape index: {}]   ;;  %s5427_s4 = inlined_call_operand.vmem [shape: bf16[2,32,96], index: 4, kind: input, shape index: {}]   ;;  %s5428_s5 = inlined_call_operand.vmem [shape: f32[2,1,96], index: 5, kind: input, shape index: {}]   ;;  %s5429_s6 = inlined_call_operand.vmem [shape: bf16[2,32,32], index: 6, kind: input, shape index: {}]   ;;  %s5430_s7 = inlined_call_operand.vmem [shape: f32[2,1,32], index: 7, kind: input, shape index: {}]   ;;  %s5431_s8 = inlined_call_operand.vmem [shape: f32[2,1,32], index: 8, kind: input, shape index: {}]   ;;  %s5432_s9 = inlined_call_operand.vmem [shape: f32[2,1,32], index: 9, kind: input, shape index: {}]   ;;  %s5433_s10 = inlined_call_operand.vmem [shape: bf16[2,32,32], index: 10, kind: input, shape index: {}]   ;;  %s5434_s11 = inlined_call_operand.vmem [shape: f32[2,1,32], index: 11, kind: input, shape index: {}]   ;;  %s5435_s12 = inlined_call_operand.vmem [shape: bf16[2,32,32], index: 12, kind: input, shape index: {}]   ;;  %s5436_s13 = inlined_call_operand.vmem [shape: f32[2,1,32], index: 13, kind: input, shape index: {}]   ;;  %s5437_s14 = inlined_call_operand.vmem [shape: bf16[2,32,32], index: 14, kind: input, shape index: {}]   ;;  %s5438_s15 = inlined_call_operand.vmem [shape: f32[2,1,32], index: 15, kind: input, shape index: {}]   ;;  %s5439_s16 = inlined_call_operand.vmem [shape: bf16[2,32,32], index: 16, kind: input, shape index: {}]   ;;  %s5440_s17 = inlined_call_operand.vmem [shape: f32[2,1,32], index: 17, kind: input, shape index: {}]   ;;  %s5441_s18 = inlined_call_operand.vmem [shape: f32[2,1,32], index: 18, kind: input, shape index: {}]   ;;  %s5442_s19 = inlined_call_operand.vmem [shape: f32[2,1,32], index: 19, kind: input, shape index: {}]   ;;  %s5443_s20 = inlined_call_operand.vmem [shape: bf16[2,32,128], index: 20, kind: input, shape index: {}]   ;;  %s5444_s21 = inlined_call_operand.vmem [shape: f32[2,1,128], index: 21, kind: input, shape index: {}]   ;;  %s5445_s22 = inlined_call_operand.vmem [shape: bf16[2,128,32], index: 22, kind: input, shape index: {}]   ;;  %s5446_s23 = inlined_call_operand.vmem [shape: f32[2,1,32], index: 23, kind: input, shape index: {}]   ;;  %s5447_s24 = inlined_call_operand.vmem [shape: f32[16,32], index: 24, kind: output, shape index: {}]  }
   0x1   :  { %5453 = sst [smem:[#allocation7_spill]] %s5423_s0 }
   0x2   :  { %5454 = sst [smem:[#allocation8_spill]] %s5424_s1 }
   0x3   :  { %5455 = sst [smem:[#allocation9_spill]] %s5425_s2 }
   0x4   :  { %5456 = sst [smem:[#allocation10_spill]] %s5426_s3 }
   0x5   :  { %5457 = sst [smem:[#allocation11_spill]] %s5427_s4 }
   0x6   :  { %5458 = sst [smem:[#allocation12_spill]] %s5428_s5  ;;  %s4701_s5 = smov 0  }
   0x7   :  { %5459 = sst [smem:[#allocation13_spill]] %s5429_s6 }
   0x8   :  { %5460 = sst [smem:[#allocation14_spill]] %s5430_s7 }
   0x9   :  { %5461 = sst [smem:[#allocation15_spill]] %s5431_s8 }
   0xa   :  { %5462 = sst [smem:[#allocation16_spill]] %s5433_s10 }
   0xb   :  { %5463 = sst [smem:[#allocation17_spill]] %s5435_s12 }
   0xc   :  { %5464 = sst [smem:[#allocation18_spill]] %s5437_s14 }
   0xd   :  { %5465 = sst [smem:[#allocation19_spill]] %s5438_s15 }
   0xe   :  { %5466 = sst [smem:[#allocation20_spill]] %s5439_s16 }
   0xf   :  { %5467 = sst [smem:[#allocation21_spill]] %s5440_s17 }
  0x10   :  { %5468 = sst [smem:[#allocation22_spill]] %s5443_s20 }
  0x11   :  { %5469 = sst [smem:[#allocation23_spill]] %s5444_s21 }
  0x12   :  { %5470 = sst [smem:[#allocation24_spill]] %s5445_s22 }
  0x13   :  { %5471 = sst [smem:[#allocation25_spill]] %s5446_s23 }
  0x14   :  { %5472 = sst [smem:[#allocation26_spill]] %s5447_s24 }
  0x15 LB: > { %5473 = sst [smem:[#allocation4_spill]] %s4557_s5  ;;  %s4707_s26 = sadd.s32 4294967295, %s4557_s5   ;;  %s4557_s5 = sphi %s4701_s5, %s34_s5  }
  0x16   : > { %5474 = sst [smem:[#allocation5_spill]] %s4707_s26  ;;  %p3956_p0 = scmp.ge.s32.totalorder %s4557_s5, 1 }
  0x17   : > { %p839_p1 = scmp.lt.s32.totalorder %s4557_s5, 3 }
  0x19   : > { %p840_p2 = pnand %p3956_p0, %p839_p1 }
  0x1b   : > { %843 = sbr.rel (%p840_p2) target bundleno = 4528 (0x11b0), region = 116 }
  0x22   : > { %p977_p3 = scmp.lt.s32.totalorder %s4707_s26, 1  ;;  %s5478_s24 = sld [smem:[#allocation11_spill]] }
  0x23   : > { %s5479_s2 = sld [smem:[#allocation13_spill]]  ;;  %s5482_s10 = sld [smem:[#allocation16_spill]] }
  0x24   : > { %s4713_s27 = scalar_select %p977_p3, %s4707_s26, 1 }
  0x25   : > { %s5483_s12 = sld [smem:[#allocation17_spill]]  ;;  %s5484_s14 = sld [smem:[#allocation18_spill]] }
  0x26   : > { %s4053_s25 = sshll.u32 %s4713_s27, 4  ;;  %s5486_s16 = sld [smem:[#allocation20_spill]] }
  0x27   : > { %s5489_s6 = sld [smem:[#allocation22_spill]]  ;;  %s4060_s15 = sshll.u32 %s4713_s27, 6 }
  0x28   : > { %s4731_s26 = scalar_lea.vmem %s5478_s24, %s4053_s25  ;;  %s5492_s20 = sld [smem:[#allocation25_spill]] }
  0x29   : > { %s4736_s29 = scalar_lea.vmem %s5479_s2, %s4053_s25  ;;  %s4753_s22 = scalar_lea.vmem %s5482_s10, %s4053_s25 }
  0x2a   : > { %s5491_s10 = sld [smem:[#allocation24_spill]]  ;;  %s5493_s4 = sld [smem:[#allocation5_spill]] }
  0x2b   : > { %s4762_s3 = scalar_lea.vmem %s5483_s12, %s4053_s25  ;;  %s4771_s24 = scalar_lea.vmem %s5484_s14, %s4053_s25 }
  0x2c   : > { %s4780_s0 = scalar_lea.vmem %s5486_s16, %s4053_s25  ;;  %s1042_s12 = scalar_lea.vmem %s5442_s19, %s4713_s27 }
  0x2d   : > { %5487 = sst [smem:[#allocation6_spill]] %s4780_s0  ;;  %s4797_s1 = scalar_lea.vmem %s5489_s6, %s4053_s25 }
  0x2e   : > { %s5490_s16 = sld [smem:[#allocation23_spill]]  ;;  %s1058_s28 = scalar_lea.vmem %s5492_s20, %s4713_s27 }
  0x30   : > { %s4807_s17 = scalar_lea.vmem %s5491_s10, %s4060_s15  ;;  %p3973_p4 = scmp.ne.s32.totalorder %s5493_s4, 0 }
  0x31   : > { %s5494_s5 = sld [smem:[#allocation7_spill]] (!%p3973_p4)  ;;  %vm1066_vm0 = vcmask (!%p3973_p4), 261120  }
  0x32   : > { %1063 = sbr.rel (%p3973_p4) target bundleno = 58 (0x3a), region = 120 }
  0x34   : > { %s1050_s0 = scalar_lea.vmem %s5490_s16, %s4713_s27 }
  0x37   : > { %s5495_s6 = smov (!%p3973_p4), %s5494_s5  ;;  %v1064_v0 = vld [vmem:[%s5494_s5] sm:$0xff] (!%p3973_p4) }
  0x38   : > { %v1065_v1 = vld [vmem:[%s5495_s6 + $0x8] sm:$0xff] (!%p3973_p4)  ;;  %1067 = vst.msk [vmem:[#allocation2] sm:$0xff] (!%p3973_p4), %vm1066_vm0, %v1064_v0 }
  0x39   : > { %1068 = vst.msk [vmem:[#allocation2 + $0x8] sm:$0xff] %vm1066_vm0, %v1065_v1 }
  0x3a PF: > { %vm1075_vm1 = vcmask 261120   ;;  %v4448_v16 = vld [vmem:[%s4731_s26] sm:$0xff]   ;;  %v4559_v17 = vmov 0.0   ;;  %v4449_v18 = vld [vmem:[%s4731_s26 + $0x8] sm:$0xff]   ;;  %vm4560_vm2 = vmmov 0   ;;  %s5496_s26 = sld [smem:[#allocation9_spill]] }
  0x3b   : > { %4155 = vmatprep.subr.bf16.mxu0 %v4559_v17  ;;  %4175 = vmatprep.subr.bf16.mxu1 %v4559_v17  ;;  %s5498_s30 = sld [smem:[#allocation10_spill]]  ;;  %s5500_s14 = sld [smem:[#allocation12_spill]]  ;;  %vm1196_vm3 = vcmask 64512   ;;  %vm1262_vm5 = vcmask 1043456   ;;  %vm1536_vm6 = vcmask 130112   ;;  %vm1771_vm7 = vcmask 195712  }
  0x3c   : > { %4156 = vmatpush3.bf16.msra.mxu0 %v4448_v16  ;;  %4159 = vmatprep.mubr.msk.bf16.mxu0 %vm4560_vm2, %v4559_v17  ;;  %s4561_s5 = smov 96   ;;  %s4562_s23 = smov 88   ;;  %vm2006_vm8 = vcmask 261312   ;;  %vm2497_vm9 = vcmask 39936   ;;  %vm2513_vm10 = vcmask 1041408   ;;  %vm2514_vm11 = vcmask 1042432  }
  0x3d   : > { %4157 = vmatprep.subr.bf16.mxu0 %v4559_v17  ;;  %4177 = vmatprep.mubr.msk.bf16.mxu1 %vm4560_vm2, %v4559_v17  ;;  %s4563_s16 = smov 80   ;;  %s4564_s10 = smov 120  }
  0x3e   : > { %s4565_s15 = smov 72   ;;  %s4568_s2 = smov 64  }
  0x3f   : > { %s4569_s7 = smov 56   ;;  %s4572_s8 = smov 8  }
  0x40   : > { %v4820_v2 = vld [vmem:[#allocation2] sm:$0xff]  ;;  %v4822_v3 = vld [vmem:[#allocation2 + $0x8] sm:$0xff]  ;;  %4158 = vmatpush3.bf16.msra.mxu0 %v4449_v18  ;;  %s5497_s20 = scalar_lea.vmem %s5496_s26, %s4713_s27  ;;  %s4566_s26 = smov 112  }
  0x41   : > { %v1076_v4 = vsel %vm1075_vm1, %v4820_v2, 0.0  ;;  %v1079_v5 = vsel %vm1075_vm1, %v4822_v3, 0.0  ;;  %4163 = vmatprep.subr.bf16.mxu0 %v4559_v17  ;;  %v3974_v27 = vld [vmem:[%s5497_s20] ss:$0 sm:$0xff]  ;;  %s5499_s21 = scalar_lea.vmem %s5498_s30, %s4713_s27  ;;  %s5501_s25 = scalar_lea.vmem %s5500_s14, %s4713_s27 }
  0x42   : > { %1077 = vadd.xlane.f32.xlu0 %v1076_v4  ;;  %v3975_v31 = vld [vmem:[%s5499_s21] ss:$0 sm:$0xff]  ;;  %s4567_s20 = smov 104   ;;  %s4570_s30 = smov 48  }
  0x43   : > { %v3976_v36 = vld [vmem:[%s5501_s25] ss:$0 sm:$0xff]  ;;  %s4571_s21 = smov 40   ;;  %s4573_s4 = smov 16  }
  0x44   : > { %s4574_s14 = smov 24   ;;  %s5509_s25 = scalar_lea.vmem %s5432_s9, %s4713_s27 }
  0x46   : > { %1080 = vadd.xlane.f32.xlu0 %v1079_v5  ;;  %v1187_v5 = vlaneseq }
  0xcf   : > { %v1078_v6 = vpop.xlane.xlu0 %1077 }
  0xd0   : > { %v1083_v7 = vmul.f32 0.03125, %v1078_v6  ;;  %v1188_v6 = vshrl.u32 %v1187_v5, 7 }
  0xd2   : > { %v1085_v8 = vsub.f32 %v4820_v2, %v1083_v7  ;;  %v1190_v7 = vand.u32 127, %v1187_v5 }
  0xd3   : > { %v1081_v9 = vpop.xlane.xlu0 %1080 }
  0xd4   : > { %v1084_v10 = vmul.f32 0.03125, %v1081_v9  ;;  %v1087_v11 = vmul.f32 %v1085_v8, %v1085_v8  ;;  %vm4928_vm4 = vcmp.le.s32.totalorder %v1190_v7, %v1188_v6 }
  0xd6   : > { %v1086_v12 = vsub.f32 %v4822_v3, %v1084_v10  ;;  %v1089_v13 = vsel %vm1075_vm1, %v1087_v11, 0.0 }
  0xd7   : > { %1090 = vadd.xlane.f32.xlu1 %v1089_v13 }
  0xd8   : > { %v1088_v14 = vmul.f32 %v1086_v12, %v1086_v12 }
  0xda   : > { %v1092_v15 = vsel %vm1075_vm1, %v1088_v14, 0.0 }
  0xdb   : > { %1093 = vadd.xlane.f32.xlu1 %v1092_v15 }
 0x164   : > { %v1091_v19 = vpop.xlane.xlu1 %1090 }
 0x165   : > { %v1095_v20 = vmul.f32 0.03125, %v1091_v19 }
 0x167   : > { %v1097_v21 = vadd.f32 1e-05, %v1095_v20 }
 0x168   : > { %v1094_v22 = vpop.xlane.xlu1 %1093 }
 0x169   : > { %4471 = vrsqrt.f32 %v1097_v21  ;;  %v1096_v23 = vmul.f32 0.03125, %v1094_v22 }
 0x16b   : > { %v1098_v24 = vadd.f32 1e-05, %v1096_v23 }
 0x16d   : > { %4473 = vrsqrt.f32 %v1098_v24 }
 0x173   : > { %v4472_v25 = vpop.eup %4471 }
 0x174   : > { %v1101_v26 = vmul.f32 %v4472_v25, %v1085_v8 }
 0x176   : > { %v1109_v30 = vmul.f32 %v3974_v27, %v1101_v26 }
 0x177   : > { %v4474_v28 = vpop.eup %4473 }
 0x178   : > { %v1102_v29 = vmul.f32 %v4474_v28, %v1086_v12  ;;  %v1117_v33 = vadd.f32 %v3975_v31, %v1109_v30 }
 0x17a   : > { %v1110_v32 = vmul.f32 %v3974_v27, %v1102_v29 }
 0x17c   : > { %v1118_v34 = vadd.f32 %v3975_v31, %v1110_v32 }
 0x17e   : > { %v1123_v35 = vpack.c.bf16 %v1118_v34, %v1117_v33 }
 0x180   : > { %4160 = vmatmul.mubr.msk.bf16.vlgmr.msra.gmra.mrb[0].mxu0 %vm1075_vm1, %v1123_v35 }
 0x181   : > { %4165 = vmatprep.mubr.msk.bf16.mxu0 %vm4560_vm2, %v4559_v17 }
 0x253   : > { %v1180_v37 = vpop.f32.mrb[0].mxu0 }
 0x254   : > { %v1181_v38 = vadd.f32 %v3976_v36, %v1180_v37  ;;  %v4161_v39 = vpop.f32.mrb[1].mxu0 }
 0x255   : > { %v1183_v40 = vpop.f32.mrb[2].mxu0 }
 0x256   : > { %v4860_v41 = vpack.c.bf16 %v1181_v38, %v1181_v38  ;;  %v1184_v42 = vadd.f32 %v3976_v36, %v1183_v40  ;;  %v4162_v43 = vpop.f32.mrb[3].mxu0 }
 0x258   : > { %v4862_v44 = vpack.c.bf16 %v1184_v42, %v1184_v42  ;;  %1194 = vrot.lane.b32.xlu0 %v4860_v41, %s4561_s5 }
 0x25a   : > { %1309 = vrot.lane.b32.xlu1 %v4862_v44, %s4561_s5  ;;  %s5504_s5 = sld [smem:[#allocation14_spill]] }
 0x25c   : > { %1540 = vrot.lane.b32.xlu0 %v4862_v44, %s4562_s23 }
 0x25e   : > { %1422 = vrot.lane.b32.xlu1 %v4860_v41, %s4562_s23 }
 0x260   : > { %1657 = vrot.lane.b32.xlu0 %v4860_v41, %s4563_s16  ;;  %s5505_s23 = scalar_lea.vmem %s5504_s5, %s4713_s27 }
 0x262   : > { %1420 = vrot.lane.b32.xlu1 %v4860_v41, %s4564_s10 }
 0x264   : > { %1775 = vrot.lane.b32.xlu0 %v4862_v44, %s4563_s16  ;;  %s5510_s16 = scalar_lea.vmem %s5436_s13, %s4713_s27 }
 0x266   : > { %1538 = vrot.lane.b32.xlu1 %v4862_v44, %s4564_s10 }
 0x268   : > { %1892 = vrot.lane.b32.xlu0 %v4860_v41, %s4565_s15 }
 0x26a   : > { %1655 = vrot.lane.b32.xlu1 %v4860_v41, %s4566_s26 }
 0x26c   : > { %2010 = vrot.lane.b32.xlu0 %v4862_v44, %s4565_s15  ;;  %s5520_s15 = sld [smem:[#allocation5_spill]] }
 0x26e   : > { %1773 = vrot.lane.b32.xlu1 %v4862_v44, %s4566_s26 }
 0x272   : > { %1890 = vrot.lane.b32.xlu1 %v4860_v41, %s4567_s20  ;;  %p4050_p5 = scmp.ne.s32.totalorder %s5520_s15, 1 }
 0x276   : > { %2008 = vrot.lane.b32.xlu1 %v4862_v44, %s4567_s20 }
 0x27a   : > { %1371 = vrot.lane.b32.xlu1 %v4862_v44, %s4568_s2 }
 0x2ca   : > { %v1195_v45 = vpop.permute.xlu0 %1194 }
 0x2cb   : > { %v1201_v46 = vsel %vm1196_vm3, %v1195_v45, 0 }
 0x2cc   : > { %4164 = vmatpush3.bf16.xpose.msra.mxu0 %v1201_v46  ;;  %v1310_v47 = vpop.permute.xlu1 %1309 }
 0x2cd   : > { %v1315_v48 = vsel %vm1196_vm3, %v1310_v47, 0  ;;  %4169 = vmatprep.subr.bf16.mxu0 %v4559_v17 }
 0x2ce   : > { %4176 = vmatpush3.bf16.xpose.msra.mxu1 %v1315_v48  ;;  %v1541_v51 = vpop.permute.xlu0 %1540 }
 0x2cf   : > { %4187 = vmatprep.subr.bf16.mxu1 %v4559_v17  ;;  %v1546_v53 = vsel %vm1196_vm3, %v1541_v51, 0 }
 0x2d0   : > { %v1423_v49 = vpop.permute.xlu1 %1422 }
 0x2d1   : > { %v1428_v50 = vsel %vm1196_vm3, %v1423_v49, 0 }
 0x2d2   : > { %v1658_v54 = vpop.permute.xlu0 %1657 }
 0x2d3   : > { %4166 = vmatmul.mubr.msk.bf16.vlgmr.msra.gmra.mrb[4].mxu0 %vm1196_vm3, %v4860_v41  ;;  %v1663_v56 = vsel %vm1196_vm3, %v1658_v54, 0 }
 0x2d4   : > { %4171 = vmatprep.mubr.msk.bf16.mxu0 %vm4560_vm2, %v4559_v17  ;;  %v1421_v52 = vpop.permute.xlu1 %1420 }
 0x2d5   : > { %4178 = vmatmul.mubr.msk.bf16.vlgmr.msra.gmra.mrb[0].mxu1 %vm1196_vm3, %v4862_v44 }
 0x2d6   : > { %4188 = vmatpush3.bf16.xpose.msra.mxu1 %v1428_v50  ;;  %4189 = vmatprep.mubr.msk.bf16.mxu1 %vm4560_vm2, %v4559_v17  ;;  %v1776_v57 = vpop.permute.xlu0 %1775 }
 0x2d7   : > { %4199 = vmatprep.subr.bf16.mxu1 %v4559_v17  ;;  %v1781_v59 = vsel %vm1196_vm3, %v1776_v57, 0 }
 0x2d8   : > { %v1539_v55 = vpop.permute.xlu1 %1538 }
 0x2da   : > { %v1893_v60 = vpop.permute.xlu0 %1892 }
 0x2db   : > { %v1898_v62 = vsel %vm1196_vm3, %v1893_v60, 0 }
 0x2dc   : > { %v1656_v58 = vpop.permute.xlu1 %1655 }
 0x2dd   : > { %4190 = vmatmul.mubr.msk.bf16.vlgmr.msra.gmra.mrb[4].mxu1 %vm1196_vm3, %v1421_v52 }
 0x2de   : > { %4200 = vmatpush3.bf16.xpose.msra.mxu1 %v1546_v53  ;;  %4201 = vmatprep.mubr.msk.bf16.mxu1 %vm4560_vm2, %v4559_v17  ;;  %v2011_v63 = vpop.permute.xlu0 %2010 }
 0x2df   : > { %4211 = vmatprep.subr.bf16.mxu1 %v4559_v17  ;;  %v2016_v1 = vsel %vm1196_vm3, %v2011_v63, 0 }
 0x2e0   : > { %v1774_v61 = vpop.permute.xlu1 %1773 }
 0x2e4   : > { %v1891_v0 = vpop.permute.xlu1 %1890 }
 0x2e5   : > { %4202 = vmatmul.mubr.msk.bf16.vlgmr.msra.gmra.mrb[8].mxu1 %vm1196_vm3, %v1539_v55 }
 0x2e6   : > { %4212 = vmatpush3.bf16.xpose.msra.mxu1 %v1663_v56  ;;  %4213 = vmatprep.mubr.msk.bf16.mxu1 %vm4560_vm2, %v4559_v17 }
 0x2e7   : > { %4223 = vmatprep.subr.bf16.mxu1 %v4559_v17 }
 0x2e8   : > { %v2009_v4 = vpop.permute.xlu1 %2008 }
 0x2ec   : > { %v4975_v6 = vpop.permute.xlu1 %1371 }
 0x2ed   : > { %4214 = vmatmul.mubr.msk.bf16.vlgmr.msra.gmra.mrb[12].mxu1 %vm1196_vm3, %v1656_v58 }
 0x2ee   : > { %4224 = vmatpush3.bf16.xpose.msra.mxu1 %v1781_v59  ;;  %4225 = vmatprep.mubr.msk.bf16.mxu1 %vm4560_vm2, %v4559_v17 }
 0x2ef   : > { %4235 = vmatprep.subr.bf16.mxu1 %v4559_v17 }
 0x2f5   : > { %4226 = vmatmul.mubr.msk.bf16.vlgmr.msra.gmra.mrb[16].mxu1 %vm1196_vm3, %v1774_v61 }
 0x2f6   : > { %4236 = vmatpush3.bf16.xpose.msra.mxu1 %v1898_v62  ;;  %4237 = vmatprep.mubr.msk.bf16.mxu1 %vm4560_vm2, %v4559_v17 }
 0x2f7   : > { %4247 = vmatprep.subr.bf16.mxu1 %v4559_v17 }
 0x2fd   : > { %4238 = vmatmul.mubr.msk.bf16.vlgmr.msra.gmra.mrb[20].mxu1 %vm1196_vm3, %v1891_v0 }
 0x2fe   : > { %4248 = vmatpush3.bf16.xpose.msra.mxu1 %v2016_v1  ;;  %4249 = vmatprep.mubr.msk.bf16.mxu1 %vm4560_vm2, %v4559_v17 }
 0x2ff   : > { %4259 = vmatprep.subr.bf16.mxu1 %v4559_v17 }
 0x305   : > { %4250 = vmatmul.mubr.msk.bf16.vlgmr.msra.gmra.mrb[24].mxu1 %vm1196_vm3, %v2009_v4 }
 0x306   : > { %4263 = vmatprep.mubr.msk.bf16.mxu1 %vm4560_vm2, %v4559_v17 }
 0x3a6   : > { %v1237_v8 = vpop.f32.mrb[4].mxu0 }
 0x3a7   : > { %v1243_v10 = vmul.f32 0.35355338, %v1237_v8  ;;  %v4167_v11 = vpop.f32.mrb[5].mxu0 }
 0x3a8   : > { %v1240_v12 = vpop.f32.mrb[6].mxu0  ;;  %v1351_v13 = vpop.f32.mrb[0].mxu1 }
 0x3a9   : > { %v1357_v14 = vmul.f32 0.35355338, %v1351_v13  ;;  %v4168_v15 = vpop.f32.mrb[7].mxu0  ;;  %v4179_v16 = vpop.f32.mrb[1].mxu1  ;;  %v4934_v18 = vsel %vm4928_vm4, %v1243_v10, -1e+30 }
 0x3aa   : > { %v1354_v19 = vpop.f32.mrb[2].mxu1  ;;  %v1245_v20 = vsel %vm1196_vm3, %v4934_v18, -inf }
 0x3ab   : > { %v4180_v21 = vpop.f32.mrb[3].mxu1  ;;  %1246 = vmax.xlane.f32.xlu0 %v1245_v20  ;;  %v4940_v22 = vsel %vm4928_vm4, %v1357_v14, -1e+30 }
 0x3ac   : > { %v1359_v23 = vsel %vm1196_vm3, %v4940_v22, -inf }
 0x3ad   : > { %1360 = vmax.xlane.f32.xlu1 %v1359_v23 }
 0x3b0   : > { %v1464_v24 = vpop.f32.mrb[4].mxu1 }
 0x3b1   : > { %v4191_v25 = vpop.f32.mrb[5].mxu1  ;;  %v1470_v51 = vmul.f32 0.35355338, %v1464_v24 }
 0x3b2   : > { %v1467_v26 = vpop.f32.mrb[6].mxu1 }
 0x3b3   : > { %v4192_v27 = vpop.f32.mrb[7].mxu1  ;;  %v1471_v60 = vsel %vm4928_vm4, %v1470_v51, -1e+30 }
 0x3b4   : > { %v1472_v61 = vsel %vm1196_vm3, %v1471_v60, -inf }
 0x3b8   : > { %v1582_v28 = vpop.f32.mrb[8].mxu1 }
 0x3b9   : > { %v4203_v29 = vpop.f32.mrb[9].mxu1  ;;  %v1588_v58 = vmul.f32 0.35355338, %v1582_v28 }
 0x3ba   : > { %v1585_v30 = vpop.f32.mrb[10].mxu1 }
 0x3bb   : > { %v4204_v31 = vpop.f32.mrb[11].mxu1  ;;  %v1589_v63 = vsel %vm4928_vm4, %v1588_v58, -1e+30 }
 0x3bc   : > { %v1590_v0 = vsel %vm1196_vm3, %v1589_v63, -inf }
 0x3c0   : > { %v1699_v32 = vpop.f32.mrb[12].mxu1 }
 0x3c1   : > { %v4215_v33 = vpop.f32.mrb[13].mxu1  ;;  %1257 = vrot.lane.b32.xlu0 %v4860_v41, %s4568_s2  ;;  %v1705_v62 = vmul.f32 0.35355338, %v1699_v32  ;;  %s5506_s2 = sld [smem:[#allocation8_spill]] }
 0x3c2   : > { %v1702_v34 = vpop.f32.mrb[14].mxu1 }
 0x3c3   : > { %v4216_v35 = vpop.f32.mrb[15].mxu1  ;;  %v1706_v1 = vsel %vm4928_vm4, %v1705_v62, -1e+30 }
 0x3c4   : > { %v1707_v4 = vsel %vm1196_vm3, %v1706_v1, -inf }
 0x3c8   : > { %v1817_v36 = vpop.f32.mrb[16].mxu1 }
 0x3c9   : > { %v1823_v37 = vmul.f32 0.35355338, %v1817_v36  ;;  %v4227_v38 = vpop.f32.mrb[17].mxu1 }
 0x3ca   : > { %v1820_v39 = vpop.f32.mrb[18].mxu1 }
 0x3cb   : > { %v4228_v40 = vpop.f32.mrb[19].mxu1  ;;  %v4948_v42 = vsel %vm4928_vm4, %v1823_v37, -1e+30 }
 0x3cc   : > { %v1825_v43 = vsel %vm1196_vm3, %v4948_v42, -inf }
 0x3cd   : > { %1826 = vmax.xlane.f32.xlu1 %v1825_v43 }
 0x3d0   : > { %v1934_v45 = vpop.f32.mrb[20].mxu1 }
 0x3d1   : > { %v1940_v46 = vmul.f32 0.35355338, %v1934_v45  ;;  %v4239_v47 = vpop.f32.mrb[21].mxu1 }
 0x3d2   : > { %v1937_v48 = vpop.f32.mrb[22].mxu1 }
 0x3d3   : > { %v4240_v49 = vpop.f32.mrb[23].mxu1  ;;  %v4954_v50 = vsel %vm4928_vm4, %v1940_v46, -1e+30 }
 0x3d4   : > { %v1942_v5 = vsel %vm1196_vm3, %v4954_v50, -inf }
 0x3d8   : > { %v2052_v52 = vpop.f32.mrb[24].mxu1 }
 0x3d9   : > { %v2058_v53 = vmul.f32 0.35355338, %v2052_v52  ;;  %v4251_v54 = vpop.f32.mrb[25].mxu1 }
 0x3da   : > { %v2055_v55 = vpop.f32.mrb[26].mxu1 }
 0x3db   : > { %v4252_v56 = vpop.f32.mrb[27].mxu1  ;;  %v4958_v57 = vsel %vm4928_vm4, %v2058_v53, -1e+30 }
 0x3dc   : > { %v2060_v59 = vsel %vm1196_vm3, %v4958_v57, -inf }
 0x3dd   : > { %2061 = vmax.xlane.f32.xlu1 %v2060_v59  ;;  %v1377_v59 = vsel %vm1262_vm5, %v4975_v6, 0 }
 0x3e0   : > { %1473 = vmax.xlane.f32.xlu0 %v1472_v61 }
 0x3e4   : > { %1591 = vmax.xlane.f32.xlu0 %v1590_v0 }
 0x3e8   : > { %1708 = vmax.xlane.f32.xlu0 %v1707_v4 }
 0x3ec   : > { %1943 = vmax.xlane.f32.xlu0 %v1942_v5 }
 0x402   : > { %1484 = vrot.lane.b32.xlu0 %v4860_v41, %s4569_s7 }
 0x438   : > { %v1247_v7 = vpop.xlane.xlu0 %1246 }
 0x439   : > { %v1248_v8 = vsub.f32 %v4934_v18, %v1247_v7 }
 0x43a   : > { %v1361_v10 = vpop.xlane.xlu1 %1360 }
 0x43b   : > { %v1249_v11 = vmul.f32 1.442695, %v1248_v8  ;;  %v1362_v9 = vsub.f32 %v4940_v22, %v1361_v10 }
 0x43c   : > { %v1258_v12 = vpop.permute.xlu0 %1257 }
 0x43d   : > { %4475 = vpow2.f32 %v1249_v11  ;;  %v1363_v13 = vmul.f32 1.442695, %v1362_v9  ;;  %v1264_v14 = vsel %vm1262_vm5, %v1258_v12, 0 }
 0x43e   : > { %4170 = vmatpush3.bf16.msra.mxu0 %v1264_v14 }
 0x43f   : > { %4477 = vpow2.f32 %v1363_v13  ;;  %4181 = vmatprep.subr.bf16.mxu0 %v4559_v17 }
 0x447   : > { %v4476_v15 = vpop.eup %4475 }
 0x448   : > { %v1251_v16 = vsel %vm1196_vm3, %v4476_v15, 0.0 }
 0x449   : > { %v4982_v19 = vpop.eup %4477  ;;  %1252 = vadd.xlane.f32.xlu0 %v1251_v16 }
 0x44a   : > { %v1365_v18 = vsel %vm1196_vm3, %v4982_v19, 0.0 }
 0x44b   : > { %1366 = vadd.xlane.f32.xlu1 %v1365_v18 }
 0x45a   : > { %v1827_v23 = vpop.xlane.xlu1 %1826 }
 0x45b   : > { %v1828_v26 = vsub.f32 %v4948_v42, %v1827_v23 }
 0x45c   : > { %1719 = vrot.lane.b32.xlu1 %v4860_v41, %s4570_s30 }
 0x45d   : > { %v1829_v30 = vmul.f32 1.442695, %v1828_v26 }
 0x46a   : > { %v2062_v45 = vpop.xlane.xlu1 %2061 }
 0x46b   : > { %v2063_v46 = vsub.f32 %v4958_v57, %v2062_v45 }
 0x46d   : > { %v1474_v20 = vpop.xlane.xlu0 %1473  ;;  %v2064_v47 = vmul.f32 1.442695, %v2063_v46 }
 0x46e   : > { %v1475_v21 = vsub.f32 %v1471_v60, %v1474_v20 }
 0x470   : > { %v1476_v22 = vmul.f32 1.442695, %v1475_v21 }
 0x471   : > { %v1592_v24 = vpop.xlane.xlu0 %1591 }
 0x472   : > { %4479 = vpow2.f32 %v1476_v22  ;;  %v1593_v25 = vsub.f32 %v1589_v63, %v1592_v24 }
 0x474   : > { %v1594_v27 = vmul.f32 1.442695, %v1593_v25 }
 0x475   : > { %v1709_v28 = vpop.xlane.xlu0 %1708 }
 0x476   : > { %4481 = vpow2.f32 %v1594_v27  ;;  %v1710_v29 = vsub.f32 %v1706_v1, %v1709_v28 }
 0x478   : > { %v1711_v31 = vmul.f32 1.442695, %v1710_v29 }
 0x479   : > { %v1944_v40 = vpop.xlane.xlu0 %1943 }
 0x47a   : > { %4483 = vpow2.f32 %v1711_v31  ;;  %v1945_v42 = vsub.f32 %v4954_v50, %v1944_v40 }
 0x47b   : > { %4485 = vpow2.f32 %v1829_v30 }
 0x47c   : > { %v4480_v32 = vpop.eup %4479  ;;  %v1946_v43 = vmul.f32 1.442695, %v1945_v42 }
 0x47d   : > { %v1478_v33 = vsel %vm1196_vm3, %v4480_v32, 0.0  ;;  %v1485_v50 = vpop.permute.xlu0 %1484 }
 0x47e   : > { %1479 = vadd.xlane.f32.xlu0 %v1478_v33  ;;  %4487 = vpow2.f32 %v1946_v43  ;;  %v1490_v60 = vsel %vm1262_vm5, %v1485_v50, 0 }
 0x47f   : > { %4489 = vpow2.f32 %v2064_v47 }
 0x480   : > { %v4990_v34 = vpop.eup %4481 }
 0x481   : > { %v1596_v35 = vsel %vm1196_vm3, %v4990_v34, 0.0 }
 0x482   : > { %1597 = vadd.xlane.f32.xlu1 %v1596_v35 }
 0x484   : > { %v4994_v36 = vpop.eup %4483 }
 0x485   : > { %v1713_v37 = vsel %vm1196_vm3, %v4994_v36, 0.0  ;;  %v4998_v38 = vpop.eup %4485 }
 0x486   : > { %1714 = vadd.xlane.f32.xlu1 %v1713_v37  ;;  %v1831_v39 = vsel %vm1196_vm3, %v4998_v38, 0.0 }
 0x488   : > { %v5008_v48 = vpop.eup %4487 }
 0x489   : > { %v1948_v49 = vsel %vm1196_vm3, %v5008_v48, 0.0  ;;  %v5012_v51 = vpop.eup %4489 }
 0x48a   : > { %1832 = vadd.xlane.f32.xlu1 %v1831_v39  ;;  %v2066_v52 = vsel %vm1196_vm3, %v5012_v51, 0.0 }
 0x494   : > { %1602 = vrot.lane.b32.xlu0 %v4862_v44, %s4569_s7 }
 0x49b   : > { %1837 = vrot.lane.b32.xlu1 %v4862_v44, %s4570_s30 }
 0x4b3   : > { %1949 = vadd.xlane.f32.xlu0 %v1948_v49 }
 0x4bf   : > { %2067 = vadd.xlane.f32.xlu1 %v2066_v52 }
 0x4c9   : > { %1954 = vrot.lane.b32.xlu0 %v4860_v41, %s4571_s21 }
 0x4d0   : > { %2072 = vrot.lane.b32.xlu1 %v4862_v44, %s4571_s21 }
 0x4d6   : > { %v1253_v53 = vpop.xlane.xlu0 %1252 }
 0x4d7   : > { %4491 = vrcp.f32 %v1253_v53 }
 0x4d8   : > { %v1367_v54 = vpop.xlane.xlu1 %1366 }
 0x4d9   : > { %4493 = vrcp.f32 %v1367_v54 }
 0x4dc   : > { %v1720_v61 = vpop.permute.xlu1 %1719 }
 0x4dd   : > { %v1725_v13 = vsel %vm1262_vm5, %v1720_v61, 0 }
 0x4e1   : > { %v4492_v55 = vpop.eup %4491 }
 0x4e2   : > { %v1255_v56 = vmul.f32 %v4492_v55, %v4476_v15 }
 0x4e3   : > { %v4494_v58 = vpop.eup %4493 }
 0x4e4   : > { %v1256_v57 = vpack.c.bf16 %v1255_v56, %v1255_v56  ;;  %v1369_v41 = vmul.f32 %v4494_v58, %v4982_v19 }
 0x4e6   : > { %4172 = vmatmul.mubr.msk.bf16.vlgmr.msra.gmra.mrb[8].mxu0 %vm1196_vm3, %v1256_v57  ;;  %v1370_v44 = vpack.c.bf16 %v1369_v41, %v1369_v41 }
 0x4e7   : > { %4182 = vmatpush3.bf16.msra.mxu0 %v1377_v59  ;;  %4183 = vmatprep.mubr.msk.bf16.mxu0 %vm4560_vm2, %v4559_v17 }
 0x4e8   : > { %4193 = vmatprep.subr.bf16.mxu0 %v4559_v17 }
 0x4ee   : > { %4184 = vmatmul.mubr.msk.bf16.vlgmr.msra.gmra.mrb[12].mxu0 %vm1196_vm3, %v1370_v44  ;;  %v4450_v44 = vld [vmem:[%s4736_s29] sm:$0xff]  }
 0x4ef   : > { %4194 = vmatpush3.bf16.msra.mxu0 %v1490_v60  ;;  %4195 = vmatprep.mubr.msk.bf16.mxu0 %vm4560_vm2, %v4559_v17 }
 0x4f0   : > { %4205 = vmatprep.subr.bf16.mxu0 %v4559_v17  ;;  %4260 = vmatpush3.bf16.msra.mxu1 %v4450_v44 }
 0x4f1   : > { %4261 = vmatprep.subr.bf16.mxu1 %v4559_v17 }
 0x50b   : > { %v1480_v62 = vpop.xlane.xlu0 %1479 }
 0x50c   : > { %4495 = vrcp.f32 %v1480_v62  ;;  %v4451_v62 = vld [vmem:[%s4736_s29 + $0x8] sm:$0xff]  }
 0x50d   : > { %4262 = vmatpush3.bf16.msra.mxu1 %v4451_v62 }
 0x50e   : > { %4275 = vmatprep.subr.bf16.mxu1 %v4559_v17 }
 0x50f   : > { %v1598_v63 = vpop.xlane.xlu1 %1597  ;;  %v1603_v5 = vpop.permute.xlu0 %1602 }
 0x510   : > { %4497 = vrcp.f32 %v1598_v63  ;;  %v1608_v8 = vsel %vm1262_vm5, %v1603_v5, 0 }
 0x513   : > { %v1715_v0 = vpop.xlane.xlu1 %1714 }
 0x514   : > { %4499 = vrcp.f32 %v1715_v0 }
 0x516   : > { %v4496_v1 = vpop.eup %4495 }
 0x517   : > { %v1482_v4 = vmul.f32 %v4496_v1, %v4480_v32  ;;  %v1833_v11 = vpop.xlane.xlu1 %1832 }
 0x518   : > { %4501 = vrcp.f32 %v1833_v11 }
 0x519   : > { %v1483_v6 = vpack.c.bf16 %v1482_v4, %v1482_v4 }
 0x51a   : > { %v4498_v7 = vpop.eup %4497 }
 0x51b   : > { %4196 = vmatmul.mubr.msk.bf16.vlgmr.msra.gmra.mrb[16].mxu0 %vm1196_vm3, %v1483_v6  ;;  %v1600_v10 = vmul.f32 %v4498_v7, %v4990_v34  ;;  %v1838_v15 = vpop.permute.xlu1 %1837 }
 0x51c   : > { %4206 = vmatpush3.bf16.msra.mxu0 %v1608_v8  ;;  %4207 = vmatprep.mubr.msk.bf16.mxu0 %vm4560_vm2, %v4559_v17  ;;  %v1843_v18 = vsel %vm1262_vm5, %v1838_v15, 0 }
 0x51d   : > { %4217 = vmatprep.subr.bf16.mxu0 %v4559_v17  ;;  %v1601_v9 = vpack.c.bf16 %v1600_v10, %v1600_v10 }
 0x51e   : > { %v4500_v12 = vpop.eup %4499 }
 0x51f   : > { %v1717_v14 = vmul.f32 %v4500_v12, %v4994_v36 }
 0x521   : > { %v1718_v16 = vpack.c.bf16 %v1717_v14, %v1717_v14 }
 0x522   : > { %v4502_v19 = vpop.eup %4501 }
 0x523   : > { %4208 = vmatmul.mubr.msk.bf16.vlgmr.msra.gmra.mrb[20].mxu0 %vm1196_vm3, %v1601_v9  ;;  %v1835_v20 = vmul.f32 %v4502_v19, %v4998_v38 }
 0x524   : > { %4218 = vmatpush3.bf16.msra.mxu0 %v1725_v13  ;;  %4219 = vmatprep.mubr.msk.bf16.mxu0 %vm4560_vm2, %v4559_v17 }
 0x525   : > { %4229 = vmatprep.subr.bf16.mxu0 %v4559_v17  ;;  %v1836_v21 = vpack.c.bf16 %v1835_v20, %v1835_v20 }
 0x52b   : > { %4220 = vmatmul.mubr.msk.bf16.vlgmr.msra.gmra.mrb[24].mxu0 %vm1196_vm3, %v1718_v16  ;;  %v3999_v16 = vld [vmem:[%s5505_s23] ss:$0 sm:$0xff] }
 0x52c   : > { %4230 = vmatpush3.bf16.msra.mxu0 %v1843_v18  ;;  %4231 = vmatprep.mubr.msk.bf16.mxu0 %vm4560_vm2, %v4559_v17 }
 0x52d   : > { %4241 = vmatprep.subr.bf16.mxu0 %v4559_v17 }
 0x533   : > { %4232 = vmatmul.mubr.msk.bf16.vlgmr.msra.gmra.mrb[28].mxu0 %vm1196_vm3, %v1836_v21 }
 0x534   : > { %4243 = vmatprep.mubr.msk.bf16.mxu0 %vm4560_vm2, %v4559_v17 }
 0x540   : > { %v1950_v22 = vpop.xlane.xlu0 %1949 }
 0x541   : > { %4503 = vrcp.f32 %v1950_v22 }
 0x544   : > { %v1955_v23 = vpop.permute.xlu0 %1954 }
 0x545   : > { %v1960_v24 = vsel %vm1262_vm5, %v1955_v23, 0 }
 0x546   : > { %4242 = vmatpush3.bf16.msra.mxu0 %v1960_v24 }
 0x547   : > { %4253 = vmatprep.subr.bf16.mxu0 %v4559_v17 }
 0x54b   : > { %v4504_v25 = vpop.eup %4503 }
 0x54c   : > { %v1952_v26 = vmul.f32 %v4504_v25, %v5008_v48  ;;  %v2068_v27 = vpop.xlane.xlu1 %2067 }
 0x54d   : > { %4505 = vrcp.f32 %v2068_v27 }
 0x54e   : > { %v1953_v28 = vpack.c.bf16 %v1952_v26, %v1952_v26 }
 0x550   : > { %v2073_v29 = vpop.permute.xlu1 %2072  ;;  %4244 = vmatmul.mubr.msk.bf16.vlgmr.msra.gmra.mrb[32].mxu0 %vm1196_vm3, %v1953_v28 }
 0x551   : > { %v2078_v30 = vsel %vm1262_vm5, %v2073_v29, 0  ;;  %4255 = vmatprep.mubr.msk.bf16.mxu0 %vm4560_vm2, %v4559_v17 }
 0x552   : > { %4254 = vmatpush3.bf16.msra.mxu0 %v2078_v30 }
 0x553   : > { %4267 = vmatprep.subr.bf16.mxu0 %v4559_v17 }
 0x557   : > { %v4506_v31 = vpop.eup %4505 }
 0x558   : > { %v2070_v32 = vmul.f32 %v4506_v31, %v5012_v51 }
 0x55a   : > { %v2071_v33 = vpack.c.bf16 %v2070_v32, %v2070_v32 }
 0x55c   : > { %4256 = vmatmul.mubr.msk.bf16.vlgmr.msra.gmra.mrb[36].mxu0 %vm1196_vm3, %v2071_v33 }
 0x55d   : > { %4271 = vmatprep.mubr.msk.bf16.mxu0 %vm4560_vm2, %v4559_v17 }
 0x5b9   : > { %v1300_v34 = vpop.f32.mrb[8].mxu0 }
 0x5ba   : > { %1306 = vst.msk [vmem:[#allocation3] sm:$0xff] %vm1196_vm3, %v1300_v34  ;;  %v4173_v35 = vpop.f32.mrb[9].mxu0 }
 0x5bb   : > { %v1303_v36 = vpop.f32.mrb[10].mxu0  ;;  %v4452_v35 = vld [vmem:[%s4762_s3] sm:$0xff]  }
 0x5bc   : > { %v4174_v37 = vpop.f32.mrb[11].mxu0  ;;  %v4453_v36 = vld [vmem:[%s4762_s3 + $0x8] sm:$0xff]   ;;  %s5511_s3 = scalar_lea.vmem %s5434_s11, %s4713_s27 }
 0x5bd   : > { %v5109_v37 = vld [vmem:[%s5506_s2] sm:$0x1f]  }
 0x5c1   : > { %v1413_v38 = vpop.f32.mrb[12].mxu0 }
 0x5c2   : > { %1419 = vst.msk [vmem:[#allocation3 + $0x8] sm:$0xff] %vm1196_vm3, %v1413_v38  ;;  %v4185_v39 = vpop.f32.mrb[13].mxu0  ;;  %v4455_v38 = vld [vmem:[%s4753_s22] sm:$0xff]  }
 0x5c3   : > { %v1416_v40 = vpop.f32.mrb[14].mxu0  ;;  %4268 = vmatpush3.bf16.msra.mxu0 %v4455_v38  ;;  %v4456_v39 = vld [vmem:[%s4753_s22 + $0x8] sm:$0xff]   ;;  %s5507_s22 = sld [smem:[#allocation15_spill]] }
 0x5c4   : > { %v4186_v42 = vpop.f32.mrb[15].mxu0  ;;  %4269 = vmatprep.subr.bf16.mxu0 %v4559_v17 }
 0x5c7   : > { %4270 = vmatpush3.bf16.msra.mxu0 %v4456_v39 }
 0x5c8   : > { %4283 = vmatprep.subr.bf16.mxu0 %v4559_v17 }
 0x5c9   : > { %s5508_s30 = scalar_lea.vmem %s5507_s22, %s4713_s27  ;;  %s5512_s22 = sld [smem:[#allocation19_spill]] }
 0x5ee   : > { %v1526_v43 = vpop.f32.mrb[16].mxu0 }
 0x5ef   : > { %1533 = vrot.lane.b32.xlu0 %v1526_v43, %s4572_s8  ;;  %v4197_v45 = vpop.f32.mrb[17].mxu0 }
 0x5f0   : > { %v1529_v46 = vpop.f32.mrb[18].mxu0 }
 0x5f1   : > { %v4198_v47 = vpop.f32.mrb[19].mxu0 }
 0x5f6   : > { %v1644_v48 = vpop.f32.mrb[20].mxu0 }
 0x5f7   : > { %1651 = vrot.lane.b32.xlu1 %v1644_v48, %s4572_s8  ;;  %v4209_v49 = vpop.f32.mrb[21].mxu0 }
 0x5f8   : > { %v1647_v51 = vpop.f32.mrb[22].mxu0 }
 0x5f9   : > { %v4210_v52 = vpop.f32.mrb[23].mxu0  ;;  %v4000_v51 = vld [vmem:[%s5508_s30] ss:$0 sm:$0xff]  ;;  %s5513_s30 = scalar_lea.vmem %s5512_s22, %s4713_s27 }
 0x5fe   : > { %v1761_v50 = vpop.f32.mrb[24].mxu0 }
 0x5ff   : > { %1768 = vrot.lane.b32.xlu0 %v1761_v50, %s4573_s4  ;;  %v4221_v53 = vpop.f32.mrb[25].mxu0 }
 0x600   : > { %v1764_v54 = vpop.f32.mrb[26].mxu0 }
 0x601   : > { %v4222_v55 = vpop.f32.mrb[27].mxu0  ;;  %v4001_v54 = vld [vmem:[%s5509_s25] ss:$0 sm:$0xff] }
 0x606   : > { %v1879_v56 = vpop.f32.mrb[28].mxu0 }
 0x607   : > { %1886 = vrot.lane.b32.xlu1 %v1879_v56, %s4573_s4  ;;  %v4233_v57 = vpop.f32.mrb[29].mxu0 }
 0x608   : > { %v1882_v58 = vpop.f32.mrb[30].mxu0 }
 0x609   : > { %v4234_v59 = vpop.f32.mrb[31].mxu0 }
 0x60a   : > { %v4006_v59 = vld [vmem:[%s5510_s16] ss:$0 sm:$0xff] }
 0x623   : > { %v1996_v41 = vpop.f32.mrb[32].mxu0 }
 0x624   : > { %2003 = vrot.lane.b32.xlu0 %v1996_v41, %s4574_s14  ;;  %v4245_v60 = vpop.f32.mrb[33].mxu0 }
 0x625   : > { %v1999_v61 = vpop.f32.mrb[34].mxu0 }
 0x626   : > { %v4246_v63 = vpop.f32.mrb[35].mxu0 }
 0x62f   : > { %v2114_v0 = vpop.f32.mrb[36].mxu0 }
 0x630   : > { %2121 = vrot.lane.b32.xlu1 %v2114_v0, %s4574_s14  ;;  %v4257_v1 = vpop.f32.mrb[37].mxu0 }
 0x631   : > { %v2117_v4 = vpop.f32.mrb[38].mxu0 }
 0x632   : > { %v4258_v5 = vpop.f32.mrb[39].mxu0 }
 0x661   : > { %v1534_v6 = vpop.permute.xlu0 %1533 }
 0x662   : > { %1537 = vst.msk [vmem:[#allocation3] sm:$0xff] %vm1536_vm6, %v1534_v6 }
 0x669   : > { %v1652_v7 = vpop.permute.xlu1 %1651 }
 0x66a   : > { %1654 = vst.msk [vmem:[#allocation3 + $0x8] sm:$0xff] %vm1536_vm6, %v1652_v7 }
 0x671   : > { %v1769_v8 = vpop.permute.xlu0 %1768 }
 0x672   : > { %1772 = vst.msk [vmem:[#allocation3] sm:$0xff] %vm1771_vm7, %v1769_v8 }
 0x679   : > { %v1887_v10 = vpop.permute.xlu1 %1886 }
 0x67a   : > { %1889 = vst.msk [vmem:[#allocation3 + $0x8] sm:$0xff] %vm1771_vm7, %v1887_v10 }
 0x696   : > { %v2004_v11 = vpop.permute.xlu0 %2003 }
 0x697   : > { %2007 = vst.msk [vmem:[#allocation3] sm:$0xff] %vm2006_vm8, %v2004_v11  ;;  %v4002_v11 = vld [vmem:[%s5511_s3] ss:$0 sm:$0xff] }
 0x69e   : > { %v2125_v12 = vld [vmem:[#allocation3] sm:$0xff] }
 0x6a2   : > { %v2122_v9 = vpop.permute.xlu1 %2121 }
 0x6a3   : > { %2124 = vst.msk [vmem:[#allocation3 + $0x8] sm:$0xff] %vm2006_vm8, %v2122_v9 }
 0x6aa   : > { %v2126_v13 = vld [vmem:[#allocation3 + $0x8] sm:$0xff] }
 0x6ab   : > { %v2131_v14 = vpack.c.bf16 %v2126_v13, %v2125_v12 }
 0x6ad   : > { %4264 = vmatmul.mubr.msk.bf16.vlgmr.msra.gmra.mrb[28].mxu1 %vm1075_vm1, %v2131_v14 }
 0x6ae   : > { %4279 = vmatprep.mubr.msk.bf16.mxu1 %vm4560_vm2, %v4559_v17  ;;  %4276 = vmatpush3.bf16.msra.mxu1 %v4452_v35 }
 0x6af   : > { %4277 = vmatprep.subr.bf16.mxu1 %v4559_v17 }
 0x6b2   : > { %4278 = vmatpush3.bf16.msra.mxu1 %v4453_v36 }
 0x6b3   : > { %4291 = vmatprep.subr.bf16.mxu1 %v4559_v17 }
 0x6b5   : > { %4280 = vmatmul.mubr.msk.bf16.vlgmr.msra.gmra.mrb[32].mxu1 %vm1075_vm1, %v5109_v37 }
 0x6b6   : > { %4293 = vmatprep.mubr.msk.bf16.mxu1 %vm4560_vm2, %v4559_v17 }
 0x780   : > { %v2181_v15 = vpop.f32.mrb[28].mxu1 }
 0x781   : > { %v2188_v19 = vadd.f32 %v2181_v15, %v4820_v2  ;;  %v4265_v18 = vpop.f32.mrb[29].mxu1 }
 0x782   : > { %v2184_v20 = vpop.f32.mrb[30].mxu1 }
 0x783   : > { %v5090_v21 = vadd.f32 %v3999_v16, %v2188_v19  ;;  %v2189_v22 = vadd.f32 %v2184_v20, %v4822_v3  ;;  %v4266_v23 = vpop.f32.mrb[31].mxu1 }
 0x785   : > { %v5093_v24 = vadd.f32 %v3999_v16, %v2189_v22  ;;  %v2201_v25 = vsel %vm1075_vm1, %v5090_v21, 0.0 }
 0x786   : > { %2202 = vadd.xlane.f32.xlu0 %v2201_v25  ;;  %v4457_v25 = vld [vmem:[%s4771_s24] sm:$0xff]  }
 0x787   : > { %v2204_v26 = vsel %vm1075_vm1, %v5093_v24, 0.0 }
 0x788   : > { %2205 = vadd.xlane.f32.xlu1 %v2204_v26  ;;  %v2376_v41 = vpop.f32.mrb[32].mxu1  ;;  %v4458_v26 = vld [vmem:[%s4771_s24 + $0x8] sm:$0xff]  }
 0x789   : > { %v2377_v44 = vadd.f32 %v4006_v59, %v2376_v41  ;;  %v4281_v60 = vpop.f32.mrb[33].mxu1 }
 0x78a   : > { %v2379_v61 = vpop.f32.mrb[34].mxu1 }
 0x78b   : > { %v2448_v62 = vpack.c.bf16 %v2377_v44, %v2377_v44  ;;  %v2380_v63 = vadd.f32 %v4006_v59, %v2379_v61  ;;  %v4282_v0 = vpop.f32.mrb[35].mxu1 }
 0x78d   : > { %v2562_v1 = vpack.c.bf16 %v2380_v63, %v2377_v44  ;;  %v2454_v4 = vsel %vm1196_vm3, %v2448_v62, 0 }
 0x78e   : > { %4292 = vmatpush3.bf16.xpose.msra.mxu1 %v2454_v4 }
 0x78f   : > { %v2565_v5 = vshrl.u32 %v2562_v1, 16  ;;  %v2568_v6 = vshll.u32 %v2562_v1, 16  ;;  %4303 = vmatprep.subr.bf16.mxu1 %v4559_v17 }
 0x791   : > { %v2567_v7 = vrot.slane %v2565_v5, 2  ;;  %v2570_v8 = vrot.slane %v2568_v6, 3 }
 0x793   : > { %v2571_v10 = vor.u32 %v2570_v8, %v2567_v7 }
 0x795   : > { %v2576_v19 = vsel %vm1196_vm3, %v2571_v10, 0 }
 0x813   : > { %v2203_v2 = vpop.xlane.xlu0 %2202 }
 0x814   : > { %v2207_v27 = vmul.f32 0.03125, %v2203_v2 }
 0x815   : > { %v2206_v28 = vpop.xlane.xlu1 %2205 }
 0x816   : > { %v2209_v29 = vsub.f32 %v5090_v21, %v2207_v27  ;;  %v2208_v30 = vmul.f32 0.03125, %v2206_v28 }
 0x818   : > { %v2210_v3 = vsub.f32 %v5093_v24, %v2208_v30  ;;  %v2211_v31 = vmul.f32 %v2209_v29, %v2209_v29 }
 0x81a   : > { %v2213_v32 = vsel %vm1075_vm1, %v2211_v31, 0.0  ;;  %v2212_v33 = vmul.f32 %v2210_v3, %v2210_v3 }
 0x81b   : > { %2214 = vadd.xlane.f32.xlu0 %v2213_v32 }
 0x81c   : > { %v2216_v34 = vsel %vm1075_vm1, %v2212_v33, 0.0 }
 0x81f   : > { %2217 = vadd.xlane.f32.xlu0 %v2216_v34 }
 0x835   : > { %2690 = vrot.lane.b32.xlu0 %v2448_v62, %s4564_s10 }
 0x839   : > { %2924 = vrot.lane.b32.xlu0 %v2448_v62, %s4566_s26 }
 0x83d   : > { %3040 = vrot.lane.b32.xlu0 %v2571_v10, %s4566_s26 }
 0x841   : > { %3156 = vrot.lane.b32.xlu0 %v2448_v62, %s4567_s20  ;;  %v4575_v62 = vmov 65535  }
 0x842   : > { %v2515_v63 = vsel %vm2513_vm10, 4294967295, %v4575_v62 }
 0x843   : > { %v5218_v0 = vsel %vm2514_vm11, %v2515_v63, 0 }
 0x845   : > { %3272 = vrot.lane.b32.xlu0 %v2571_v10, %s4567_s20 }
 0x8a8   : > { %v2215_v40 = vpop.xlane.xlu0 %2214 }
 0x8a9   : > { %v2219_v42 = vmul.f32 0.03125, %v2215_v40 }
 0x8ab   : > { %v2221_v43 = vadd.f32 1e-05, %v2219_v42 }
 0x8ac   : > { %v2218_v45 = vpop.xlane.xlu0 %2217 }
 0x8ad   : > { %4507 = vrsqrt.f32 %v2221_v43  ;;  %v2220_v46 = vmul.f32 0.03125, %v2218_v45 }
 0x8af   : > { %v2222_v47 = vadd.f32 1e-05, %v2220_v46 }
 0x8b0   : > { %v2691_v20 = vpop.permute.xlu0 %2690 }
 0x8b1   : > { %4509 = vrsqrt.f32 %v2222_v47  ;;  %v2696_v23 = vsel %vm1196_vm3, %v2691_v20, 0 }
 0x8b7   : > { %v4508_v48 = vpop.eup %4507 }
 0x8b8   : > { %v2225_v49 = vmul.f32 %v4508_v48, %v2209_v29  ;;  %v2925_v29 = vpop.permute.xlu0 %2924 }
 0x8ba   : > { %v2233_v50 = vmul.f32 %v4000_v51, %v2225_v49 }
 0x8bb   : > { %v4510_v52 = vpop.eup %4509 }
 0x8bc   : > { %v2226_v53 = vmul.f32 %v4510_v52, %v2210_v3  ;;  %v2241_v56 = vadd.f32 %v4001_v54, %v2233_v50  ;;  %v2930_v3 = vsel %vm1196_vm3, %v2925_v29, 0  ;;  %v3041_v31 = vpop.permute.xlu0 %3040 }
 0x8bd   : > { %v3046_v33 = vsel %vm1196_vm3, %v3041_v31, 0 }
 0x8be   : > { %v2234_v55 = vmul.f32 %v4000_v51, %v2226_v53 }
 0x8c0   : > { %v2242_v57 = vadd.f32 %v4001_v54, %v2234_v55  ;;  %v3157_v34 = vpop.permute.xlu0 %3156  ;;  %v4011_v55 = vld [vmem:[%s5513_s30] ss:$0 sm:$0xff] }
 0x8c1   : > { %v3162_v36 = vsel %vm1196_vm3, %v3157_v34, 0 }
 0x8c2   : > { %v2247_v58 = vpack.c.bf16 %v2242_v57, %v2241_v56 }
 0x8c4   : > { %4272 = vmatmul.mubr.msk.bf16.vlgmr.msra.gmra.mrb[40].mxu0 %vm1075_vm1, %v2247_v58 }
 0x8c5   : > { %4287 = vmatprep.mubr.msk.bf16.mxu0 %vm4560_vm2, %v4559_v17  ;;  %4284 = vmatpush3.bf16.msra.mxu0 %v4457_v25 }
 0x8c6   : > { %4285 = vmatprep.subr.bf16.mxu0 %v4559_v17 }
 0x8c9   : > { %4286 = vmatpush3.bf16.msra.mxu0 %v4458_v26 }
 0x8ca   : > { %4297 = vmatprep.subr.bf16.mxu0 %v4559_v17 }
 0x8cc   : > { %4288 = vmatmul.mubr.msk.bf16.vlgmr.msra.gmra.mrb[44].mxu0 %vm1075_vm1, %v5109_v37  ;;  %v3273_v37 = vpop.permute.xlu0 %3272 }
 0x8cd   : > { %4299 = vmatprep.mubr.msk.bf16.mxu0 %vm4560_vm2, %v4559_v17  ;;  %v3278_v39 = vsel %vm1196_vm3, %v3273_v37, 0 }
 0x997   : > { %v2304_v9 = vpop.f32.mrb[40].mxu0 }
 0x998   : > { %v2305_v12 = vadd.f32 %v4002_v11, %v2304_v9  ;;  %v4273_v13 = vpop.f32.mrb[41].mxu0 }
 0x999   : > { %v2307_v14 = vpop.f32.mrb[42].mxu0 }
 0x99a   : > { %v2447_v15 = vpack.c.bf16 %v2305_v12, %v2305_v12  ;;  %v4274_v16 = vpop.f32.mrb[43].mxu0  ;;  %v2308_v18 = vadd.f32 %v4002_v11, %v2307_v14 }
 0x99c   : > { %2687 = vrot.lane.b32.xlu1 %v2447_v15, %s4564_s10  ;;  %4294 = vmatmul.mubr.msk.bf16.vlgmr.msra.gmra.mrb[36].mxu1 %vm1196_vm3, %v2447_v15  ;;  %v2561_v22 = vpack.c.bf16 %v2308_v18, %v2308_v18 }
 0x99d   : > { %4304 = vmatpush3.bf16.xpose.msra.mxu1 %v2576_v19  ;;  %4305 = vmatprep.mubr.msk.bf16.mxu1 %vm4560_vm2, %v4559_v17 }
 0x99e   : > { %4315 = vmatprep.subr.bf16.mxu1 %v4559_v17 }
 0x99f   : > { %v2440_v56 = vpop.f32.mrb[44].mxu0 }
 0x9a0   : > { %2808 = vrot.lane.b32.xlu1 %v2571_v10, %s4564_s10  ;;  %v2441_v57 = vadd.f32 %v4011_v55, %v2440_v56  ;;  %v4289_v58 = vpop.f32.mrb[45].mxu0 }
 0x9a1   : > { %v2443_v59 = vpop.f32.mrb[46].mxu0 }
 0x9a2   : > { %v2444_v41 = vadd.f32 %v4011_v55, %v2443_v59  ;;  %v4290_v44 = vpop.f32.mrb[47].mxu0  ;;  %v5216_v61 = vpack.c.bf16 %v2441_v57, %v2441_v57 }
 0x9a4   : > { %2806 = vrot.lane.b32.xlu1 %v2561_v22, %s4564_s10  ;;  %4306 = vmatmul.mubr.msk.bf16.vlgmr.msra.gmra.mrb[40].mxu1 %vm1196_vm3, %v2561_v22  ;;  %v2563_v60 = vpack.c.bf16 %v2444_v41, %v2441_v57  ;;  %v2518_v1 = vand.u32 %v5218_v0, %v5216_v61 }
 0x9a5   : > { %4316 = vmatpush3.bf16.xpose.msra.mxu1 %v2696_v23  ;;  %4317 = vmatprep.mubr.msk.bf16.mxu1 %vm4560_vm2, %v4559_v17 }
 0x9a6   : > { %4327 = vmatprep.subr.bf16.mxu1 %v4559_v17  ;;  %4298 = vmatpush3.bf16.msra.mxu0 %v2518_v1 }
 0x9a7   : > { %4309 = vmatprep.subr.bf16.mxu0 %v4559_v17 }
 0x9a8   : > { %2922 = vrot.lane.b32.xlu1 %v2447_v15, %s4566_s26 }
 0x9ac   : > { %3038 = vrot.lane.b32.xlu1 %v2561_v22, %s4566_s26 }
 0x9b0   : > { %3154 = vrot.lane.b32.xlu1 %v2447_v15, %s4567_s20 }
 0x9b4   : > { %3270 = vrot.lane.b32.xlu1 %v2561_v22, %s4567_s20 }
 0xa0e   : > { %v2688_v2 = vpop.permute.xlu1 %2687 }
 0xa0f   : > { %4318 = vmatmul.mubr.msk.bf16.vlgmr.msra.gmra.mrb[44].mxu1 %vm1196_vm3, %v2688_v2 }
 0xa10   : > { %4329 = vmatprep.mubr.msk.bf16.mxu1 %vm4560_vm2, %v4559_v17 }
 0xa12   : > { %v2809_v27 = vpop.permute.xlu1 %2808 }
 0xa13   : > { %v2814_v28 = vsel %vm1196_vm3, %v2809_v27, 0 }
 0xa14   : > { %4328 = vmatpush3.bf16.xpose.msra.mxu1 %v2814_v28 }
 0xa15   : > { %4339 = vmatprep.subr.bf16.mxu1 %v4559_v17 }
 0xa16   : > { %v2807_v30 = vpop.permute.xlu1 %2806 }
 0xa1a   : > { %v2923_v32 = vpop.permute.xlu1 %2922 }
 0xa1b   : > { %4330 = vmatmul.mubr.msk.bf16.vlgmr.msra.gmra.mrb[48].mxu1 %vm1196_vm3, %v2807_v30 }
 0xa1c   : > { %4340 = vmatpush3.bf16.xpose.msra.mxu1 %v2930_v3  ;;  %4341 = vmatprep.mubr.msk.bf16.mxu1 %vm4560_vm2, %v4559_v17 }
 0xa1d   : > { %4351 = vmatprep.subr.bf16.mxu1 %v4559_v17 }
 0xa1e   : > { %v3039_v35 = vpop.permute.xlu1 %3038 }
 0xa22   : > { %v3155_v38 = vpop.permute.xlu1 %3154 }
 0xa23   : > { %4342 = vmatmul.mubr.msk.bf16.vlgmr.msra.gmra.mrb[52].mxu1 %vm1196_vm3, %v2923_v32 }
 0xa24   : > { %4352 = vmatpush3.bf16.xpose.msra.mxu1 %v3046_v33  ;;  %4353 = vmatprep.mubr.msk.bf16.mxu1 %vm4560_vm2, %v4559_v17 }
 0xa25   : > { %4363 = vmatprep.subr.bf16.mxu1 %v4559_v17 }
 0xa26   : > { %v3271_v40 = vpop.permute.xlu1 %3270 }
 0xa2b   : > { %4354 = vmatmul.mubr.msk.bf16.vlgmr.msra.gmra.mrb[56].mxu1 %vm1196_vm3, %v3039_v35 }
 0xa2c   : > { %4364 = vmatpush3.bf16.xpose.msra.mxu1 %v3162_v36  ;;  %4365 = vmatprep.mubr.msk.bf16.mxu1 %vm4560_vm2, %v4559_v17 }
 0xa2d   : > { %4375 = vmatprep.subr.bf16.mxu1 %v4559_v17 }
 0xa33   : > { %4366 = vmatmul.mubr.msk.bf16.vlgmr.msra.gmra.mrb[60].mxu1 %vm1196_vm3, %v3155_v38 }
 0xa34   : > { %4376 = vmatpush3.bf16.xpose.msra.mxu1 %v3278_v39  ;;  %4377 = vmatprep.mubr.msk.bf16.mxu1 %vm4560_vm2, %v4559_v17 }
 0xa35   : > { %4387 = vmatprep.subr.bf16.mxu1 %v4559_v17 }
 0xa3b   : > { %4378 = vmatmul.mubr.msk.bf16.vlgmr.msra.gmra.mrb[64].mxu1 %vm1196_vm3, %v3271_v40 }
 0xa3c   : > { %4391 = vmatprep.mubr.msk.bf16.mxu1 %vm4560_vm2, %v4559_v17 }
 0xa6f   : > { %v2490_v42 = vpop.f32.mrb[36].mxu1 }
 0xa70   : > { %v5203_v43 = vmul.f32 0.35355338, %v2490_v42  ;;  %v4295_v45 = vpop.f32.mrb[37].mxu1  ;;  %v2632_v42 = vshrl.u32 %v2563_v60, 16 }
 0xa71   : > { %v2493_v46 = vpop.f32.mrb[38].mxu1  ;;  %v2635_v45 = vshll.u32 %v2563_v60, 16 }
 0xa72   : > { %v4296_v47 = vpop.f32.mrb[39].mxu1  ;;  %v2498_v48 = vsel %vm2497_vm9, %v5203_v43, -inf  ;;  %v2634_v46 = vrot.slane %v2632_v42, 2 }
 0xa73   : > { %2499 = vmax.xlane.f32.xlu0 %v2498_v48  ;;  %v2637_v47 = vrot.slane %v2635_v45, 3 }
 0xa75   : > { %v5235_v48 = vor.u32 %v2637_v47, %v2634_v46 }
 0xa77   : > { %v2612_v49 = vpop.f32.mrb[40].mxu1 }
 0xa78   : > { %v5207_v51 = vmul.f32 0.35355338, %v2612_v49  ;;  %v4307_v52 = vpop.f32.mrb[41].mxu1 }
 0xa79   : > { %v2615_v50 = vpop.f32.mrb[42].mxu1 }
 0xa7a   : > { %v4308_v53 = vpop.f32.mrb[43].mxu1  ;;  %v2619_v54 = vsel %vm2497_vm9, %v5207_v51, -inf }
 0xa7b   : > { %2620 = vmax.xlane.f32.xlu1 %v2619_v54 }
 0xae2   : > { %v2732_v4 = vpop.f32.mrb[44].mxu1 }
 0xae3   : > { %v5223_v5 = vmul.f32 0.35355338, %v2732_v4  ;;  %v4319_v6 = vpop.f32.mrb[45].mxu1 }
 0xae4   : > { %v2735_v7 = vpop.f32.mrb[46].mxu1 }
 0xae5   : > { %v4320_v8 = vpop.f32.mrb[47].mxu1  ;;  %v2739_v10 = vsel %vm2497_vm9, %v5223_v5, -inf }
 0xae6   : > { %2740 = vmax.xlane.f32.xlu0 %v2739_v10 }
 0xaee   : > { %v2850_v11 = vpop.f32.mrb[48].mxu1 }
 0xaef   : > { %v2856_v9 = vmul.f32 0.35355338, %v2850_v11  ;;  %v4331_v12 = vpop.f32.mrb[49].mxu1 }
 0xaf0   : > { %v2853_v13 = vpop.f32.mrb[50].mxu1 }
 0xaf1   : > { %v4332_v14 = vpop.f32.mrb[51].mxu1  ;;  %v2857_v15 = vsel %vm2497_vm9, %v2856_v9, -inf }
 0xaf2   : > { %2858 = vmax.xlane.f32.xlu0 %v2857_v15 }
 0xaf6   : > { %v2966_v16 = vpop.f32.mrb[52].mxu1 }
 0xaf7   : > { %v2972_v19 = vmul.f32 0.35355338, %v2966_v16  ;;  %v4343_v18 = vpop.f32.mrb[53].mxu1 }
 0xaf8   : > { %v2969_v20 = vpop.f32.mrb[54].mxu1 }
 0xaf9   : > { %v4344_v22 = vpop.f32.mrb[55].mxu1  ;;  %v2973_v23 = vsel %vm2497_vm9, %v2972_v19, -inf }
 0xafa   : > { %2974 = vmax.xlane.f32.xlu0 %v2973_v23 }
 0xafe   : > { %v3082_v25 = vpop.f32.mrb[56].mxu1 }
 0xaff   : > { %v5229_v26 = vmul.f32 0.35355338, %v3082_v25  ;;  %v4355_v2 = vpop.f32.mrb[57].mxu1 }
 0xb00   : > { %v3085_v27 = vpop.f32.mrb[58].mxu1  ;;  %v2500_v49 = vpop.xlane.xlu0 %2499 }
 0xb01   : > { %v4356_v28 = vpop.f32.mrb[59].mxu1  ;;  %v3089_v29 = vsel %vm2497_vm9, %v5229_v26, -inf  ;;  %v2501_v52 = vsub.f32 %v5203_v43, %v2500_v49 }
 0xb02   : > { %3090 = vmax.xlane.f32.xlu1 %v3089_v29 }
 0xb03   : > { %v2502_v50 = vmul.f32 1.442695, %v2501_v52 }
 0xb05   : > { %4511 = vpow2.f32 %v2502_v50 }
 0xb06   : > { %v3198_v30 = vpop.f32.mrb[60].mxu1 }
 0xb07   : > { %v3204_v3 = vmul.f32 0.35355338, %v3198_v30  ;;  %v4367_v31 = vpop.f32.mrb[61].mxu1 }
 0xb08   : > { %v3201_v32 = vpop.f32.mrb[62].mxu1  ;;  %v2621_v53 = vpop.xlane.xlu1 %2620 }
 0xb09   : > { %v4368_v33 = vpop.f32.mrb[63].mxu1  ;;  %v3205_v34 = vsel %vm2497_vm9, %v3204_v3, -inf  ;;  %v2622_v54 = vsub.f32 %v5207_v51, %v2621_v53 }
 0xb0a   : > { %3206 = vmax.xlane.f32.xlu0 %v3205_v34  ;;  %v2643_v34 = vand.u32 %v5235_v48, %v5218_v0 }
 0xb0b   : > { %v2623_v55 = vmul.f32 1.442695, %v2622_v54 }
 0xb0d   : > { %4513 = vpow2.f32 %v2623_v55 }
 0xb0e   : > { %v3314_v35 = vpop.f32.mrb[64].mxu1 }
 0xb0f   : > { %v3320_v36 = vmul.f32 0.35355338, %v3314_v35  ;;  %v4379_v37 = vpop.f32.mrb[65].mxu1  ;;  %v4512_v56 = vpop.eup %4511 }
 0xb10   : > { %v3317_v38 = vpop.f32.mrb[66].mxu1  ;;  %v2504_v57 = vsel %vm2497_vm9, %v4512_v56, 0.0 }
 0xb11   : > { %v4380_v39 = vpop.f32.mrb[67].mxu1  ;;  %v3321_v40 = vsel %vm2497_vm9, %v3320_v36, -inf }
 0xb12   : > { %3322 = vmax.xlane.f32.xlu1 %v3321_v40 }
 0xb17   : > { %v5244_v58 = vpop.eup %4513 }
 0xb18   : > { %v2625_v59 = vsel %vm2497_vm9, %v5244_v58, 0.0 }
 0xb20   : > { %2869 = vrot.lane.b32.xlu0 %v5235_v48, %s4564_s10 }
 0xb23   : > { %2752 = vrot.lane.b32.xlu1 %v5216_v61, %s4564_s10  ;;  %s5514_s10 = sld [smem:[#allocation6_spill]] }
 0xb3f   : > { %2505 = vadd.xlane.f32.xlu0 %v2504_v57 }
 0xb47   : > { %2626 = vadd.xlane.f32.xlu1 %v2625_v59 }
 0xb73   : > { %v2741_v41 = vpop.xlane.xlu0 %2740 }
 0xb74   : > { %v2742_v43 = vsub.f32 %v5223_v5, %v2741_v41 }
 0xb76   : > { %v2743_v44 = vmul.f32 1.442695, %v2742_v43 }
 0xb78   : > { %4515 = vpow2.f32 %v2743_v44 }
 0xb7f   : > { %v2859_v60 = vpop.xlane.xlu0 %2858 }
 0xb80   : > { %v2860_v62 = vsub.f32 %v2856_v9, %v2859_v60 }
 0xb82   : > { %v5249_v51 = vpop.eup %4515  ;;  %v2861_v63 = vmul.f32 1.442695, %v2860_v62 }
 0xb83   : > { %v2745_v1 = vsel %vm2497_vm9, %v5249_v51, 0.0 }
 0xb84   : > { %4517 = vpow2.f32 %v2861_v63  ;;  %2746 = vadd.xlane.f32.xlu0 %v2745_v1 }
 0xb87   : > { %v2975_v4 = vpop.xlane.xlu0 %2974 }
 0xb88   : > { %v2976_v6 = vsub.f32 %v2972_v19, %v2975_v4 }
 0xb8a   : > { %v2977_v7 = vmul.f32 1.442695, %v2976_v6 }
 0xb8c   : > { %4519 = vpow2.f32 %v2977_v7 }
 0xb8e   : > { %v5253_v8 = vpop.eup %4517 }
 0xb8f   : > { %v2863_v5 = vsel %vm2497_vm9, %v5253_v8, 0.0  ;;  %v3091_v14 = vpop.xlane.xlu1 %3090 }
 0xb90   : > { %2864 = vadd.xlane.f32.xlu1 %v2863_v5  ;;  %v3092_v15 = vsub.f32 %v5229_v26, %v3091_v14 }
 0xb92   : > { %v3093_v19 = vmul.f32 1.442695, %v3092_v15 }
 0xb96   : > { %v5257_v10 = vpop.eup %4519 }
 0xb97   : > { %v2979_v11 = vsel %vm2497_vm9, %v5257_v10, 0.0  ;;  %v3207_v9 = vpop.xlane.xlu0 %3206 }
 0xb98   : > { %2980 = vadd.xlane.f32.xlu0 %v2979_v11  ;;  %v3208_v12 = vsub.f32 %v3204_v3, %v3207_v9 }
 0xb9a   : > { %v3209_v13 = vmul.f32 1.442695, %v3208_v12 }
 0xb9b   : > { %v2870_v25 = vpop.permute.xlu0 %2869 }
 0xb9c   : > { %4521 = vpow2.f32 %v3209_v13  ;;  %v2875_v47 = vand.u32 %v2870_v25, %v5218_v0 }
 0xb9d   : > { %4523 = vpow2.f32 %v3093_v19 }
 0xb9f   : > { %v3323_v16 = vpop.xlane.xlu1 %3322 }
 0xba0   : > { %v3324_v18 = vsub.f32 %v3320_v36, %v3323_v16 }
 0xba1   : > { %3101 = vrot.lane.b32.xlu1 %v5235_v48, %s4566_s26 }
 0xba2   : > { %v3325_v20 = vmul.f32 1.442695, %v3324_v18 }
 0xba3   : > { %v2753_v29 = vpop.permute.xlu1 %2752 }
 0xba4   : > { %4525 = vpow2.f32 %v3325_v20  ;;  %v2758_v38 = vand.u32 %v2753_v29, %v5218_v0 }
 0xba6   : > { %v5266_v22 = vpop.eup %4521 }
 0xba7   : > { %v3211_v23 = vsel %vm2497_vm9, %v5266_v22, 0.0  ;;  %v5270_v2 = vpop.eup %4523 }
 0xba8   : > { %v3095_v26 = vsel %vm2497_vm9, %v5270_v2, 0.0 }
 0xbae   : > { %2985 = vrot.lane.b32.xlu0 %v5216_v61, %s4566_s26  ;;  %v5274_v28 = vpop.eup %4525 }
 0xbaf   : > { %v3327_v30 = vsel %vm2497_vm9, %v5274_v28, 0.0 }
 0xbc5   : > { %3212 = vadd.xlane.f32.xlu1 %v3211_v23 }
 0xbcc   : > { %v2506_v27 = vpop.xlane.xlu0 %2505 }
 0xbcd   : > { %4527 = vrcp.f32 %v2506_v27  ;;  %3096 = vadd.xlane.f32.xlu0 %v3095_v26 }
 0xbd1   : > { %3328 = vadd.xlane.f32.xlu0 %v3327_v30 }
 0xbd4   : > { %v2627_v3 = vpop.xlane.xlu1 %2626 }
 0xbd5   : > { %4529 = vrcp.f32 %v2627_v3 }
 0xbd6   : > { %3333 = vrot.lane.b32.xlu1 %v5235_v48, %s4567_s20 }
 0xbd7   : > { %v4528_v31 = vpop.eup %4527 }
 0xbd8   : > { %v2508_v32 = vmul.f32 %v4528_v31, %v4512_v56 }
 0xbda   : > { %v2509_v33 = vpack.c.bf16 %v2508_v32, %v2508_v32 }
 0xbdc   : > { %4300 = vmatmul.mubr.msk.bf16.vlgmr.msra.gmra.mrb[48].mxu0 %vm2497_vm9, %v2509_v33 }
 0xbdd   : > { %4310 = vmatpush3.bf16.msra.mxu0 %v2643_v34  ;;  %4311 = vmatprep.mubr.msk.bf16.mxu0 %vm4560_vm2, %v4559_v17 }
 0xbde   : > { %4321 = vmatprep.subr.bf16.mxu0 %v4559_v17 }
 0xbdf   : > { %v4530_v35 = vpop.eup %4529 }
 0xbe0   : > { %v2629_v36 = vmul.f32 %v4530_v35, %v5244_v58  ;;  %v4459_v35 = vld [vmem:[%s5514_s10] sm:$0xff]  }
 0xbe1   : > { %4388 = vmatpush3.bf16.msra.mxu1 %v4459_v35  ;;  %v4467_v35 = vld [vmem:[%s4807_s17 + $0x20] sm:$0xff]  }
 0xbe2   : > { %v2630_v37 = vpack.c.bf16 %v2629_v36, %v2629_v36  ;;  %v4460_v36 = vld [vmem:[%s5514_s10 + $0x8] sm:$0xff]   ;;  %4389 = vmatprep.subr.bf16.mxu1 %v4559_v17 }
 0xbe4   : > { %4312 = vmatmul.mubr.msk.bf16.vlgmr.msra.gmra.mrb[52].mxu0 %vm2497_vm9, %v2630_v37 }
 0xbe5   : > { %4322 = vmatpush3.bf16.msra.mxu0 %v2758_v38  ;;  %4323 = vmatprep.mubr.msk.bf16.mxu0 %vm4560_vm2, %v4559_v17 }
 0xbe6   : > { %4333 = vmatprep.subr.bf16.mxu0 %v4559_v17  ;;  %4390 = vmatpush3.bf16.msra.mxu1 %v4460_v36  ;;  %v4468_v36 = vld [vmem:[%s4807_s17 + $0x28] sm:$0xff]  }
 0xbe7   : > { %3217 = vrot.lane.b32.xlu0 %v5216_v61, %s4567_s20  ;;  %4403 = vmatprep.subr.bf16.mxu1 %v4559_v17 }
 0xc11   : > { %v2747_v39 = vpop.xlane.xlu0 %2746 }
 0xc12   : > { %4531 = vrcp.f32 %v2747_v39 }
 0xc1c   : > { %v4532_v40 = vpop.eup %4531 }
 0xc1d   : > { %v2749_v42 = vmul.f32 %v4532_v40, %v5249_v51  ;;  %v2865_v45 = vpop.xlane.xlu1 %2864 }
 0xc1e   : > { %4533 = vrcp.f32 %v2865_v45 }
 0xc1f   : > { %v2750_v46 = vpack.c.bf16 %v2749_v42, %v2749_v42 }
 0xc21   : > { %4324 = vmatmul.mubr.msk.bf16.vlgmr.msra.gmra.mrb[56].mxu0 %vm2497_vm9, %v2750_v46  ;;  %v3102_v55 = vpop.permute.xlu1 %3101 }
 0xc22   : > { %4334 = vmatpush3.bf16.msra.mxu0 %v2875_v47  ;;  %4335 = vmatprep.mubr.msk.bf16.mxu0 %vm4560_vm2, %v4559_v17  ;;  %v3107_v58 = vand.u32 %v3102_v55, %v5218_v0 }
 0xc23   : > { %4345 = vmatprep.subr.bf16.mxu0 %v4559_v17 }
 0xc25   : > { %v2981_v48 = vpop.xlane.xlu0 %2980 }
 0xc26   : > { %4535 = vrcp.f32 %v2981_v48 }
 0xc28   : > { %v4534_v61 = vpop.eup %4533 }
 0xc29   : > { %v2867_v49 = vmul.f32 %v4534_v61, %v5253_v8  ;;  %v2986_v52 = vpop.permute.xlu0 %2985 }
 0xc2a   : > { %v2991_v50 = vand.u32 %v2986_v52, %v5218_v0 }
 0xc2b   : > { %v2868_v53 = vpack.c.bf16 %v2867_v49, %v2867_v49 }
 0xc2d   : > { %4336 = vmatmul.mubr.msk.bf16.vlgmr.msra.gmra.mrb[60].mxu0 %vm2497_vm9, %v2868_v53 }
 0xc2e   : > { %4346 = vmatpush3.bf16.msra.mxu0 %v2991_v50  ;;  %4347 = vmatprep.mubr.msk.bf16.mxu0 %vm4560_vm2, %v4559_v17 }
 0xc2f   : > { %4357 = vmatprep.subr.bf16.mxu0 %v4559_v17 }
 0xc30   : > { %v4536_v54 = vpop.eup %4535 }
 0xc31   : > { %v2983_v56 = vmul.f32 %v4536_v54, %v5257_v10 }
 0xc33   : > { %v2984_v57 = vpack.c.bf16 %v2983_v56, %v2983_v56 }
 0xc35   : > { %4348 = vmatmul.mubr.msk.bf16.vlgmr.msra.gmra.mrb[64].mxu0 %vm2497_vm9, %v2984_v57 }
 0xc36   : > { %4358 = vmatpush3.bf16.msra.mxu0 %v3107_v58  ;;  %4359 = vmatprep.mubr.msk.bf16.mxu0 %vm4560_vm2, %v4559_v17 }
 0xc37   : > { %4369 = vmatprep.subr.bf16.mxu0 %v4559_v17 }
 0xc52   : > { %v3213_v41 = vpop.xlane.xlu1 %3212 }
 0xc56   : > { %v3334_v6 = vpop.permute.xlu1 %3333 }
 0xc57   : > { %v3339_v5 = vand.u32 %v3334_v6, %v5218_v0 }
 0xc5a   : > { %v3097_v59 = vpop.xlane.xlu0 %3096 }
 0xc5b   : > { %4537 = vrcp.f32 %v3097_v59 }
 0xc5c   : > { %4539 = vrcp.f32 %v3213_v41 }
 0xc5e   : > { %v3329_v43 = vpop.xlane.xlu0 %3328 }
 0xc5f   : > { %4541 = vrcp.f32 %v3329_v43 }
 0xc62   : > { %v3218_v62 = vpop.permute.xlu0 %3217 }
 0xc63   : > { %v3223_v1 = vand.u32 %v3218_v62, %v5218_v0 }
 0xc65   : > { %v4538_v44 = vpop.eup %4537 }
 0xc66   : > { %v3099_v60 = vmul.f32 %v4538_v44, %v5270_v2  ;;  %v4540_v63 = vpop.eup %4539 }
 0xc67   : > { %v3215_v4 = vmul.f32 %v4540_v63, %v5266_v22 }
 0xc68   : > { %v3100_v51 = vpack.c.bf16 %v3099_v60, %v3099_v60 }
 0xc69   : > { %v3216_v7 = vpack.c.bf16 %v3215_v4, %v3215_v4  ;;  %v4542_v8 = vpop.eup %4541 }
 0xc6a   : > { %4360 = vmatmul.mubr.msk.bf16.vlgmr.msra.gmra.mrb[68].mxu0 %vm2497_vm9, %v3100_v51  ;;  %v3331_v10 = vmul.f32 %v4542_v8, %v5274_v28 }
 0xc6b   : > { %4370 = vmatpush3.bf16.msra.mxu0 %v3223_v1  ;;  %4371 = vmatprep.mubr.msk.bf16.mxu0 %vm4560_vm2, %v4559_v17 }
 0xc6c   : > { %4381 = vmatprep.subr.bf16.mxu0 %v4559_v17  ;;  %v3332_v11 = vpack.c.bf16 %v3331_v10, %v3331_v10 }
 0xc72   : > { %4372 = vmatmul.mubr.msk.bf16.vlgmr.msra.gmra.mrb[72].mxu0 %vm2497_vm9, %v3216_v7 }
 0xc73   : > { %4382 = vmatpush3.bf16.msra.mxu0 %v3339_v5  ;;  %4383 = vmatprep.mubr.msk.bf16.mxu0 %vm4560_vm2, %v4559_v17 }
 0xc74   : > { %4395 = vmatprep.subr.bf16.mxu0 %v4559_v17 }
 0xc7a   : > { %4384 = vmatmul.mubr.msk.bf16.vlgmr.msra.gmra.mrb[76].mxu0 %vm2497_vm9, %v3332_v11 }
 0xc7b   : > { %4399 = vmatprep.mubr.msk.bf16.mxu0 %vm4560_vm2, %v4559_v17 }
 0xcaf   : > { %v2554_v9 = vpop.f32.mrb[48].mxu0 }
 0xcb0   : > { %2560 = vst.msk [vmem:[#allocation3] sm:$0xff] %vm1196_vm3, %v2554_v9  ;;  %v4301_v0 = vpop.f32.mrb[49].mxu0 }
 0xcb1   : > { %v2557_v12 = vpop.f32.mrb[50].mxu0  ;;  %v4461_v0 = vld [vmem:[%s4797_s1] sm:$0xff]  }
 0xcb2   : > { %v4302_v13 = vpop.f32.mrb[51].mxu0  ;;  %4396 = vmatpush3.bf16.msra.mxu0 %v4461_v0  ;;  %v4462_v12 = vld [vmem:[%s4797_s1 + $0x8] sm:$0xff]   ;;  %s5517_s1 = scalar_lea.vmem %s5441_s18, %s4713_s27 }
 0xcb3   : > { %4397 = vmatprep.subr.bf16.mxu0 %v4559_v17 }
 0xcb6   : > { %4398 = vmatpush3.bf16.msra.mxu0 %v4462_v12 }
 0xcb7   : > { %v2679_v14 = vpop.f32.mrb[52].mxu0 }
 0xcb8   : > { %2685 = vst.msk [vmem:[#allocation3 + $0x8] sm:$0xff] %vm1196_vm3, %v2679_v14  ;;  %v4313_v15 = vpop.f32.mrb[53].mxu0 }
 0xcb9   : > { %v2682_v16 = vpop.f32.mrb[54].mxu0 }
 0xcba   : > { %v4314_v19 = vpop.f32.mrb[55].mxu0 }
 0xcf4   : > { %v2794_v18 = vpop.f32.mrb[56].mxu0 }
 0xcf5   : > { %2801 = vrot.lane.b32.xlu1 %v2794_v18, %s4572_s8  ;;  %v4325_v20 = vpop.f32.mrb[57].mxu0 }
 0xcf6   : > { %v2797_v22 = vpop.f32.mrb[58].mxu0 }
 0xcf7   : > { %v4326_v23 = vpop.f32.mrb[59].mxu0 }
 0xcf8   : > { %v4035_v23 = vld [vmem:[%s5517_s1] ss:$0 sm:$0xff] }
 0xd00   : > { %v2911_v25 = vpop.f32.mrb[60].mxu0 }
 0xd01   : > { %2918 = vrot.lane.b32.xlu1 %v2911_v25, %s4572_s8  ;;  %v4337_v2 = vpop.f32.mrb[61].mxu0  ;;  %s5515_s8 = sld [smem:[#allocation21_spill]] }
 0xd02   : > { %v2914_v27 = vpop.f32.mrb[62].mxu0 }
 0xd03   : > { %v4338_v26 = vpop.f32.mrb[63].mxu0 }
 0xd04   : > { %v4036_v26 = vld [vmem:[%s1042_s12] ss:$0 sm:$0xff] }
 0xd08   : > { %v3027_v28 = vpop.f32.mrb[64].mxu0 }
 0xd09   : > { %3034 = vrot.lane.b32.xlu1 %v3027_v28, %s4573_s4  ;;  %v4349_v29 = vpop.f32.mrb[65].mxu0 }
 0xd0a   : > { %v3030_v30 = vpop.f32.mrb[66].mxu0 }
 0xd0b   : > { %v4350_v3 = vpop.f32.mrb[67].mxu0 }
 0xd3d   : > { %v3143_v31 = vpop.f32.mrb[68].mxu0 }
 0xd3e   : > { %3150 = vrot.lane.b32.xlu1 %v3143_v31, %s4573_s4  ;;  %v4361_v32 = vpop.f32.mrb[69].mxu0  ;;  %s5516_s4 = scalar_lea.vmem %s5515_s8, %s4713_s27  ;;  %v4463_v31 = vld [vmem:[%s4807_s17] sm:$0xff]  }
 0xd3f   : > { %v3146_v33 = vpop.f32.mrb[70].mxu0  ;;  %v4034_v58 = vld [vmem:[%s5516_s4] ss:$0 sm:$0xff]  ;;  %v4464_v32 = vld [vmem:[%s4807_s17 + $0x8] sm:$0xff]  }
 0xd40   : > { %v4362_v34 = vpop.f32.mrb[71].mxu0  ;;  %v4465_v33 = vld [vmem:[%s4807_s17 + $0x10] sm:$0xff]  }
 0xd41   : > { %v4466_v34 = vld [vmem:[%s4807_s17 + $0x18] sm:$0xff]  }
 0xd45   : > { %v3259_v37 = vpop.f32.mrb[72].mxu0 }
 0xd46   : > { %3266 = vrot.lane.b32.xlu0 %v3259_v37, %s4574_s14  ;;  %v4373_v38 = vpop.f32.mrb[73].mxu0  ;;  %v4469_v37 = vld [vmem:[%s4807_s17 + $0x30] sm:$0xff]  }
 0xd47   : > { %v3262_v39 = vpop.f32.mrb[74].mxu0  ;;  %v4470_v38 = vld [vmem:[%s4807_s17 + $0x38] sm:$0xff]  }
 0xd48   : > { %v4374_v40 = vpop.f32.mrb[75].mxu0  ;;  %v4037_v39 = vld [vmem:[%s1050_s0] ss:$0 sm:$0xff] }
 0xd4d   : > { %v3375_v42 = vpop.f32.mrb[76].mxu0 }
 0xd4e   : > { %3382 = vrot.lane.b32.xlu1 %v3375_v42, %s4574_s14  ;;  %v4385_v45 = vpop.f32.mrb[77].mxu0 }
 0xd4f   : > { %v3378_v46 = vpop.f32.mrb[78].mxu0 }
 0xd50   : > { %v4386_v47 = vpop.f32.mrb[79].mxu0 }
 0xd67   : > { %v2802_v48 = vpop.permute.xlu1 %2801 }
 0xd68   : > { %2804 = vst.msk [vmem:[#allocation3] sm:$0xff] %vm1536_vm6, %v2802_v48 }
 0xd73   : > { %v2919_v61 = vpop.permute.xlu1 %2918 }
 0xd74   : > { %2921 = vst.msk [vmem:[#allocation3 + $0x8] sm:$0xff] %vm1536_vm6, %v2919_v61 }
 0xd7b   : > { %v3035_v49 = vpop.permute.xlu1 %3034 }
 0xd7c   : > { %3037 = vst.msk [vmem:[#allocation3] sm:$0xff] %vm1771_vm7, %v3035_v49 }
 0xdb0   : > { %v3151_v52 = vpop.permute.xlu1 %3150 }
 0xdb1   : > { %3153 = vst.msk [vmem:[#allocation3 + $0x8] sm:$0xff] %vm1771_vm7, %v3151_v52 }
 0xdb8   : > { %v3267_v50 = vpop.permute.xlu0 %3266 }
 0xdb9   : > { %3269 = vst.msk [vmem:[#allocation3] sm:$0xff] %vm2006_vm8, %v3267_v50 }
 0xdc0   : > { %v3383_v53 = vpop.permute.xlu1 %3382  ;;  %v3386_v54 = vld [vmem:[#allocation3] sm:$0xff] }
 0xdc1   : > { %3385 = vst.msk [vmem:[#allocation3 + $0x8] sm:$0xff] %vm2006_vm8, %v3383_v53 }
 0xdc8   : > { %v3387_v55 = vld [vmem:[#allocation3 + $0x8] sm:$0xff] }
 0xdc9   : > { %v3392_v56 = vpack.c.bf16 %v3387_v55, %v3386_v54 }
 0xdcb   : > { %4392 = vmatmul.mubr.msk.bf16.vlgmr.msra.gmra.mrb[68].mxu1 %vm1075_vm1, %v3392_v56 }
 0xdcc   : > { %4419 = vmatprep.mubr.msk.bf16.mxu1 %vm4560_vm2, %v4559_v17  ;;  %4404 = vmatpush3.bf16.msra.mxu1 %v4463_v31 }
 0xdcd   : > { %4405 = vmatprep.subr.bf16.mxu1 %v4559_v17 }
 0xdd0   : > { %4406 = vmatpush3.bf16.msra.mxu1 %v4464_v32 }
 0xdd1   : > { %4407 = vmatprep.subr.bf16.mxu1 %v4559_v17 }
 0xdd4   : > { %4408 = vmatpush3.bf16.msra.mxu1 %v4465_v33 }
 0xdd5   : > { %4409 = vmatprep.subr.bf16.mxu1 %v4559_v17 }
 0xdd8   : > { %4410 = vmatpush3.bf16.msra.mxu1 %v4466_v34 }
 0xdd9   : > { %4411 = vmatprep.subr.bf16.mxu1 %v4559_v17 }
 0xddc   : > { %4412 = vmatpush3.bf16.msra.mxu1 %v4467_v35 }
 0xddd   : > { %4413 = vmatprep.subr.bf16.mxu1 %v4559_v17 }
 0xde0   : > { %4414 = vmatpush3.bf16.msra.mxu1 %v4468_v36 }
 0xde1   : > { %4415 = vmatprep.subr.bf16.mxu1 %v4559_v17 }
 0xde4   : > { %4416 = vmatpush3.bf16.msra.mxu1 %v4469_v37 }
 0xde5   : > { %4417 = vmatprep.subr.bf16.mxu1 %v4559_v17 }
 0xde8   : > { %4418 = vmatpush3.bf16.msra.mxu1 %v4470_v38 }
 0xe9e   : > { %v3442_v57 = vpop.f32.mrb[68].mxu1 }
 0xe9f   : > { %v3449_v59 = vadd.f32 %v3442_v57, %v5090_v21  ;;  %v4393_v41 = vpop.f32.mrb[69].mxu1 }
 0xea0   : > { %v3445_v43 = vpop.f32.mrb[70].mxu1 }
 0xea1   : > { %v5355_v44 = vadd.f32 %v4034_v58, %v3449_v59  ;;  %v3450_v60 = vadd.f32 %v3445_v43, %v5093_v24  ;;  %v4394_v62 = vpop.f32.mrb[71].mxu1 }
 0xea3   : > { %v5358_v51 = vadd.f32 %v4034_v58, %v3450_v60  ;;  %v3462_v63 = vsel %vm1075_vm1, %v5355_v44, 0.0 }
 0xea4   : > { %3463 = vadd.xlane.f32.xlu0 %v3462_v63 }
 0xea5   : > { %v3465_v1 = vsel %vm1075_vm1, %v5358_v51, 0.0 }
 0xea6   : > { %3466 = vadd.xlane.f32.xlu1 %v3465_v1 }
 0xf31   : > { %v3464_v21 = vpop.xlane.xlu0 %3463 }
 0xf32   : > { %v3468_v4 = vmul.f32 0.03125, %v3464_v21 }
 0xf33   : > { %v3467_v6 = vpop.xlane.xlu1 %3466 }
 0xf34   : > { %v3470_v7 = vsub.f32 %v5355_v44, %v3468_v4  ;;  %v3469_v8 = vmul.f32 0.03125, %v3467_v6  ;;  %v4049_v6 = vld [vmem:[%s1058_s28] ss:$0 sm:$0xff]  ;;  %s5521_s28 = sld [smem:[#allocation26_spill]] (!%p4050_p5) }
 0xf36   : > { %v3471_v24 = vsub.f32 %v5358_v51, %v3469_v8  ;;  %v3472_v5 = vmul.f32 %v3470_v7, %v3470_v7 }
 0xf38   : > { %v3474_v10 = vsel %vm1075_vm1, %v3472_v5, 0.0  ;;  %v3473_v11 = vmul.f32 %v3471_v24, %v3471_v24 }
 0xf39   : > { %3475 = vadd.xlane.f32.xlu0 %v3474_v10 }
 0xf3a   : > { %v3477_v9 = vsel %vm1075_vm1, %v3473_v11, 0.0 }
 0xf3d   : > { %3478 = vadd.xlane.f32.xlu0 %v3477_v9 }
 0xfc6   : > { %v3476_v13 = vpop.xlane.xlu0 %3475 }
 0xfc7   : > { %v3480_v14 = vmul.f32 0.03125, %v3476_v13 }
 0xfc9   : > { %v3482_v15 = vadd.f32 1e-05, %v3480_v14 }
 0xfca   : > { %v3479_v16 = vpop.xlane.xlu0 %3478 }
 0xfcb   : > { %4543 = vrsqrt.f32 %v3482_v15  ;;  %v3481_v19 = vmul.f32 0.03125, %v3479_v16 }
 0xfcd   : > { %v3483_v18 = vadd.f32 1e-05, %v3481_v19 }
 0xfcf   : > { %4545 = vrsqrt.f32 %v3483_v18 }
 0xfd5   : > { %v4544_v20 = vpop.eup %4543 }
 0xfd6   : > { %v3486_v22 = vmul.f32 %v4544_v20, %v3470_v7 }
 0xfd8   : > { %v3494_v2 = vmul.f32 %v4035_v23, %v3486_v22 }
 0xfd9   : > { %v4546_v25 = vpop.eup %4545 }
 0xfda   : > { %v3487_v27 = vmul.f32 %v4546_v25, %v3471_v24  ;;  %v3502_v29 = vadd.f32 %v4036_v26, %v3494_v2 }
 0xfdc   : > { %v3495_v28 = vmul.f32 %v4035_v23, %v3487_v27 }
 0xfde   : > { %v3503_v30 = vadd.f32 %v4036_v26, %v3495_v28 }
 0xfe0   : > { %v3508_v3 = vpack.c.bf16 %v3503_v30, %v3502_v29 }
 0xfe2   : > { %4400 = vmatmul.mubr.msk.bf16.vlgmr.msra.gmra.mrb[80].mxu0 %vm1075_vm1, %v3508_v3 }
0x10b5   : > { %v3565_v40 = vpop.f32.mrb[80].mxu0 }
0x10b6   : > { %v3566_v42 = vadd.f32 %v4037_v39, %v3565_v40  ;;  %v4401_v45 = vpop.f32.mrb[81].mxu0 }
0x10b7   : > { %v3568_v46 = vpop.f32.mrb[82].mxu0 }
0x10b8   : > { %v3574_v47 = vmul.f32 0.044715, %v3566_v42  ;;  %v3569_v48 = vadd.f32 %v4037_v39, %v3568_v46  ;;  %v4402_v61 = vpop.f32.mrb[83].mxu0  ;;  %v3572_v43 = vmul.f32 0.5, %v3566_v42 }
0x10ba   : > { %v3576_v49 = vmul.f32 %v3574_v47, %v3566_v42  ;;  %v3575_v52 = vmul.f32 0.044715, %v3569_v48  ;;  %v3573_v60 = vmul.f32 0.5, %v3569_v48 }
0x10bc   : > { %v3578_v50 = vmul.f32 %v3576_v49, %v3566_v42  ;;  %v3577_v53 = vmul.f32 %v3575_v52, %v3569_v48 }
0x10be   : > { %v3580_v54 = vadd.f32 %v3578_v50, %v3566_v42  ;;  %v3579_v55 = vmul.f32 %v3577_v53, %v3569_v48 }
0x10c0   : > { %v3582_v17 = vmul.f32 0.7978846, %v3580_v54  ;;  %v3581_v56 = vadd.f32 %v3579_v55, %v3569_v48 }
0x10c2   : > { %4547 = vtanh.f32 %v3582_v17  ;;  %v3583_v57 = vmul.f32 0.7978846, %v3581_v56 }
0x10c4   : > { %4549 = vtanh.f32 %v3583_v57 }
0x10cc   : > { %v4548_v58 = vpop.eup %4547 }
0x10cd   : > { %v3586_v59 = vadd.f32 1.0, %v4548_v58 }
0x10ce   : > { %v4550_v41 = vpop.eup %4549 }
0x10cf   : > { %v3587_v62 = vadd.f32 1.0, %v4550_v41  ;;  %v3588_v63 = vmul.f32 %v3586_v59, %v3572_v43 }
0x10d1   : > { %v3589_v1 = vmul.f32 %v3587_v62, %v3573_v60 }
0x10d3   : > { %v3606_v21 = vpack.c.bf16 %v3589_v1, %v3588_v63 }
0x10d5   : > { %4420 = vmatmul.mubr.bf16.vlgmr.msra.gmra.mrb[72].mxu1 %v3606_v21 }
0x11a8   : > { %v3689_v4 = vpop.f32.mrb[72].mxu1 }
0x11a9   : > { %v3696_v7 = vadd.f32 %v3689_v4, %v5355_v44  ;;  %v4421_v8 = vpop.f32.mrb[73].mxu1  ;;  %3712 = sbr.rel (%p4050_p5) target bundleno = 4528 (0x11b0), region = 124 }
0x11aa   : > { %v3692_v24 = vpop.f32.mrb[74].mxu1 }
0x11ab   : > { %v3705_v5 = vadd.f32 %v4049_v6, %v3696_v7  ;;  %v3697_v10 = vadd.f32 %v3692_v24, %v5358_v51  ;;  %v4422_v11 = vpop.f32.mrb[75].mxu1 }
0x11ad   : > { %3707 = vst.msk [vmem:[#allocation2] sm:$0xff] %vm1075_vm1, %v3705_v5  ;;  %v3706_v9 = vadd.f32 %v4049_v6, %v3697_v10  ;;  %3713 = vst.msk [vmem:[%s5521_s28] sm:$0xff] (!%p4050_p5), %vm1075_vm1, %v3705_v5 }
0x11af   : > { %3708 = vst.msk [vmem:[#allocation2 + $0x8] sm:$0xff] %vm1075_vm1, %v3706_v9  ;;  %3714 = vst.msk [vmem:[%s5521_s28 + $0x8] sm:$0xff] (!%p4050_p5), %vm1075_vm1, %v3706_v9 }
0x11b0 PF: > { %s5522_s7 = sld [smem:[#allocation4_spill]] }
0x11b6   : > { %s34_s5 = sadd.s32 1, %s5522_s7  }
0x11b7   : > { %p31_p6 = scmp.ge.s32.totalorder %s34_s5, 4  }
0x11b9   :  { %33 = sbr.rel (!%p31_p6) target bundleno = 21 (0x15), region = 213 }

</bundles_post_ra>
